<compile_context>
chip_gen: v7x
topology: tpu7x:2x2x1
jax: 0.10.0
libtpu: 0.0.40
codegen_flags: <defaults>
</compile_context>

<pallas_src>
import functools

import numpy as np
import jax
import jax.numpy as jnp
from jax.experimental import pallas as pl
from jax.experimental.pallas import tpu as pltpu

NUM_CLASSES = 6
HEADS = 2
FC_PAD = 128  # lane-dense classifier output width (sliced to NUM_CLASSES outside)


# ----------------------- constant 3x3 tap-selection matrices -----------------------

def _dw_selection(size, stride):
    """Flattened 0/1 token-selection matrix for a 3x3, pad=1 depthwise conv.

    sel[t*No + m, n] = 1 iff output token m=(i,j) at tap t=(dy*3+dx) reads input
    token n=(stride*i+dy-1, stride*j+dx-1); out-of-bounds taps stay 0 (== zero pad).
    Shape: (9 * (size//stride)**2, size*size).
    """
    so = size // stride
    sel = np.zeros((9, so * so, size * size), np.float32)
    for dy in range(3):
        for dx in range(3):
            t = dy * 3 + dx
            for i in range(so):
                for j in range(so):
                    h = stride * i + dy - 1
                    w = stride * j + dx - 1
                    if 0 <= h < size and 0 <= w < size:
                        sel[t, i * so + j, h * size + w] = 1.0
    return jnp.asarray(sel.reshape(9 * so * so, size * size))


# --------------------------------- fused kernel ------------------------------------

def _effnet_kernel(stem_cols_ref, sel1_ref, sel2_ref,
                   stem_w_ref, stem_b_ref,
                   mb1_exp_w_ref, mb1_exp_b_ref, mb1_dw_w_ref,
                   mb1_proj_w_ref, mb1_proj_b_ref,
                   qkv_w_ref, qkv_b_ref, attn_proj_w_ref, attn_proj_b_ref,
                   ffn_exp_w_ref, ffn_exp_b_ref, ffn_dw_w_ref,
                   ffn_proj_w_ref, ffn_proj_b_ref,
                   head_w_ref, head_b_ref, fc_w_ref, fc_b_ref,
                   out_ref, *, heads):
    f32 = jnp.float32

    def mm(a, w, b=None, act=None):
        y = jnp.dot(a, w, preferred_element_type=f32)
        if b is not None:
            y = y + b
        if act == "gelu":
            y = jax.nn.gelu(y)
        return y

    def dwconv_gelu(x, sel_ref, w_ref):
        # 3x3 depthwise conv (any stride, pad=1): ONE big selection matmul
        # producing all 9 taps at once, then per-tap/per-channel weighted sum.
        n_out = sel_ref.shape[0] // 9
        taps = jnp.dot(sel_ref[...], x, preferred_element_type=f32)   # (9*No, C)
        acc = jnp.zeros((n_out, x.shape[-1]), f32)
        for t in range(9):                                            # static unroll
            acc = acc + taps[t * n_out:(t + 1) * n_out] * w_ref[t]    # (1, C) bcast
        return jax.nn.gelu(acc)

    # Stem 3x3/s2 conv as a single im2col matmul (+ GELU).
    x = mm(stem_cols_ref[0], stem_w_ref[...], stem_b_ref[...], "gelu")     # (256, 16)

    # MBConv downsample: 1x1 expand + GELU, 3x3/s2 depthwise + GELU, 1x1 project.
    x = mm(x, mb1_exp_w_ref[...], mb1_exp_b_ref[...], "gelu")              # (256, 32)
    x = dwconv_gelu(x, sel1_ref, mb1_dw_w_ref)                             # (64, 32)
    x = mm(x, mb1_proj_w_ref[...], mb1_proj_b_ref[...])                    # (64, 32)

    # ReLU linear-attention block (residual). Per-head weights are pre-split,
    # so head handling is just leading-dim indexing; the output projection of
    # the concatenated heads == sum over per-head projections.
    attn = attn_proj_b_ref[...]                                            # (1, C)
    for h in range(heads):
        q = jnp.maximum(mm(x, qkv_w_ref[h], qkv_b_ref[h]), 0.0)            # (N, dh)
        k = jnp.maximum(mm(x, qkv_w_ref[heads + h], qkv_b_ref[heads + h]), 0.0)
        v = mm(x, qkv_w_ref[2 * heads + h], qkv_b_ref[2 * heads + h])
        kv = jnp.dot(k.T, v, preferred_element_type=f32)                   # (dh, dh)
        ksum = jnp.sum(k, axis=0, keepdims=True)                           # (1, dh)
        num = jnp.dot(q, kv, preferred_element_type=f32)                   # (N, dh)
        den = jnp.sum(q * ksum, axis=-1, keepdims=True)                    # (N, 1)
        scaled = num * pl.reciprocal(den + 1e-6, approx=True)              # EUP slot
        attn = attn + jnp.dot(scaled, attn_proj_w_ref[h],
                              preferred_element_type=f32)                  # (N, C)
    x = x + attn                                                           # residual

    # MBConv FFN block (residual).
    y = mm(x, ffn_exp_w_ref[...], ffn_exp_b_ref[...], "gelu")              # (64, 64)
    y = dwconv_gelu(y, sel2_ref, ffn_dw_w_ref)                             # (64, 64)
    y = mm(y, ffn_proj_w_ref[...], ffn_proj_b_ref[...])                    # (64, 32)
    x = x + y

    # Head: 1x1 conv + GELU, global average pool, classifier (lane-padded to 128).
    feat = mm(x, head_w_ref[...], head_b_ref[...], "gelu")                 # (64, 64)
    pooled = jnp.mean(feat, axis=0, keepdims=True)                         # (1, 64)
    out_ref[0] = mm(pooled, fc_w_ref[...], fc_b_ref[...])                  # (1, 128)


# ------------------------------------ params ---------------------------------------

def _init(key, shape, scale=0.1):
    return scale * jax.random.normal(key, shape, jnp.float32)


def init_params(key):
    ks = jax.random.split(key, 12)
    C1, C2, Ce, Cf, Ch = 16, 32, 32, 64, 64
    p = {}
    p["stem_w"] = _init(ks[0], (3, 3, 3, C1));      p["stem_b"] = jnp.zeros((C1,), jnp.float32)
    p["mb1_exp_w"] = _init(ks[1], (C1, Ce));        p["mb1_exp_b"] = jnp.zeros((Ce,), jnp.float32)
    p["mb1_dw_w"] = _init(ks[2], (3, 3, Ce))
    p["mb1_proj_w"] = _init(ks[3], (Ce, C2));       p["mb1_proj_b"] = jnp.zeros((C2,), jnp.float32)
    p["attn_qkv_w"] = _init(ks[4], (C2, 3 * C2));   p["attn_qkv_b"] = jnp.zeros((3 * C2,), jnp.float32)
    p["attn_proj_w"] = _init(ks[5], (C2, C2));      p["attn_proj_b"] = jnp.zeros((C2,), jnp.float32)
    p["ffn_exp_w"] = _init(ks[6], (C2, Cf));        p["ffn_exp_b"] = jnp.zeros((Cf,), jnp.float32)
    p["ffn_dw_w"] = _init(ks[7], (3, 3, Cf))
    p["ffn_proj_w"] = _init(ks[8], (Cf, C2));       p["ffn_proj_b"] = jnp.zeros((C2,), jnp.float32)
    p["head_conv_w"] = _init(ks[9], (C2, Ch));      p["head_conv_b"] = jnp.zeros((Ch,), jnp.float32)
    p["fc_w"] = _init(ks[10], (Ch, NUM_CLASSES));   p["fc_b"] = jnp.zeros((NUM_CLASSES,), jnp.float32)
    return p


# ------------------------------------ forward --------------------------------------

def effnet_forward(params, x_nchw, heads=HEADS):
    p = params
    B = x_nchw.shape[0]
    C1 = p["stem_w"].shape[-1]
    C2 = p["mb1_proj_w"].shape[-1]
    Ch = p["head_conv_w"].shape[-1]
    dh = C2 // heads

    # ---- XLA-side prep (tiny, one-time): NCHW->NHWC + stem 3x3/s2 im2col ----
    x = jnp.transpose(x_nchw, (0, 2, 3, 1)).astype(jnp.float32)            # (B,32,32,3)
    _, H, W, Cin = x.shape
    Ho, Wo = H // 2, W // 2
    xp = jnp.pad(x, ((0, 0), (1, 1), (1, 1), (0, 0)))
    cols = [xp[:, dy:dy + H:2, dx:dx + W:2, :]
            for dy in range(3) for dx in range(3)]                         # 9 x (B,Ho,Wo,3)
    stem_cols = jnp.concatenate(cols, axis=-1).reshape(B, Ho * Wo, 9 * Cin)

    # ---- trace-time constants: tap-selection matrices & packed weights ----
    sel1 = _dw_selection(Ho, 2)                  # (9*64, 256) stride-2 dw conv
    sel2 = _dw_selection(Ho // 2, 1)             # (9*64, 64)  stride-1 dw conv

    stem_w = p["stem_w"].reshape(9 * Cin, C1)
    mb1_dw_w = p["mb1_dw_w"].reshape(9, 1, -1)
    ffn_dw_w = p["ffn_dw_w"].reshape(9, 1, -1)
    # qkv weight columns are (s, h, d)-major; split into per-(s,h) (C2, dh) blocks.
    qkv_w = jnp.transpose(p["attn_qkv_w"].reshape(C2, 3, heads, dh),
                          (1, 2, 0, 3)).reshape(3 * heads, C2, dh)
    qkv_b = p["attn_qkv_b"].reshape(3 * heads, 1, dh)
    attn_proj_w = p["attn_proj_w"].reshape(heads, dh, C2)
    # Lane-dense classifier: zero-pad to FC_PAD output lanes (unmasked final vst).
    fc_w = jnp.pad(p["fc_w"], ((0, 0), (0, FC_PAD - NUM_CLASSES)))         # (Ch, 128)
    fc_b = jnp.pad(p["fc_b"], ((0, FC_PAD - NUM_CLASSES),)).reshape(1, FC_PAD)

    def b2(v):                                   # (N,) bias -> (1, N)
        return v.reshape(1, -1)

    consts = [
        sel1, sel2,
        stem_w, b2(p["stem_b"]),
        p["mb1_exp_w"], b2(p["mb1_exp_b"]), mb1_dw_w,
        p["mb1_proj_w"], b2(p["mb1_proj_b"]),
        qkv_w, qkv_b, attn_proj_w, b2(p["attn_proj_b"]),
        p["ffn_exp_w"], b2(p["ffn_exp_b"]), ffn_dw_w,
        p["ffn_proj_w"], b2(p["ffn_proj_b"]),
        p["head_conv_w"], b2(p["head_conv_b"]),
        fc_w, fc_b,
    ]

    def const_spec(a):
        nd = a.ndim
        return pl.BlockSpec(a.shape, lambda b, _nd=nd: (0,) * _nd)

    out = pl.pallas_call(
        functools.partial(_effnet_kernel, heads=heads),
        out_shape=jax.ShapeDtypeStruct((B, 1, FC_PAD), jnp.float32),
        grid=(B,),
        in_specs=[pl.BlockSpec((1, Ho * Wo, 9 * Cin), lambda b: (b, 0, 0))]
                 + [const_spec(a) for a in consts],
        out_specs=pl.BlockSpec((1, 1, FC_PAD), lambda b: (b, 0, 0)),
        compiler_params=pltpu.CompilerParams(dimension_semantics=("parallel",)),
    )(stem_cols, *consts)
    return out.reshape(B, FC_PAD)[:, :NUM_CLASSES]


if __name__ == "__main__":
    key = jax.random.PRNGKey(0)
    pkey, xkey = jax.random.split(key)
    params = init_params(pkey)
    x = jax.random.normal(xkey, (2, 3, 32, 32), jnp.float32)   # NCHW, like PyTorch input
    fwd = jax.jit(functools.partial(effnet_forward, params))
    out = fwd(x)
    jax.block_until_ready(out)
    assert out.shape == (2, NUM_CLASSES)
    print("KERNEL_OK")
</pallas_src>

<mosaic_0001>
module attributes {stable_mosaic.version = 11 : i64} {
  func.func @_effnet_kernel(%arg0: i32, %arg1: memref<1x256x27xf32, #tpu.memory_space<vmem>>, %arg2: memref<576x256xf32, #tpu.memory_space<vmem>>, %arg3: memref<576x64xf32, #tpu.memory_space<vmem>>, %arg4: memref<27x16xf32, #tpu.memory_space<vmem>>, %arg5: memref<1x16xf32, #tpu.memory_space<vmem>>, %arg6: memref<16x32xf32, #tpu.memory_space<vmem>>, %arg7: memref<1x32xf32, #tpu.memory_space<vmem>>, %arg8: memref<9x1x32xf32, #tpu.memory_space<vmem>>, %arg9: memref<32x32xf32, #tpu.memory_space<vmem>>, %arg10: memref<1x32xf32, #tpu.memory_space<vmem>>, %arg11: memref<6x32x16xf32, #tpu.memory_space<vmem>>, %arg12: memref<6x1x16xf32, #tpu.memory_space<vmem>>, %arg13: memref<2x16x32xf32, #tpu.memory_space<vmem>>, %arg14: memref<1x32xf32, #tpu.memory_space<vmem>>, %arg15: memref<32x64xf32, #tpu.memory_space<vmem>>, %arg16: memref<1x64xf32, #tpu.memory_space<vmem>>, %arg17: memref<9x1x64xf32, #tpu.memory_space<vmem>>, %arg18: memref<64x32xf32, #tpu.memory_space<vmem>>, %arg19: memref<1x32xf32, #tpu.memory_space<vmem>>, %arg20: memref<32x64xf32, #tpu.memory_space<vmem>>, %arg21: memref<1x64xf32, #tpu.memory_space<vmem>>, %arg22: memref<64x128xf32, #tpu.memory_space<vmem>>, %arg23: memref<1x128xf32, #tpu.memory_space<vmem>>, %arg24: memref<1x1x128xf32, #tpu.memory_space<vmem>>) attributes {dimension_semantics = [#tpu.dimension_semantics<parallel>], iteration_bounds = array<i64: 2>, scalar_prefetch = 0 : i64, scratch_operands = 0 : i64, tpu.core_type = #tpu.core_type<tc>, window_params = [{transform_indices = @transform_0, window_bounds = array<i64: 1, 256, 27>}, {pipeline_mode = #tpu.pipeline_mode<synchronous>, transform_indices = @transform_1, window_bounds = array<i64: 576, 256>}, {pipeline_mode = #tpu.pipeline_mode<synchronous>, transform_indices = @transform_2, window_bounds = array<i64: 576, 64>}, {pipeline_mode = #tpu.pipeline_mode<synchronous>, transform_indices = @transform_3, window_bounds = array<i64: 27, 16>}, {pipeline_mode = #tpu.pipeline_mode<synchronous>, transform_indices = @transform_4, window_bounds = array<i64: 1, 16>}, {pipeline_mode = #tpu.pipeline_mode<synchronous>, transform_indices = @transform_5, window_bounds = array<i64: 16, 32>}, {pipeline_mode = #tpu.pipeline_mode<synchronous>, transform_indices = @transform_6, window_bounds = array<i64: 1, 32>}, {pipeline_mode = #tpu.pipeline_mode<synchronous>, transform_indices = @transform_7, window_bounds = array<i64: 9, 1, 32>}, {pipeline_mode = #tpu.pipeline_mode<synchronous>, transform_indices = @transform_8, window_bounds = array<i64: 32, 32>}, {pipeline_mode = #tpu.pipeline_mode<synchronous>, transform_indices = @transform_9, window_bounds = array<i64: 1, 32>}, {pipeline_mode = #tpu.pipeline_mode<synchronous>, transform_indices = @transform_10, window_bounds = array<i64: 6, 32, 16>}, {pipeline_mode = #tpu.pipeline_mode<synchronous>, transform_indices = @transform_11, window_bounds = array<i64: 6, 1, 16>}, {pipeline_mode = #tpu.pipeline_mode<synchronous>, transform_indices = @transform_12, window_bounds = array<i64: 2, 16, 32>}, {pipeline_mode = #tpu.pipeline_mode<synchronous>, transform_indices = @transform_13, window_bounds = array<i64: 1, 32>}, {pipeline_mode = #tpu.pipeline_mode<synchronous>, transform_indices = @transform_14, window_bounds = array<i64: 32, 64>}, {pipeline_mode = #tpu.pipeline_mode<synchronous>, transform_indices = @transform_15, window_bounds = array<i64: 1, 64>}, {pipeline_mode = #tpu.pipeline_mode<synchronous>, transform_indices = @transform_16, window_bounds = array<i64: 9, 1, 64>}, {pipeline_mode = #tpu.pipeline_mode<synchronous>, transform_indices = @transform_17, window_bounds = array<i64: 64, 32>}, {pipeline_mode = #tpu.pipeline_mode<synchronous>, transform_indices = @transform_18, window_bounds = array<i64: 1, 32>}, {pipeline_mode = #tpu.pipeline_mode<synchronous>, transform_indices = @transform_19, window_bounds = array<i64: 32, 64>}, {pipeline_mode = #tpu.pipeline_mode<synchronous>, transform_indices = @transform_20, window_bounds = array<i64: 1, 64>}, {pipeline_mode = #tpu.pipeline_mode<synchronous>, transform_indices = @transform_21, window_bounds = array<i64: 64, 128>}, {pipeline_mode = #tpu.pipeline_mode<synchronous>, transform_indices = @transform_22, window_bounds = array<i64: 1, 128>}, {transform_indices = @transform_23, window_bounds = array<i64: 1, 1, 128>}]} {
    %c0 = arith.constant 0 : index
    %c0_0 = arith.constant 0 : index
    %c0_1 = arith.constant 0 : index
    %0 = vector.load %arg1[%c0, %c0_0, %c0_1] : memref<1x256x27xf32, #tpu.memory_space<vmem>>, vector<1x256x27xf32>
    %1 = vector.shape_cast %0 : vector<1x256x27xf32> to vector<256x27xf32>
    %c0_2 = arith.constant 0 : index
    %c0_3 = arith.constant 0 : index
    %2 = vector.load %arg4[%c0_2, %c0_3] : memref<27x16xf32, #tpu.memory_space<vmem>>, vector<27x16xf32>
    %c0_4 = arith.constant 0 : index
    %c0_5 = arith.constant 0 : index
    %3 = vector.load %arg5[%c0_4, %c0_5] : memref<1x16xf32, #tpu.memory_space<vmem>>, vector<1x16xf32>
    %cst = arith.constant dense<0.000000e+00> : vector<256x16xf32>
    %4 = tpu.matmul %1, %2, %cst {dimension_numbers = #tpu.dot_dimension_numbers<[1], [0], [0], [1], [0, 0, 1, 1], [], []>} : vector<256x27xf32>, vector<27x16xf32>, vector<256x16xf32> -> vector<256x16xf32>
    %5 = vector.broadcast %3 : vector<1x16xf32> to vector<256x16xf32>
    %6 = arith.addf %4, %5 : vector<256x16xf32>
    %7 = arith.mulf %6, %6 : vector<256x16xf32>
    %8 = arith.mulf %6, %7 : vector<256x16xf32>
    %cst_6 = arith.constant 4.471500e-02 : f32
    %9 = vector.broadcast %cst_6 : f32 to vector<256x16xf32>
    %10 = arith.mulf %9, %8 : vector<256x16xf32>
    %11 = arith.addf %6, %10 : vector<256x16xf32>
    %cst_7 = arith.constant 0.797884583 : f32
    %12 = vector.broadcast %cst_7 : f32 to vector<256x16xf32>
    %13 = arith.mulf %12, %11 : vector<256x16xf32>
    %14 = math.tanh %13 : vector<256x16xf32>
    %cst_8 = arith.constant 1.000000e+00 : f32
    %15 = vector.broadcast %cst_8 : f32 to vector<256x16xf32>
    %16 = arith.addf %15, %14 : vector<256x16xf32>
    %cst_9 = arith.constant 5.000000e-01 : f32
    %17 = vector.broadcast %cst_9 : f32 to vector<256x16xf32>
    %18 = arith.mulf %17, %16 : vector<256x16xf32>
    %19 = arith.mulf %6, %18 : vector<256x16xf32>
    %c0_10 = arith.constant 0 : index
    %c0_11 = arith.constant 0 : index
    %20 = vector.load %arg6[%c0_10, %c0_11] : memref<16x32xf32, #tpu.memory_space<vmem>>, vector<16x32xf32>
    %c0_12 = arith.constant 0 : index
    %c0_13 = arith.constant 0 : index
    %21 = vector.load %arg7[%c0_12, %c0_13] : memref<1x32xf32, #tpu.memory_space<vmem>>, vector<1x32xf32>
    %cst_14 = arith.constant dense<0.000000e+00> : vector<256x32xf32>
    %22 = tpu.matmul %19, %20, %cst_14 {dimension_numbers = #tpu.dot_dimension_numbers<[1], [0], [0], [1], [0, 0, 1, 1], [], []>} : vector<256x16xf32>, vector<16x32xf32>, vector<256x32xf32> -> vector<256x32xf32>
    %23 = vector.broadcast %21 : vector<1x32xf32> to vector<256x32xf32>
    %24 = arith.addf %22, %23 : vector<256x32xf32>
    %25 = arith.mulf %24, %24 : vector<256x32xf32>
    %26 = arith.mulf %24, %25 : vector<256x32xf32>
    %cst_15 = arith.constant 4.471500e-02 : f32
    %27 = vector.broadcast %cst_15 : f32 to vector<256x32xf32>
    %28 = arith.mulf %27, %26 : vector<256x32xf32>
    %29 = arith.addf %24, %28 : vector<256x32xf32>
    %cst_16 = arith.constant 0.797884583 : f32
    %30 = vector.broadcast %cst_16 : f32 to vector<256x32xf32>
    %31 = arith.mulf %30, %29 : vector<256x32xf32>
    %32 = math.tanh %31 : vector<256x32xf32>
    %cst_17 = arith.constant 1.000000e+00 : f32
    %33 = vector.broadcast %cst_17 : f32 to vector<256x32xf32>
    %34 = arith.addf %33, %32 : vector<256x32xf32>
    %cst_18 = arith.constant 5.000000e-01 : f32
    %35 = vector.broadcast %cst_18 : f32 to vector<256x32xf32>
    %36 = arith.mulf %35, %34 : vector<256x32xf32>
    %37 = arith.mulf %24, %36 : vector<256x32xf32>
    %c0_19 = arith.constant 0 : index
    %c0_20 = arith.constant 0 : index
    %38 = vector.load %arg2[%c0_19, %c0_20] : memref<576x256xf32, #tpu.memory_space<vmem>>, vector<576x256xf32>
    %cst_21 = arith.constant dense<0.000000e+00> : vector<576x32xf32>
    %39 = tpu.matmul %38, %37, %cst_21 {dimension_numbers = #tpu.dot_dimension_numbers<[1], [0], [0], [1], [0, 0, 1, 1], [], []>} : vector<576x256xf32>, vector<256x32xf32>, vector<576x32xf32> -> vector<576x32xf32>
    %cst_22 = arith.constant 0.000000e+00 : f32
    %40 = vector.broadcast %cst_22 : f32 to vector<64x32xf32>
    %41 = vector.extract_strided_slice %39 {offsets = [0, 0], sizes = [64, 32], strides = [1, 1]} : vector<576x32xf32> to vector<64x32xf32>
    %c0_23 = arith.constant 0 : index
    %c0_24 = arith.constant 0 : index
    %c0_25 = arith.constant 0 : index
    %42 = vector.load %arg8[%c0_23, %c0_24, %c0_25] : memref<9x1x32xf32, #tpu.memory_space<vmem>>, vector<1x1x32xf32>
    %43 = vector.shape_cast %42 : vector<1x1x32xf32> to vector<1x32xf32>
    %44 = vector.broadcast %43 : vector<1x32xf32> to vector<64x32xf32>
    %45 = arith.mulf %41, %44 : vector<64x32xf32>
    %46 = arith.addf %40, %45 : vector<64x32xf32>
    %47 = vector.extract_strided_slice %39 {offsets = [64, 0], sizes = [64, 32], strides = [1, 1]} : vector<576x32xf32> to vector<64x32xf32>
    %c1 = arith.constant 1 : index
    %c0_26 = arith.constant 0 : index
    %c0_27 = arith.constant 0 : index
    %48 = vector.load %arg8[%c1, %c0_26, %c0_27] : memref<9x1x32xf32, #tpu.memory_space<vmem>>, vector<1x1x32xf32>
    %49 = vector.shape_cast %48 : vector<1x1x32xf32> to vector<1x32xf32>
    %50 = vector.broadcast %49 : vector<1x32xf32> to vector<64x32xf32>
    %51 = arith.mulf %47, %50 : vector<64x32xf32>
    %52 = arith.addf %46, %51 : vector<64x32xf32>
    %53 = vector.extract_strided_slice %39 {offsets = [128, 0], sizes = [64, 32], strides = [1, 1]} : vector<576x32xf32> to vector<64x32xf32>
    %c2 = arith.constant 2 : index
    %c0_28 = arith.constant 0 : index
    %c0_29 = arith.constant 0 : index
    %54 = vector.load %arg8[%c2, %c0_28, %c0_29] : memref<9x1x32xf32, #tpu.memory_space<vmem>>, vector<1x1x32xf32>
    %55 = vector.shape_cast %54 : vector<1x1x32xf32> to vector<1x32xf32>
    %56 = vector.broadcast %55 : vector<1x32xf32> to vector<64x32xf32>
    %57 = arith.mulf %53, %56 : vector<64x32xf32>
    %58 = arith.addf %52, %57 : vector<64x32xf32>
    %59 = vector.extract_strided_slice %39 {offsets = [192, 0], sizes = [64, 32], strides = [1, 1]} : vector<576x32xf32> to vector<64x32xf32>
    %c3 = arith.constant 3 : index
    %c0_30 = arith.constant 0 : index
    %c0_31 = arith.constant 0 : index
    %60 = vector.load %arg8[%c3, %c0_30, %c0_31] : memref<9x1x32xf32, #tpu.memory_space<vmem>>, vector<1x1x32xf32>
    %61 = vector.shape_cast %60 : vector<1x1x32xf32> to vector<1x32xf32>
    %62 = vector.broadcast %61 : vector<1x32xf32> to vector<64x32xf32>
    %63 = arith.mulf %59, %62 : vector<64x32xf32>
    %64 = arith.addf %58, %63 : vector<64x32xf32>
    %65 = vector.extract_strided_slice %39 {offsets = [256, 0], sizes = [64, 32], strides = [1, 1]} : vector<576x32xf32> to vector<64x32xf32>
    %c4 = arith.constant 4 : index
    %c0_32 = arith.constant 0 : index
    %c0_33 = arith.constant 0 : index
    %66 = vector.load %arg8[%c4, %c0_32, %c0_33] : memref<9x1x32xf32, #tpu.memory_space<vmem>>, vector<1x1x32xf32>
    %67 = vector.shape_cast %66 : vector<1x1x32xf32> to vector<1x32xf32>
    %68 = vector.broadcast %67 : vector<1x32xf32> to vector<64x32xf32>
    %69 = arith.mulf %65, %68 : vector<64x32xf32>
    %70 = arith.addf %64, %69 : vector<64x32xf32>
    %71 = vector.extract_strided_slice %39 {offsets = [320, 0], sizes = [64, 32], strides = [1, 1]} : vector<576x32xf32> to vector<64x32xf32>
    %c5 = arith.constant 5 : index
    %c0_34 = arith.constant 0 : index
    %c0_35 = arith.constant 0 : index
    %72 = vector.load %arg8[%c5, %c0_34, %c0_35] : memref<9x1x32xf32, #tpu.memory_space<vmem>>, vector<1x1x32xf32>
    %73 = vector.shape_cast %72 : vector<1x1x32xf32> to vector<1x32xf32>
    %74 = vector.broadcast %73 : vector<1x32xf32> to vector<64x32xf32>
    %75 = arith.mulf %71, %74 : vector<64x32xf32>
    %76 = arith.addf %70, %75 : vector<64x32xf32>
    %77 = vector.extract_strided_slice %39 {offsets = [384, 0], sizes = [64, 32], strides = [1, 1]} : vector<576x32xf32> to vector<64x32xf32>
    %c6 = arith.constant 6 : index
    %c0_36 = arith.constant 0 : index
    %c0_37 = arith.constant 0 : index
    %78 = vector.load %arg8[%c6, %c0_36, %c0_37] : memref<9x1x32xf32, #tpu.memory_space<vmem>>, vector<1x1x32xf32>
    %79 = vector.shape_cast %78 : vector<1x1x32xf32> to vector<1x32xf32>
    %80 = vector.broadcast %79 : vector<1x32xf32> to vector<64x32xf32>
    %81 = arith.mulf %77, %80 : vector<64x32xf32>
    %82 = arith.addf %76, %81 : vector<64x32xf32>
    %83 = vector.extract_strided_slice %39 {offsets = [448, 0], sizes = [64, 32], strides = [1, 1]} : vector<576x32xf32> to vector<64x32xf32>
    %c7 = arith.constant 7 : index
    %c0_38 = arith.constant 0 : index
    %c0_39 = arith.constant 0 : index
    %84 = vector.load %arg8[%c7, %c0_38, %c0_39] : memref<9x1x32xf32, #tpu.memory_space<vmem>>, vector<1x1x32xf32>
    %85 = vector.shape_cast %84 : vector<1x1x32xf32> to vector<1x32xf32>
    %86 = vector.broadcast %85 : vector<1x32xf32> to vector<64x32xf32>
    %87 = arith.mulf %83, %86 : vector<64x32xf32>
    %88 = arith.addf %82, %87 : vector<64x32xf32>
    %89 = vector.extract_strided_slice %39 {offsets = [512, 0], sizes = [64, 32], strides = [1, 1]} : vector<576x32xf32> to vector<64x32xf32>
    %c8 = arith.constant 8 : index
    %c0_40 = arith.constant 0 : index
    %c0_41 = arith.constant 0 : index
    %90 = vector.load %arg8[%c8, %c0_40, %c0_41] : memref<9x1x32xf32, #tpu.memory_space<vmem>>, vector<1x1x32xf32>
    %91 = vector.shape_cast %90 : vector<1x1x32xf32> to vector<1x32xf32>
    %92 = vector.broadcast %91 : vector<1x32xf32> to vector<64x32xf32>
    %93 = arith.mulf %89, %92 : vector<64x32xf32>
    %94 = arith.addf %88, %93 : vector<64x32xf32>
    %95 = arith.mulf %94, %94 : vector<64x32xf32>
    %96 = arith.mulf %94, %95 : vector<64x32xf32>
    %cst_42 = arith.constant 4.471500e-02 : f32
    %97 = vector.broadcast %cst_42 : f32 to vector<64x32xf32>
    %98 = arith.mulf %97, %96 : vector<64x32xf32>
    %99 = arith.addf %94, %98 : vector<64x32xf32>
    %cst_43 = arith.constant 0.797884583 : f32
    %100 = vector.broadcast %cst_43 : f32 to vector<64x32xf32>
    %101 = arith.mulf %100, %99 : vector<64x32xf32>
    %102 = math.tanh %101 : vector<64x32xf32>
    %cst_44 = arith.constant 1.000000e+00 : f32
    %103 = vector.broadcast %cst_44 : f32 to vector<64x32xf32>
    %104 = arith.addf %103, %102 : vector<64x32xf32>
    %cst_45 = arith.constant 5.000000e-01 : f32
    %105 = vector.broadcast %cst_45 : f32 to vector<64x32xf32>
    %106 = arith.mulf %105, %104 : vector<64x32xf32>
    %107 = arith.mulf %94, %106 : vector<64x32xf32>
    %c0_46 = arith.constant 0 : index
    %c0_47 = arith.constant 0 : index
    %108 = vector.load %arg9[%c0_46, %c0_47] : memref<32x32xf32, #tpu.memory_space<vmem>>, vector<32x32xf32>
    %c0_48 = arith.constant 0 : index
    %c0_49 = arith.constant 0 : index
    %109 = vector.load %arg10[%c0_48, %c0_49] : memref<1x32xf32, #tpu.memory_space<vmem>>, vector<1x32xf32>
    %cst_50 = arith.constant dense<0.000000e+00> : vector<64x32xf32>
    %110 = tpu.matmul %107, %108, %cst_50 {dimension_numbers = #tpu.dot_dimension_numbers<[1], [0], [0], [1], [0, 0, 1, 1], [], []>} : vector<64x32xf32>, vector<32x32xf32>, vector<64x32xf32> -> vector<64x32xf32>
    %111 = vector.broadcast %109 : vector<1x32xf32> to vector<64x32xf32>
    %112 = arith.addf %110, %111 : vector<64x32xf32>
    %c0_51 = arith.constant 0 : index
    %c0_52 = arith.constant 0 : index
    %113 = vector.load %arg14[%c0_51, %c0_52] : memref<1x32xf32, #tpu.memory_space<vmem>>, vector<1x32xf32>
    %c0_53 = arith.constant 0 : index
    %c0_54 = arith.constant 0 : index
    %c0_55 = arith.constant 0 : index
    %114 = vector.load %arg11[%c0_53, %c0_54, %c0_55] : memref<6x32x16xf32, #tpu.memory_space<vmem>>, vector<1x32x16xf32>
    %115 = vector.shape_cast %114 : vector<1x32x16xf32> to vector<32x16xf32>
    %c0_56 = arith.constant 0 : index
    %c0_57 = arith.constant 0 : index
    %c0_58 = arith.constant 0 : index
    %116 = vector.load %arg12[%c0_56, %c0_57, %c0_58] : memref<6x1x16xf32, #tpu.memory_space<vmem>>, vector<1x1x16xf32>
    %117 = vector.shape_cast %116 : vector<1x1x16xf32> to vector<1x16xf32>
    %cst_59 = arith.constant dense<0.000000e+00> : vector<64x16xf32>
    %118 = tpu.matmul %112, %115, %cst_59 {dimension_numbers = #tpu.dot_dimension_numbers<[1], [0], [0], [1], [0, 0, 1, 1], [], []>} : vector<64x32xf32>, vector<32x16xf32>, vector<64x16xf32> -> vector<64x16xf32>
    %119 = vector.broadcast %117 : vector<1x16xf32> to vector<64x16xf32>
    %120 = arith.addf %118, %119 : vector<64x16xf32>
    %cst_60 = arith.constant 0.000000e+00 : f32
    %121 = vector.broadcast %cst_60 : f32 to vector<64x16xf32>
    %122 = arith.maximumf %120, %121 : vector<64x16xf32>
    %c2_61 = arith.constant 2 : index
    %c0_62 = arith.constant 0 : index
    %c0_63 = arith.constant 0 : index
    %123 = vector.load %arg11[%c2_61, %c0_62, %c0_63] : memref<6x32x16xf32, #tpu.memory_space<vmem>>, vector<1x32x16xf32>
    %124 = vector.shape_cast %123 : vector<1x32x16xf32> to vector<32x16xf32>
    %c2_64 = arith.constant 2 : index
    %c0_65 = arith.constant 0 : index
    %c0_66 = arith.constant 0 : index
    %125 = vector.load %arg12[%c2_64, %c0_65, %c0_66] : memref<6x1x16xf32, #tpu.memory_space<vmem>>, vector<1x1x16xf32>
    %126 = vector.shape_cast %125 : vector<1x1x16xf32> to vector<1x16xf32>
    %cst_67 = arith.constant dense<0.000000e+00> : vector<64x16xf32>
    %127 = tpu.matmul %112, %124, %cst_67 {dimension_numbers = #tpu.dot_dimension_numbers<[1], [0], [0], [1], [0, 0, 1, 1], [], []>} : vector<64x32xf32>, vector<32x16xf32>, vector<64x16xf32> -> vector<64x16xf32>
    %128 = vector.broadcast %126 : vector<1x16xf32> to vector<64x16xf32>
    %129 = arith.addf %127, %128 : vector<64x16xf32>
    %cst_68 = arith.constant 0.000000e+00 : f32
    %130 = vector.broadcast %cst_68 : f32 to vector<64x16xf32>
    %131 = arith.maximumf %129, %130 : vector<64x16xf32>
    %c4_69 = arith.constant 4 : index
    %c0_70 = arith.constant 0 : index
    %c0_71 = arith.constant 0 : index
    %132 = vector.load %arg11[%c4_69, %c0_70, %c0_71] : memref<6x32x16xf32, #tpu.memory_space<vmem>>, vector<1x32x16xf32>
    %133 = vector.shape_cast %132 : vector<1x32x16xf32> to vector<32x16xf32>
    %c4_72 = arith.constant 4 : index
    %c0_73 = arith.constant 0 : index
    %c0_74 = arith.constant 0 : index
    %134 = vector.load %arg12[%c4_72, %c0_73, %c0_74] : memref<6x1x16xf32, #tpu.memory_space<vmem>>, vector<1x1x16xf32>
    %135 = vector.shape_cast %134 : vector<1x1x16xf32> to vector<1x16xf32>
    %cst_75 = arith.constant dense<0.000000e+00> : vector<64x16xf32>
    %136 = tpu.matmul %112, %133, %cst_75 {dimension_numbers = #tpu.dot_dimension_numbers<[1], [0], [0], [1], [0, 0, 1, 1], [], []>} : vector<64x32xf32>, vector<32x16xf32>, vector<64x16xf32> -> vector<64x16xf32>
    %137 = vector.broadcast %135 : vector<1x16xf32> to vector<64x16xf32>
    %138 = arith.addf %136, %137 : vector<64x16xf32>
    %139 = tpu.transpose %131, [1, 0] : vector<64x16xf32> -> vector<16x64xf32>
    %cst_76 = arith.constant dense<0.000000e+00> : vector<16x16xf32>
    %140 = tpu.matmul %139, %138, %cst_76 {dimension_numbers = #tpu.dot_dimension_numbers<[1], [0], [0], [1], [0, 0, 1, 1], [], []>} : vector<16x64xf32>, vector<64x16xf32>, vector<16x16xf32> -> vector<16x16xf32>
    %cst_77 = arith.constant dense<0.000000e+00> : vector<16xf32>
    %141 = vector.multi_reduction <add>, %131, %cst_77 [0] : vector<64x16xf32> to vector<16xf32>
    %142 = vector.shape_cast %141 : vector<16xf32> to vector<1x16xf32>
    %cst_78 = arith.constant dense<0.000000e+00> : vector<64x16xf32>
    %143 = tpu.matmul %122, %140, %cst_78 {dimension_numbers = #tpu.dot_dimension_numbers<[1], [0], [0], [1], [0, 0, 1, 1], [], []>} : vector<64x16xf32>, vector<16x16xf32>, vector<64x16xf32> -> vector<64x16xf32>
    %144 = vector.broadcast %142 : vector<1x16xf32> to vector<64x16xf32>
    %145 = arith.mulf %122, %144 : vector<64x16xf32>
    %cst_79 = arith.constant dense<0.000000e+00> : vector<64xf32>
    %146 = vector.multi_reduction <add>, %145, %cst_79 [1] : vector<64x16xf32> to vector<64xf32>
    %147 = vector.shape_cast %146 : vector<64xf32> to vector<64x1xf32>
    %cst_80 = arith.constant 9.99999997E-7 : f32
    %148 = vector.broadcast %cst_80 : f32 to vector<64x1xf32>
    %149 = arith.addf %147, %148 : vector<64x1xf32>
    %150 = tpu.reciprocal %149 {approx = true} : vector<64x1xf32> -> vector<64x1xf32>
    %151 = vector.broadcast %150 : vector<64x1xf32> to vector<64x16xf32>
    %152 = arith.mulf %143, %151 : vector<64x16xf32>
    %c0_81 = arith.constant 0 : index
    %c0_82 = arith.constant 0 : index
    %c0_83 = arith.constant 0 : index
    %153 = vector.load %arg13[%c0_81, %c0_82, %c0_83] : memref<2x16x32xf32, #tpu.memory_space<vmem>>, vector<1x16x32xf32>
    %154 = vector.shape_cast %153 : vector<1x16x32xf32> to vector<16x32xf32>
    %cst_84 = arith.constant dense<0.000000e+00> : vector<64x32xf32>
    %155 = tpu.matmul %152, %154, %cst_84 {dimension_numbers = #tpu.dot_dimension_numbers<[1], [0], [0], [1], [0, 0, 1, 1], [], []>} : vector<64x16xf32>, vector<16x32xf32>, vector<64x32xf32> -> vector<64x32xf32>
    %156 = vector.broadcast %113 : vector<1x32xf32> to vector<64x32xf32>
    %157 = arith.addf %156, %155 : vector<64x32xf32>
    %c1_85 = arith.constant 1 : index
    %c0_86 = arith.constant 0 : index
    %c0_87 = arith.constant 0 : index
    %158 = vector.load %arg11[%c1_85, %c0_86, %c0_87] : memref<6x32x16xf32, #tpu.memory_space<vmem>>, vector<1x32x16xf32>
    %159 = vector.shape_cast %158 : vector<1x32x16xf32> to vector<32x16xf32>
    %c1_88 = arith.constant 1 : index
    %c0_89 = arith.constant 0 : index
    %c0_90 = arith.constant 0 : index
    %160 = vector.load %arg12[%c1_88, %c0_89, %c0_90] : memref<6x1x16xf32, #tpu.memory_space<vmem>>, vector<1x1x16xf32>
    %161 = vector.shape_cast %160 : vector<1x1x16xf32> to vector<1x16xf32>
    %cst_91 = arith.constant dense<0.000000e+00> : vector<64x16xf32>
    %162 = tpu.matmul %112, %159, %cst_91 {dimension_numbers = #tpu.dot_dimension_numbers<[1], [0], [0], [1], [0, 0, 1, 1], [], []>} : vector<64x32xf32>, vector<32x16xf32>, vector<64x16xf32> -> vector<64x16xf32>
    %163 = vector.broadcast %161 : vector<1x16xf32> to vector<64x16xf32>
    %164 = arith.addf %162, %163 : vector<64x16xf32>
    %cst_92 = arith.constant 0.000000e+00 : f32
    %165 = vector.broadcast %cst_92 : f32 to vector<64x16xf32>
    %166 = arith.maximumf %164, %165 : vector<64x16xf32>
    %c3_93 = arith.constant 3 : index
    %c0_94 = arith.constant 0 : index
    %c0_95 = arith.constant 0 : index
    %167 = vector.load %arg11[%c3_93, %c0_94, %c0_95] : memref<6x32x16xf32, #tpu.memory_space<vmem>>, vector<1x32x16xf32>
    %168 = vector.shape_cast %167 : vector<1x32x16xf32> to vector<32x16xf32>
    %c3_96 = arith.constant 3 : index
    %c0_97 = arith.constant 0 : index
    %c0_98 = arith.constant 0 : index
    %169 = vector.load %arg12[%c3_96, %c0_97, %c0_98] : memref<6x1x16xf32, #tpu.memory_space<vmem>>, vector<1x1x16xf32>
    %170 = vector.shape_cast %169 : vector<1x1x16xf32> to vector<1x16xf32>
    %cst_99 = arith.constant dense<0.000000e+00> : vector<64x16xf32>
    %171 = tpu.matmul %112, %168, %cst_99 {dimension_numbers = #tpu.dot_dimension_numbers<[1], [0], [0], [1], [0, 0, 1, 1], [], []>} : vector<64x32xf32>, vector<32x16xf32>, vector<64x16xf32> -> vector<64x16xf32>
    %172 = vector.broadcast %170 : vector<1x16xf32> to vector<64x16xf32>
    %173 = arith.addf %171, %172 : vector<64x16xf32>
    %cst_100 = arith.constant 0.000000e+00 : f32
    %174 = vector.broadcast %cst_100 : f32 to vector<64x16xf32>
    %175 = arith.maximumf %173, %174 : vector<64x16xf32>
    %c5_101 = arith.constant 5 : index
    %c0_102 = arith.constant 0 : index
    %c0_103 = arith.constant 0 : index
    %176 = vector.load %arg11[%c5_101, %c0_102, %c0_103] : memref<6x32x16xf32, #tpu.memory_space<vmem>>, vector<1x32x16xf32>
    %177 = vector.shape_cast %176 : vector<1x32x16xf32> to vector<32x16xf32>
    %c5_104 = arith.constant 5 : index
    %c0_105 = arith.constant 0 : index
    %c0_106 = arith.constant 0 : index
    %178 = vector.load %arg12[%c5_104, %c0_105, %c0_106] : memref<6x1x16xf32, #tpu.memory_space<vmem>>, vector<1x1x16xf32>
    %179 = vector.shape_cast %178 : vector<1x1x16xf32> to vector<1x16xf32>
    %cst_107 = arith.constant dense<0.000000e+00> : vector<64x16xf32>
    %180 = tpu.matmul %112, %177, %cst_107 {dimension_numbers = #tpu.dot_dimension_numbers<[1], [0], [0], [1], [0, 0, 1, 1], [], []>} : vector<64x32xf32>, vector<32x16xf32>, vector<64x16xf32> -> vector<64x16xf32>
    %181 = vector.broadcast %179 : vector<1x16xf32> to vector<64x16xf32>
    %182 = arith.addf %180, %181 : vector<64x16xf32>
    %183 = tpu.transpose %175, [1, 0] : vector<64x16xf32> -> vector<16x64xf32>
    %cst_108 = arith.constant dense<0.000000e+00> : vector<16x16xf32>
    %184 = tpu.matmul %183, %182, %cst_108 {dimension_numbers = #tpu.dot_dimension_numbers<[1], [0], [0], [1], [0, 0, 1, 1], [], []>} : vector<16x64xf32>, vector<64x16xf32>, vector<16x16xf32> -> vector<16x16xf32>
    %cst_109 = arith.constant dense<0.000000e+00> : vector<16xf32>
    %185 = vector.multi_reduction <add>, %175, %cst_109 [0] : vector<64x16xf32> to vector<16xf32>
    %186 = vector.shape_cast %185 : vector<16xf32> to vector<1x16xf32>
    %cst_110 = arith.constant dense<0.000000e+00> : vector<64x16xf32>
    %187 = tpu.matmul %166, %184, %cst_110 {dimension_numbers = #tpu.dot_dimension_numbers<[1], [0], [0], [1], [0, 0, 1, 1], [], []>} : vector<64x16xf32>, vector<16x16xf32>, vector<64x16xf32> -> vector<64x16xf32>
    %188 = vector.broadcast %186 : vector<1x16xf32> to vector<64x16xf32>
    %189 = arith.mulf %166, %188 : vector<64x16xf32>
    %cst_111 = arith.constant dense<0.000000e+00> : vector<64xf32>
    %190 = vector.multi_reduction <add>, %189, %cst_111 [1] : vector<64x16xf32> to vector<64xf32>
    %191 = vector.shape_cast %190 : vector<64xf32> to vector<64x1xf32>
    %cst_112 = arith.constant 9.99999997E-7 : f32
    %192 = vector.broadcast %cst_112 : f32 to vector<64x1xf32>
    %193 = arith.addf %191, %192 : vector<64x1xf32>
    %194 = tpu.reciprocal %193 {approx = true} : vector<64x1xf32> -> vector<64x1xf32>
    %195 = vector.broadcast %194 : vector<64x1xf32> to vector<64x16xf32>
    %196 = arith.mulf %187, %195 : vector<64x16xf32>
    %c1_113 = arith.constant 1 : index
    %c0_114 = arith.constant 0 : index
    %c0_115 = arith.constant 0 : index
    %197 = vector.load %arg13[%c1_113, %c0_114, %c0_115] : memref<2x16x32xf32, #tpu.memory_space<vmem>>, vector<1x16x32xf32>
    %198 = vector.shape_cast %197 : vector<1x16x32xf32> to vector<16x32xf32>
    %cst_116 = arith.constant dense<0.000000e+00> : vector<64x32xf32>
    %199 = tpu.matmul %196, %198, %cst_116 {dimension_numbers = #tpu.dot_dimension_numbers<[1], [0], [0], [1], [0, 0, 1, 1], [], []>} : vector<64x16xf32>, vector<16x32xf32>, vector<64x32xf32> -> vector<64x32xf32>
    %200 = arith.addf %157, %199 : vector<64x32xf32>
    %201 = arith.addf %112, %200 : vector<64x32xf32>
    %c0_117 = arith.constant 0 : index
    %c0_118 = arith.constant 0 : index
    %202 = vector.load %arg15[%c0_117, %c0_118] : memref<32x64xf32, #tpu.memory_space<vmem>>, vector<32x64xf32>
    %c0_119 = arith.constant 0 : index
    %c0_120 = arith.constant 0 : index
    %203 = vector.load %arg16[%c0_119, %c0_120] : memref<1x64xf32, #tpu.memory_space<vmem>>, vector<1x64xf32>
    %cst_121 = arith.constant dense<0.000000e+00> : vector<64x64xf32>
    %204 = tpu.matmul %201, %202, %cst_121 {dimension_numbers = #tpu.dot_dimension_numbers<[1], [0], [0], [1], [0, 0, 1, 1], [], []>} : vector<64x32xf32>, vector<32x64xf32>, vector<64x64xf32> -> vector<64x64xf32>
    %205 = vector.broadcast %203 : vector<1x64xf32> to vector<64x64xf32>
    %206 = arith.addf %204, %205 : vector<64x64xf32>
    %207 = arith.mulf %206, %206 : vector<64x64xf32>
    %208 = arith.mulf %206, %207 : vector<64x64xf32>
    %cst_122 = arith.constant 4.471500e-02 : f32
    %209 = vector.broadcast %cst_122 : f32 to vector<64x64xf32>
    %210 = arith.mulf %209, %208 : vector<64x64xf32>
    %211 = arith.addf %206, %210 : vector<64x64xf32>
    %cst_123 = arith.constant 0.797884583 : f32
    %212 = vector.broadcast %cst_123 : f32 to vector<64x64xf32>
    %213 = arith.mulf %212, %211 : vector<64x64xf32>
    %214 = math.tanh %213 : vector<64x64xf32>
    %cst_124 = arith.constant 1.000000e+00 : f32
    %215 = vector.broadcast %cst_124 : f32 to vector<64x64xf32>
    %216 = arith.addf %215, %214 : vector<64x64xf32>
    %cst_125 = arith.constant 5.000000e-01 : f32
    %217 = vector.broadcast %cst_125 : f32 to vector<64x64xf32>
    %218 = arith.mulf %217, %216 : vector<64x64xf32>
    %219 = arith.mulf %206, %218 : vector<64x64xf32>
    %c0_126 = arith.constant 0 : index
    %c0_127 = arith.constant 0 : index
    %220 = vector.load %arg3[%c0_126, %c0_127] : memref<576x64xf32, #tpu.memory_space<vmem>>, vector<576x64xf32>
    %cst_128 = arith.constant dense<0.000000e+00> : vector<576x64xf32>
    %221 = tpu.matmul %220, %219, %cst_128 {dimension_numbers = #tpu.dot_dimension_numbers<[1], [0], [0], [1], [0, 0, 1, 1], [], []>} : vector<576x64xf32>, vector<64x64xf32>, vector<576x64xf32> -> vector<576x64xf32>
    %cst_129 = arith.constant 0.000000e+00 : f32
    %222 = vector.broadcast %cst_129 : f32 to vector<64x64xf32>
    %223 = vector.extract_strided_slice %221 {offsets = [0, 0], sizes = [64, 64], strides = [1, 1]} : vector<576x64xf32> to vector<64x64xf32>
    %c0_130 = arith.constant 0 : index
    %c0_131 = arith.constant 0 : index
    %c0_132 = arith.constant 0 : index
    %224 = vector.load %arg17[%c0_130, %c0_131, %c0_132] : memref<9x1x64xf32, #tpu.memory_space<vmem>>, vector<1x1x64xf32>
    %225 = vector.shape_cast %224 : vector<1x1x64xf32> to vector<1x64xf32>
    %226 = vector.broadcast %225 : vector<1x64xf32> to vector<64x64xf32>
    %227 = arith.mulf %223, %226 : vector<64x64xf32>
    %228 = arith.addf %222, %227 : vector<64x64xf32>
    %229 = vector.extract_strided_slice %221 {offsets = [64, 0], sizes = [64, 64], strides = [1, 1]} : vector<576x64xf32> to vector<64x64xf32>
    %c1_133 = arith.constant 1 : index
    %c0_134 = arith.constant 0 : index
    %c0_135 = arith.constant 0 : index
    %230 = vector.load %arg17[%c1_133, %c0_134, %c0_135] : memref<9x1x64xf32, #tpu.memory_space<vmem>>, vector<1x1x64xf32>
    %231 = vector.shape_cast %230 : vector<1x1x64xf32> to vector<1x64xf32>
    %232 = vector.broadcast %231 : vector<1x64xf32> to vector<64x64xf32>
    %233 = arith.mulf %229, %232 : vector<64x64xf32>
    %234 = arith.addf %228, %233 : vector<64x64xf32>
    %235 = vector.extract_strided_slice %221 {offsets = [128, 0], sizes = [64, 64], strides = [1, 1]} : vector<576x64xf32> to vector<64x64xf32>
    %c2_136 = arith.constant 2 : index
    %c0_137 = arith.constant 0 : index
    %c0_138 = arith.constant 0 : index
    %236 = vector.load %arg17[%c2_136, %c0_137, %c0_138] : memref<9x1x64xf32, #tpu.memory_space<vmem>>, vector<1x1x64xf32>
    %237 = vector.shape_cast %236 : vector<1x1x64xf32> to vector<1x64xf32>
    %238 = vector.broadcast %237 : vector<1x64xf32> to vector<64x64xf32>
    %239 = arith.mulf %235, %238 : vector<64x64xf32>
    %240 = arith.addf %234, %239 : vector<64x64xf32>
    %241 = vector.extract_strided_slice %221 {offsets = [192, 0], sizes = [64, 64], strides = [1, 1]} : vector<576x64xf32> to vector<64x64xf32>
    %c3_139 = arith.constant 3 : index
    %c0_140 = arith.constant 0 : index
    %c0_141 = arith.constant 0 : index
    %242 = vector.load %arg17[%c3_139, %c0_140, %c0_141] : memref<9x1x64xf32, #tpu.memory_space<vmem>>, vector<1x1x64xf32>
    %243 = vector.shape_cast %242 : vector<1x1x64xf32> to vector<1x64xf32>
    %244 = vector.broadcast %243 : vector<1x64xf32> to vector<64x64xf32>
    %245 = arith.mulf %241, %244 : vector<64x64xf32>
    %246 = arith.addf %240, %245 : vector<64x64xf32>
    %247 = vector.extract_strided_slice %221 {offsets = [256, 0], sizes = [64, 64], strides = [1, 1]} : vector<576x64xf32> to vector<64x64xf32>
    %c4_142 = arith.constant 4 : index
    %c0_143 = arith.constant 0 : index
    %c0_144 = arith.constant 0 : index
    %248 = vector.load %arg17[%c4_142, %c0_143, %c0_144] : memref<9x1x64xf32, #tpu.memory_space<vmem>>, vector<1x1x64xf32>
    %249 = vector.shape_cast %248 : vector<1x1x64xf32> to vector<1x64xf32>
    %250 = vector.broadcast %249 : vector<1x64xf32> to vector<64x64xf32>
    %251 = arith.mulf %247, %250 : vector<64x64xf32>
    %252 = arith.addf %246, %251 : vector<64x64xf32>
    %253 = vector.extract_strided_slice %221 {offsets = [320, 0], sizes = [64, 64], strides = [1, 1]} : vector<576x64xf32> to vector<64x64xf32>
    %c5_145 = arith.constant 5 : index
    %c0_146 = arith.constant 0 : index
    %c0_147 = arith.constant 0 : index
    %254 = vector.load %arg17[%c5_145, %c0_146, %c0_147] : memref<9x1x64xf32, #tpu.memory_space<vmem>>, vector<1x1x64xf32>
    %255 = vector.shape_cast %254 : vector<1x1x64xf32> to vector<1x64xf32>
    %256 = vector.broadcast %255 : vector<1x64xf32> to vector<64x64xf32>
    %257 = arith.mulf %253, %256 : vector<64x64xf32>
    %258 = arith.addf %252, %257 : vector<64x64xf32>
    %259 = vector.extract_strided_slice %221 {offsets = [384, 0], sizes = [64, 64], strides = [1, 1]} : vector<576x64xf32> to vector<64x64xf32>
    %c6_148 = arith.constant 6 : index
    %c0_149 = arith.constant 0 : index
    %c0_150 = arith.constant 0 : index
    %260 = vector.load %arg17[%c6_148, %c0_149, %c0_150] : memref<9x1x64xf32, #tpu.memory_space<vmem>>, vector<1x1x64xf32>
    %261 = vector.shape_cast %260 : vector<1x1x64xf32> to vector<1x64xf32>
    %262 = vector.broadcast %261 : vector<1x64xf32> to vector<64x64xf32>
    %263 = arith.mulf %259, %262 : vector<64x64xf32>
    %264 = arith.addf %258, %263 : vector<64x64xf32>
    %265 = vector.extract_strided_slice %221 {offsets = [448, 0], sizes = [64, 64], strides = [1, 1]} : vector<576x64xf32> to vector<64x64xf32>
    %c7_151 = arith.constant 7 : index
    %c0_152 = arith.constant 0 : index
    %c0_153 = arith.constant 0 : index
    %266 = vector.load %arg17[%c7_151, %c0_152, %c0_153] : memref<9x1x64xf32, #tpu.memory_space<vmem>>, vector<1x1x64xf32>
    %267 = vector.shape_cast %266 : vector<1x1x64xf32> to vector<1x64xf32>
    %268 = vector.broadcast %267 : vector<1x64xf32> to vector<64x64xf32>
    %269 = arith.mulf %265, %268 : vector<64x64xf32>
    %270 = arith.addf %264, %269 : vector<64x64xf32>
    %271 = vector.extract_strided_slice %221 {offsets = [512, 0], sizes = [64, 64], strides = [1, 1]} : vector<576x64xf32> to vector<64x64xf32>
    %c8_154 = arith.constant 8 : index
    %c0_155 = arith.constant 0 : index
    %c0_156 = arith.constant 0 : index
    %272 = vector.load %arg17[%c8_154, %c0_155, %c0_156] : memref<9x1x64xf32, #tpu.memory_space<vmem>>, vector<1x1x64xf32>
    %273 = vector.shape_cast %272 : vector<1x1x64xf32> to vector<1x64xf32>
    %274 = vector.broadcast %273 : vector<1x64xf32> to vector<64x64xf32>
    %275 = arith.mulf %271, %274 : vector<64x64xf32>
    %276 = arith.addf %270, %275 : vector<64x64xf32>
    %277 = arith.mulf %276, %276 : vector<64x64xf32>
    %278 = arith.mulf %276, %277 : vector<64x64xf32>
    %cst_157 = arith.constant 4.471500e-02 : f32
    %279 = vector.broadcast %cst_157 : f32 to vector<64x64xf32>
    %280 = arith.mulf %279, %278 : vector<64x64xf32>
    %281 = arith.addf %276, %280 : vector<64x64xf32>
    %cst_158 = arith.constant 0.797884583 : f32
    %282 = vector.broadcast %cst_158 : f32 to vector<64x64xf32>
    %283 = arith.mulf %282, %281 : vector<64x64xf32>
    %284 = math.tanh %283 : vector<64x64xf32>
    %cst_159 = arith.constant 1.000000e+00 : f32
    %285 = vector.broadcast %cst_159 : f32 to vector<64x64xf32>
    %286 = arith.addf %285, %284 : vector<64x64xf32>
    %cst_160 = arith.constant 5.000000e-01 : f32
    %287 = vector.broadcast %cst_160 : f32 to vector<64x64xf32>
    %288 = arith.mulf %287, %286 : vector<64x64xf32>
    %289 = arith.mulf %276, %288 : vector<64x64xf32>
    %c0_161 = arith.constant 0 : index
    %c0_162 = arith.constant 0 : index
    %290 = vector.load %arg18[%c0_161, %c0_162] : memref<64x32xf32, #tpu.memory_space<vmem>>, vector<64x32xf32>
    %c0_163 = arith.constant 0 : index
    %c0_164 = arith.constant 0 : index
    %291 = vector.load %arg19[%c0_163, %c0_164] : memref<1x32xf32, #tpu.memory_space<vmem>>, vector<1x32xf32>
    %cst_165 = arith.constant dense<0.000000e+00> : vector<64x32xf32>
    %292 = tpu.matmul %289, %290, %cst_165 {dimension_numbers = #tpu.dot_dimension_numbers<[1], [0], [0], [1], [0, 0, 1, 1], [], []>} : vector<64x64xf32>, vector<64x32xf32>, vector<64x32xf32> -> vector<64x32xf32>
    %293 = vector.broadcast %291 : vector<1x32xf32> to vector<64x32xf32>
    %294 = arith.addf %292, %293 : vector<64x32xf32>
    %295 = arith.addf %201, %294 : vector<64x32xf32>
    %c0_166 = arith.constant 0 : index
    %c0_167 = arith.constant 0 : index
    %296 = vector.load %arg20[%c0_166, %c0_167] : memref<32x64xf32, #tpu.memory_space<vmem>>, vector<32x64xf32>
    %c0_168 = arith.constant 0 : index
    %c0_169 = arith.constant 0 : index
    %297 = vector.load %arg21[%c0_168, %c0_169] : memref<1x64xf32, #tpu.memory_space<vmem>>, vector<1x64xf32>
    %cst_170 = arith.constant dense<0.000000e+00> : vector<64x64xf32>
    %298 = tpu.matmul %295, %296, %cst_170 {dimension_numbers = #tpu.dot_dimension_numbers<[1], [0], [0], [1], [0, 0, 1, 1], [], []>} : vector<64x32xf32>, vector<32x64xf32>, vector<64x64xf32> -> vector<64x64xf32>
    %299 = vector.broadcast %297 : vector<1x64xf32> to vector<64x64xf32>
    %300 = arith.addf %298, %299 : vector<64x64xf32>
    %301 = arith.mulf %300, %300 : vector<64x64xf32>
    %302 = arith.mulf %300, %301 : vector<64x64xf32>
    %cst_171 = arith.constant 4.471500e-02 : f32
    %303 = vector.broadcast %cst_171 : f32 to vector<64x64xf32>
    %304 = arith.mulf %303, %302 : vector<64x64xf32>
    %305 = arith.addf %300, %304 : vector<64x64xf32>
    %cst_172 = arith.constant 0.797884583 : f32
    %306 = vector.broadcast %cst_172 : f32 to vector<64x64xf32>
    %307 = arith.mulf %306, %305 : vector<64x64xf32>
    %308 = math.tanh %307 : vector<64x64xf32>
    %cst_173 = arith.constant 1.000000e+00 : f32
    %309 = vector.broadcast %cst_173 : f32 to vector<64x64xf32>
    %310 = arith.addf %309, %308 : vector<64x64xf32>
    %cst_174 = arith.constant 5.000000e-01 : f32
    %311 = vector.broadcast %cst_174 : f32 to vector<64x64xf32>
    %312 = arith.mulf %311, %310 : vector<64x64xf32>
    %313 = arith.mulf %300, %312 : vector<64x64xf32>
    %cst_175 = arith.constant dense<0.000000e+00> : vector<64xf32>
    %314 = vector.multi_reduction <add>, %313, %cst_175 [0] : vector<64x64xf32> to vector<64xf32>
    %315 = vector.shape_cast %314 : vector<64xf32> to vector<1x64xf32>
    %cst_176 = arith.constant 6.400000e+01 : f32
    %316 = vector.broadcast %cst_176 : f32 to vector<1x64xf32>
    %317 = arith.divf %315, %316 : vector<1x64xf32>
    %c0_177 = arith.constant 0 : index
    %c0_178 = arith.constant 0 : index
    %318 = vector.load %arg22[%c0_177, %c0_178] : memref<64x128xf32, #tpu.memory_space<vmem>>, vector<64x128xf32>
    %c0_179 = arith.constant 0 : index
    %c0_180 = arith.constant 0 : index
    %319 = vector.load %arg23[%c0_179, %c0_180] : memref<1x128xf32, #tpu.memory_space<vmem>>, vector<1x128xf32>
    %cst_181 = arith.constant dense<0.000000e+00> : vector<1x128xf32>
    %320 = tpu.matmul %317, %318, %cst_181 {dimension_numbers = #tpu.dot_dimension_numbers<[1], [0], [0], [1], [0, 0, 1, 1], [], []>} : vector<1x64xf32>, vector<64x128xf32>, vector<1x128xf32> -> vector<1x128xf32>
    %321 = arith.addf %320, %319 : vector<1x128xf32>
    %c0_182 = arith.constant 0 : index
    %c0_183 = arith.constant 0 : index
    %c0_184 = arith.constant 0 : index
    %322 = vector.load %arg24[%c0_182, %c0_183, %c0_184] : memref<1x1x128xf32, #tpu.memory_space<vmem>>, vector<1x1x128xf32>
    %323 = vector.shape_cast %322 : vector<1x1x128xf32> to vector<1x128xf32>
    %324 = vector.shape_cast %321 : vector<1x128xf32> to vector<1x1x128xf32>
    tpu.vector_store %arg24[%c0_182, %c0_183, %c0_184], %324 {strides = array<i32>} : memref<1x1x128xf32, #tpu.memory_space<vmem>>, vector<1x1x128xf32>,
    return
  }
  func.func @transform_0(%arg0: i32) -> (i32, i32, i32) {
    %c0_i32 = arith.constant 0 : i32
    %c0_i32_0 = arith.constant 0 : i32
    %c0_i32_1 = arith.constant 0 : i32
    return %arg0, %c0_i32, %c0_i32_0 : i32, i32, i32
  }
  func.func @transform_1(%arg0: i32) -> (i32, i32) {
    %c0_i32 = arith.constant 0 : i32
    %c0_i32_0 = arith.constant 0 : i32
    %c0_i32_1 = arith.constant 0 : i32
    return %c0_i32, %c0_i32_0 : i32, i32
  }
  func.func @transform_2(%arg0: i32) -> (i32, i32) {
    %c0_i32 = arith.constant 0 : i32
    %c0_i32_0 = arith.constant 0 : i32
    %c0_i32_1 = arith.constant 0 : i32
    return %c0_i32, %c0_i32_0 : i32, i32
  }
  func.func @transform_3(%arg0: i32) -> (i32, i32) {
    %c0_i32 = arith.constant 0 : i32
    %c0_i32_0 = arith.constant 0 : i32
    %c0_i32_1 = arith.constant 0 : i32
    return %c0_i32, %c0_i32_0 : i32, i32
  }
  func.func @transform_4(%arg0: i32) -> (i32, i32) {
    %c0_i32 = arith.constant 0 : i32
    %c0_i32_0 = arith.constant 0 : i32
    %c0_i32_1 = arith.constant 0 : i32
    return %c0_i32, %c0_i32_0 : i32, i32
  }
  func.func @transform_5(%arg0: i32) -> (i32, i32) {
    %c0_i32 = arith.constant 0 : i32
    %c0_i32_0 = arith.constant 0 : i32
    %c0_i32_1 = arith.constant 0 : i32
    return %c0_i32, %c0_i32_0 : i32, i32
  }
  func.func @transform_6(%arg0: i32) -> (i32, i32) {
    %c0_i32 = arith.constant 0 : i32
    %c0_i32_0 = arith.constant 0 : i32
    %c0_i32_1 = arith.constant 0 : i32
    return %c0_i32, %c0_i32_0 : i32, i32
  }
  func.func @transform_7(%arg0: i32) -> (i32, i32, i32) {
    %c0_i32 = arith.constant 0 : i32
    %c0_i32_0 = arith.constant 0 : i32
    %c0_i32_1 = arith.constant 0 : i32
    %c0_i32_2 = arith.constant 0 : i32
    return %c0_i32, %c0_i32_0, %c0_i32_1 : i32, i32, i32
  }
  func.func @transform_8(%arg0: i32) -> (i32, i32) {
    %c0_i32 = arith.constant 0 : i32
    %c0_i32_0 = arith.constant 0 : i32
    %c0_i32_1 = arith.constant 0 : i32
    return %c0_i32, %c0_i32_0 : i32, i32
  }
  func.func @transform_9(%arg0: i32) -> (i32, i32) {
    %c0_i32 = arith.constant 0 : i32
    %c0_i32_0 = arith.constant 0 : i32
    %c0_i32_1 = arith.constant 0 : i32
    return %c0_i32, %c0_i32_0 : i32, i32
  }
  func.func @transform_10(%arg0: i32) -> (i32, i32, i32) {
    %c0_i32 = arith.constant 0 : i32
    %c0_i32_0 = arith.constant 0 : i32
    %c0_i32_1 = arith.constant 0 : i32
    %c0_i32_2 = arith.constant 0 : i32
    return %c0_i32, %c0_i32_0, %c0_i32_1 : i32, i32, i32
  }
  func.func @transform_11(%arg0: i32) -> (i32, i32, i32) {
    %c0_i32 = arith.constant 0 : i32
    %c0_i32_0 = arith.constant 0 : i32
    %c0_i32_1 = arith.constant 0 : i32
    %c0_i32_2 = arith.constant 0 : i32
    return %c0_i32, %c0_i32_0, %c0_i32_1 : i32, i32, i32
  }
  func.func @transform_12(%arg0: i32) -> (i32, i32, i32) {
    %c0_i32 = arith.constant 0 : i32
    %c0_i32_0 = arith.constant 0 : i32
    %c0_i32_1 = arith.constant 0 : i32
    %c0_i32_2 = arith.constant 0 : i32
    return %c0_i32, %c0_i32_0, %c0_i32_1 : i32, i32, i32
  }
  func.func @transform_13(%arg0: i32) -> (i32, i32) {
    %c0_i32 = arith.constant 0 : i32
    %c0_i32_0 = arith.constant 0 : i32
    %c0_i32_1 = arith.constant 0 : i32
    return %c0_i32, %c0_i32_0 : i32, i32
  }
  func.func @transform_14(%arg0: i32) -> (i32, i32) {
    %c0_i32 = arith.constant 0 : i32
    %c0_i32_0 = arith.constant 0 : i32
    %c0_i32_1 = arith.constant 0 : i32
    return %c0_i32, %c0_i32_0 : i32, i32
  }
  func.func @transform_15(%arg0: i32) -> (i32, i32) {
    %c0_i32 = arith.constant 0 : i32
    %c0_i32_0 = arith.constant 0 : i32
    %c0_i32_1 = arith.constant 0 : i32
    return %c0_i32, %c0_i32_0 : i32, i32
  }
  func.func @transform_16(%arg0: i32) -> (i32, i32, i32) {
    %c0_i32 = arith.constant 0 : i32
    %c0_i32_0 = arith.constant 0 : i32
    %c0_i32_1 = arith.constant 0 : i32
    %c0_i32_2 = arith.constant 0 : i32
    return %c0_i32, %c0_i32_0, %c0_i32_1 : i32, i32, i32
  }
  func.func @transform_17(%arg0: i32) -> (i32, i32) {
    %c0_i32 = arith.constant 0 : i32
    %c0_i32_0 = arith.constant 0 : i32
    %c0_i32_1 = arith.constant 0 : i32
    return %c0_i32, %c0_i32_0 : i32, i32
  }
  func.func @transform_18(%arg0: i32) -> (i32, i32) {
    %c0_i32 = arith.constant 0 : i32
    %c0_i32_0 = arith.constant 0 : i32
    %c0_i32_1 = arith.constant 0 : i32
    return %c0_i32, %c0_i32_0 : i32, i32
  }
  func.func @transform_19(%arg0: i32) -> (i32, i32) {
    %c0_i32 = arith.constant 0 : i32
    %c0_i32_0 = arith.constant 0 : i32
    %c0_i32_1 = arith.constant 0 : i32
    return %c0_i32, %c0_i32_0 : i32, i32
  }
  func.func @transform_20(%arg0: i32) -> (i32, i32) {
    %c0_i32 = arith.constant 0 : i32
    %c0_i32_0 = arith.constant 0 : i32
    %c0_i32_1 = arith.constant 0 : i32
    return %c0_i32, %c0_i32_0 : i32, i32
  }
  func.func @transform_21(%arg0: i32) -> (i32, i32) {
    %c0_i32 = arith.constant 0 : i32
    %c0_i32_0 = arith.constant 0 : i32
    %c0_i32_1 = arith.constant 0 : i32
    return %c0_i32, %c0_i32_0 : i32, i32
  }
  func.func @transform_22(%arg0: i32) -> (i32, i32) {
    %c0_i32 = arith.constant 0 : i32
    %c0_i32_0 = arith.constant 0 : i32
    %c0_i32_1 = arith.constant 0 : i32
    return %c0_i32, %c0_i32_0 : i32, i32
  }
  func.func @transform_23(%arg0: i32) -> (i32, i32, i32) {
    %c0_i32 = arith.constant 0 : i32
    %c0_i32_0 = arith.constant 0 : i32
    %c0_i32_1 = arith.constant 0 : i32
    return %arg0, %c0_i32, %c0_i32_0 : i32, i32, i32
  }
}

</mosaic_0001>

<bundles_post_ra>
// kernel: effnet_forward.1
= control target key start
LH: loop header
LB: loop body
LE: loop exit
PB: predicated region body
PF: predicated region fallthrough
CT: control target
= control target key end

     0   :  { %s10777_s0 = inlined_call_operand.vmem [shape: f32[2,256,27], index: 0, kind: input, shape index: {}]   ;;  %s10778_s1 = inlined_call_operand.vmem [shape: f32[576,256], index: 1, kind: input, shape index: {}]   ;;  %s10779_s2 = inlined_call_operand.vmem [shape: f32[576,64], index: 2, kind: input, shape index: {}]   ;;  %s10780_s3 = inlined_call_operand.vmem [shape: f32[27,16], index: 3, kind: input, shape index: {}]   ;;  %s10781_s4 = inlined_call_operand.vmem [shape: f32[1,16], index: 4, kind: input, shape index: {}]   ;;  %s10782_s5 = inlined_call_operand.vmem [shape: f32[16,32], index: 5, kind: input, shape index: {}]   ;;  %s10783_s6 = inlined_call_operand.vmem [shape: f32[1,32], index: 6, kind: input, shape index: {}, may-alias: {6,9,13,18}]   ;;  %s10784_s7 = inlined_call_operand.vmem [shape: f32[9,1,32], index: 7, kind: input, shape index: {}]   ;;  %s10785_s8 = inlined_call_operand.vmem [shape: f32[32,32], index: 8, kind: input, shape index: {}]   ;;  %s10786_s9 = inlined_call_operand.vmem [shape: f32[1,32], index: 9, kind: input, shape index: {}, may-alias: {6,9,13,18}]   ;;  %s10787_s10 = inlined_call_operand.vmem [shape: f32[6,32,16], index: 10, kind: input, shape index: {}]   ;;  %s10788_s11 = inlined_call_operand.vmem [shape: f32[6,1,16], index: 11, kind: input, shape index: {}]   ;;  %s10789_s12 = inlined_call_operand.vmem [shape: f32[2,16,32], index: 12, kind: input, shape index: {}]   ;;  %s10790_s13 = inlined_call_operand.vmem [shape: f32[1,32], index: 13, kind: input, shape index: {}, may-alias: {6,9,13,18}]   ;;  %s10791_s14 = inlined_call_operand.vmem [shape: f32[32,64], index: 14, kind: input, shape index: {}]   ;;  %s10792_s15 = inlined_call_operand.vmem [shape: f32[1,64], index: 15, kind: input, shape index: {}, may-alias: {15,20}]   ;;  %s10793_s16 = inlined_call_operand.vmem [shape: f32[9,1,64], index: 16, kind: input, shape index: {}]   ;;  %s10794_s17 = inlined_call_operand.vmem [shape: f32[64,32], index: 17, kind: input, shape index: {}]   ;;  %s10795_s18 = inlined_call_operand.vmem [shape: f32[1,32], index: 18, kind: input, shape index: {}, may-alias: {6,9,13,18}]   ;;  %s10796_s19 = inlined_call_operand.vmem [shape: f32[32,64], index: 19, kind: input, shape index: {}]   ;;  %s10797_s20 = inlined_call_operand.vmem [shape: f32[1,64], index: 20, kind: input, shape index: {}, may-alias: {15,20}]   ;;  %s10798_s21 = inlined_call_operand.vmem [shape: f32[64,128], index: 21, kind: input, shape index: {}]   ;;  %s10799_s22 = inlined_call_operand.vmem [shape: f32[1,128], index: 22, kind: input, shape index: {}]   ;;  %s10800_s23 = inlined_call_operand.hbm [shape: f32[2,1,128], index: 23, kind: output, shape index: {}]  }
   0x1   :  { %10814 = sst [smem:[#allocation10_spill]] %s10777_s0 }
   0x2   :  { %10815 = sst [smem:[#allocation11_spill]] %s10778_s1 }
   0x3   :  { %10816 = sst [smem:[#allocation12_spill]] %s10779_s2 }
   0x4   :  { %10817 = sst [smem:[#allocation13_spill]] %s10780_s3 }
   0x5   :  { %10818 = sst [smem:[#allocation14_spill]] %s10781_s4 }
   0x6   :  { %10819 = sst [smem:[#allocation15_spill]] %s10782_s5 }
   0x7   :  { %10820 = sst [smem:[#allocation16_spill]] %s10783_s6 }
   0x8   :  { %10821 = sst [smem:[#allocation17_spill]] %s10784_s7 }
   0x9   :  { %10822 = sst [smem:[#allocation18_spill]] %s10785_s8 }
   0xa   :  { %10823 = sst [smem:[#allocation19_spill]] %s10786_s9 }
   0xb   :  { %28 = vsyncpa [#allocation3], 0 }
   0xc   :  { %30 = vsyncpa [#allocation3 + $0x1], 0  ;;  %s8370_s4 = smov 0   ;;  %s8372_s30 = smov 0  }
   0xd   :  { %s8374_s24 = smov 0   ;;  %s8376_s25 = smov 0  }
   0xe LB: > { %10824 = sst [smem:[#allocation5_spill]] %s8231_s4  ;;  %s8391_s5 = sadd.s32 4294967295, %s8243_s25   ;;  %s8243_s25 = sphi %s8376_s25, %s10844_s25   ;;  %s8239_s24 = sphi %s8374_s24, %s10846_s24   ;;  %s8235_s30 = sphi %s8372_s30, %s10848_s30   ;;  %s8231_s4 = sphi %s8370_s4, %s10847_s4  }
   0xf   : > { %10825 = sst [smem:[#allocation6_spill]] %s8239_s24  ;;  %s6426_s1 = sadd.s32 4294967294, %s8243_s25  }
  0x10   : > { %s8395_s26 = sadd.s32 1, %s8243_s25   ;;  %s531_s2 = sadd.s32 1, %s8239_s24 }
  0x11   : > { %10826 = sst [smem:[#allocation7_spill]] %s8395_s26  ;;  %s528_s6 = ssub.s32 %s8243_s25, %s8395_s26 }
  0x12   : > { %p541_p0 = scmp.ne.s32.totalorder %s8239_s24, %s8235_s30  ;;  %p529_p1 = scmp.eq.s32.totalorder %s528_s6, 0 }
  0x13   : > { %p542_p2 = scmp.eq.s32.totalorder %s8391_s5, 1  ;;  %p547_p3 = scmp.ne.s32.totalorder %s8235_s30, %s8231_s4 }
  0x14   : > { %p548_p4 = scmp.eq.s32.totalorder %s6426_s1, 1  ;;  %p6429_p7 = scmp.ge.s32.totalorder %s8243_s25, 1 }
  0x15   : > { %s8406_s27 = scalar_select %p529_p1, %s8239_s24, %s531_s2  }
  0x16   : > { %p8408_p5 = por %p542_p2, %p541_p0  ;;  %p8412_p6 = por %p548_p4, %p547_p3 }
  0x17   : > { %10827 = sst [smem:[#allocation8_spill]] %s8406_s27  ;;  %p640_p8 = scmp.lt.s32.totalorder %s8243_s25, 3 }
  0x18   : > { %s10829_s28 = scalar_select %p8412_p6, 1, 0 }
  0x19   : > { %p641_p9 = pnand %p6429_p7, %p640_p8 }
  0x1a   : > { %10830 = sst [smem:[#allocation9_spill]] %s10829_s28  ;;  %s10831_s0 = sld [smem:[#allocation13_spill]] (!%p641_p9)  ;;  %vm848_vm0 = vcmask (!%p641_p9), 1042432   ;;  %vm8245_vm1 = vmmov (!%p641_p9), 1   ;;  %vm751_vm3 = vcmask (!%p641_p9), 220160   ;;  %vm1374_vm4 = vcmask (!%p641_p9), 130048  }
  0x1b   : > { %644 = sbr.rel (%p641_p9) target bundleno = 4545 (0x11c1), region = 112  ;;  %p703_p10 = scmp.lt.s32.totalorder (!%p641_p9), %s8391_s5, 1  ;;  %vm7673_vm2 = vmpackc.low (!%p641_p9), %vm848_vm0, %vm8245_vm1  ;;  %vm2851_vm5 = vcmask (!%p641_p9), 261120   ;;  %vm3406_vm6 = vcmask (!%p641_p9), 523264   ;;  %vm8247_vm7 = vmmov (!%p641_p9), 0  }
  0x1c   : > { %s10832_s2 = sld [smem:[#allocation10_spill]] (!%p641_p9)  ;;  %s10835_s24 = sld [smem:[#allocation11_spill]] (!%p641_p9) }
  0x1d   : > { %s10837_s1 = sld [smem:[#allocation16_spill]] (!%p641_p9)  ;;  %s10839_s8 = sld [smem:[#allocation18_spill]] (!%p641_p9) }
  0x1e   : > { %s10840_s9 = sld [smem:[#allocation19_spill]] (!%p641_p9) }
  0x20   : > { %v740_v0 = vld [vmem:[%s10831_s0] sm:$0xff] (!%p641_p9)  ;;  %v741_v1 = vld [vmem:[%s10831_s0 + $0x8] sm:$0xff] (!%p641_p9)  ;;  %v742_v2 = vld [vmem:[%s10831_s0 + $0x10] sm:$0xff] (!%p641_p9) }
  0x21   : > { %v7668_v3 = vpack.c.bf16 (!%p641_p9), %v741_v1, %v740_v0  ;;  %v743_v4 = vld [vmem:[%s10831_s0 + $0x18] sm:$0x7] (!%p641_p9)  ;;  %s10834_s0 = sld [smem:[#allocation14_spill]] (!%p641_p9) }
  0x22   : > { %v7672_v5 = vpack.c.bf16 %v743_v4, %v742_v2  ;;  %s704_s29 = scalar_select %p703_p10, %s8391_s5, 1 }
  0x23   : > { %7669 = vmatprep.subr.bf16.mxu0 %v7668_v3  ;;  %7894 = vmatprep.subr.bf16.mxu1 %v7668_v3  ;;  %s10836_s26 = smov %s10835_s24 }
  0x24   : > { %7671 = vmatpush3.bf16.msra.mxu0 %v7668_v3  ;;  %s6763_s3 = sshll.u32 %s704_s29, 8  ;;  %7896 = vmatpush3.bf16.msra.mxu1 %v7668_v3  ;;  %s10833_s29 = sld [smem:[#allocation15_spill]] }
  0x25   : > { %7674 = vmatprep.subr.msk.bf16.mxu0 %vm7673_vm2, %v7672_v5  ;;  %s8435_s6 = scalar_lea.vmem %s10832_s2, %s6763_s3  ;;  %7895 = vmatprep.subr.msk.bf16.mxu1 %vm7673_vm2, %v7672_v5  ;;  %s6760_s3 = sshll.u32 %s8391_s5, 4 }
  0x26   : > { %v708_v6 = vld [vmem:[%s8435_s6] sm:$0xff]  ;;  %v709_v7 = vld [vmem:[%s8435_s6 + $0x8] sm:$0xff]  ;;  %v710_v8 = vld [vmem:[%s8435_s6 + $0x10] sm:$0xff]  ;;  %s8249_s5 = smov [#allocation2]  }
  0x27   : > { %7115 = vmatprep.mubr.msk.f32.mxu0 %vm751_vm3, %v708_v6  ;;  %v736_v9 = vld [vmem:[%s8435_s6 + $0xe0] sm:$0xff]  ;;  %v737_v10 = vld [vmem:[%s8435_s6 + $0xe8] sm:$0xff]  ;;  %v711_v11 = vld [vmem:[%s8435_s6 + $0x18] sm:$0xff] }
  0x28   : > { %7677 = vmatpush3.bf16.msk.msra.mxu0 %vm7673_vm2, %v7672_v5  ;;  %7897 = vmatpush3.bf16.msk.msra.mxu1 %vm7673_vm2, %v7672_v5  ;;  %v738_v12 = vld [vmem:[%s8435_s6 + $0xf0] sm:$0xff]  ;;  %v712_v13 = vld [vmem:[%s8435_s6 + $0x20] sm:$0xff]  ;;  %v739_v14 = vld [vmem:[%s8435_s6 + $0xf8] sm:$0xff] }
  0x29   : > { %7157 = vmatprep.mubr.msk.f32.mxu1 %vm751_vm3, %v736_v9  ;;  %v713_v15 = vld [vmem:[%s8435_s6 + $0x28] sm:$0xff]  ;;  %v714_v16 = vld [vmem:[%s8435_s6 + $0x30] sm:$0xff]  ;;  %v715_v17 = vld [vmem:[%s8435_s6 + $0x38] sm:$0xff] }
  0x2a   : > { %v716_v18 = vld [vmem:[%s8435_s6 + $0x40] sm:$0xff]  ;;  %v717_v19 = vld [vmem:[%s8435_s6 + $0x48] sm:$0xff]  ;;  %v718_v20 = vld [vmem:[%s8435_s6 + $0x50] sm:$0xff] }
  0x2b   : > { %7116 = vmatmul.mubr.msk.f32.vlgmr.msra.gmra.mrb[0].mxu0 %vm751_vm3, %v709_v7  ;;  %7158 = vmatmul.mubr.msk.f32.vlgmr.msra.gmra.mrb[0].mxu1 %vm751_vm3, %v737_v10  ;;  %v719_v21 = vld [vmem:[%s8435_s6 + $0x58] sm:$0xff]  ;;  %v720_v22 = vld [vmem:[%s8435_s6 + $0x60] sm:$0xff]  ;;  %v721_v23 = vld [vmem:[%s8435_s6 + $0x68] sm:$0xff] }
  0x2c   : > { %7118 = vmatprep.mubr.msk.f32.mxu0 %vm751_vm3, %v710_v8  ;;  %7160 = vmatprep.mubr.msk.f32.mxu1 %vm751_vm3, %v738_v12  ;;  %v722_v24 = vld [vmem:[%s8435_s6 + $0x70] sm:$0xff]  ;;  %v723_v25 = vld [vmem:[%s8435_s6 + $0x78] sm:$0xff]  ;;  %v724_v26 = vld [vmem:[%s8435_s6 + $0x80] sm:$0xff] }
  0x2d   : > { %v725_v27 = vld [vmem:[%s8435_s6 + $0x88] sm:$0xff]  ;;  %v726_v28 = vld [vmem:[%s8435_s6 + $0x90] sm:$0xff]  ;;  %v727_v29 = vld [vmem:[%s8435_s6 + $0x98] sm:$0xff] }
  0x2e   : > { %v728_v30 = vld [vmem:[%s8435_s6 + $0xa0] sm:$0xff]  ;;  %v729_v31 = vld [vmem:[%s8435_s6 + $0xa8] sm:$0xff]  ;;  %v730_v32 = vld [vmem:[%s8435_s6 + $0xb0] sm:$0xff] }
  0x2f   : > { %7119 = vmatmul.mubr.msk.f32.gmra.mrb[2].mxu0 %vm751_vm3, %v711_v11  ;;  %7161 = vmatmul.mubr.msk.f32.gmra.mrb[2].mxu1 %vm751_vm3, %v739_v14  ;;  %v731_v33 = vld [vmem:[%s8435_s6 + $0xb8] sm:$0xff]  ;;  %v732_v34 = vld [vmem:[%s8435_s6 + $0xc0] sm:$0xff]  ;;  %v733_v35 = vld [vmem:[%s8435_s6 + $0xc8] sm:$0xff] }
  0x30   : > { %7121 = vmatprep.mubr.msk.f32.mxu0 %vm751_vm3, %v712_v13  ;;  %v734_v36 = vld [vmem:[%s8435_s6 + $0xd0] sm:$0xff]  ;;  %v735_v37 = vld [vmem:[%s8435_s6 + $0xd8] sm:$0xff]  ;;  %v1365_v38 = vld [vmem:[%s10833_s29] sm:$0xff] }
  0x31   : > { %v1366_v39 = vld [vmem:[%s10833_s29 + $0x8] sm:$0xff]  ;;  %v8510_v41 = vld [vmem:[%s10834_s0] ss:$0 sm:$0xff]  ;;  %s10838_s29 = sld [smem:[#allocation17_spill]]  ;;  %s701_s0 = sand.u32 1, %s8235_s30  }
  0x32   : > { %v7678_v40 = vpack.c.bf16 %v1366_v39, %v1365_v38  ;;  %s702_s27 = scalar_lea.vmem [#allocation2], %s701_s0  ;;  %s6359_s2 = scalar_lea.sflag [#allocation3], %s701_s0 }
  0x33   : > { %7122 = vmatmul.mubr.msk.f32.gmra.mrb[4].mxu0 %vm751_vm3, %v713_v15 }
  0x34   : > { %7124 = vmatprep.mubr.msk.f32.mxu0 %vm751_vm3, %v714_v16  ;;  %7679 = vmatprep.subr.bf16.mxu1 %v7678_v40 }
  0x35   : > { %7681 = vmatpush3.bf16.msra.mxu1 %v7678_v40 }
  0x37   : > { %7125 = vmatmul.mubr.msk.f32.gmra.mrb[6].mxu0 %vm751_vm3, %v715_v17 }
  0x38   : > { %7127 = vmatprep.mubr.msk.f32.mxu0 %vm751_vm3, %v716_v18 }
  0x3b   : > { %7128 = vmatmul.mubr.msk.f32.gmra.mrb[8].mxu0 %vm751_vm3, %v717_v19 }
  0x3c   : > { %7130 = vmatprep.mubr.msk.f32.mxu0 %vm751_vm3, %v718_v20 }
  0x3f   : > { %7131 = vmatmul.mubr.msk.f32.gmra.mrb[10].mxu0 %vm751_vm3, %v719_v21 }
  0x40   : > { %7133 = vmatprep.mubr.msk.f32.mxu0 %vm751_vm3, %v720_v22 }
  0x43   : > { %7134 = vmatmul.mubr.msk.f32.gmra.mrb[12].mxu0 %vm751_vm3, %v721_v23 }
  0x44   : > { %7136 = vmatprep.mubr.msk.f32.mxu0 %vm751_vm3, %v722_v24 }
  0x47   : > { %7137 = vmatmul.mubr.msk.f32.gmra.mrb[14].mxu0 %vm751_vm3, %v723_v25 }
  0x48   : > { %7139 = vmatprep.mubr.msk.f32.mxu0 %vm751_vm3, %v724_v26 }
  0x4b   : > { %7140 = vmatmul.mubr.msk.f32.gmra.mrb[16].mxu0 %vm751_vm3, %v725_v27 }
  0x4c   : > { %7142 = vmatprep.mubr.msk.f32.mxu0 %vm751_vm3, %v726_v28 }
  0x4f   : > { %7143 = vmatmul.mubr.msk.f32.gmra.mrb[18].mxu0 %vm751_vm3, %v727_v29 }
  0x50   : > { %7145 = vmatprep.mubr.msk.f32.mxu0 %vm751_vm3, %v728_v30 }
  0x53   : > { %7146 = vmatmul.mubr.msk.f32.gmra.mrb[20].mxu0 %vm751_vm3, %v729_v31 }
  0x54   : > { %7148 = vmatprep.mubr.msk.f32.mxu0 %vm751_vm3, %v730_v32 }
  0x57   : > { %7149 = vmatmul.mubr.msk.f32.gmra.mrb[22].mxu0 %vm751_vm3, %v731_v33 }
  0x58   : > { %7151 = vmatprep.mubr.msk.f32.mxu0 %vm751_vm3, %v732_v34 }
  0x5b   : > { %7152 = vmatmul.mubr.msk.f32.gmra.mrb[24].mxu0 %vm751_vm3, %v733_v35 }
  0x5c   : > { %7154 = vmatprep.mubr.msk.f32.mxu0 %vm751_vm3, %v734_v36 }
  0x5f   : > { %7155 = vmatmul.mubr.msk.f32.gmra.mrb[26].mxu0 %vm751_vm3, %v735_v37 }
  0xfe   : > { %v7117_v42 = vpop.f32.mrb[0].mxu0  ;;  %v7159_v46 = vpop.f32.mrb[0].mxu1 }
  0xff   : > { %v8513_v43 = vadd.f32 %v7117_v42, %v8510_v41  ;;  %v918_v44 = vpop.f32.mrb[1].mxu0  ;;  %v8521_v48 = vadd.f32 %v7159_v46, %v8510_v41  ;;  %v1058_v49 = vpop.f32.mrb[1].mxu1 }
 0x100   : > { %v8516_v45 = vadd.f32 %v8510_v41, %v918_v44  ;;  %v8526_v52 = vadd.f32 %v8510_v41, %v1058_v49 }
 0x101   : > { %v1078_v47 = vmul.f32 %v8513_v43, %v8513_v43  ;;  %v1106_v15 = vmul.f32 %v8521_v48, %v8521_v48 }
 0x102   : > { %v1077_v50 = vmul.f32 %v8516_v45, %v8516_v45  ;;  %v7120_v51 = vpop.f32.mrb[2].mxu0  ;;  %v7162_v58 = vpop.f32.mrb[2].mxu1  ;;  %v1105_v26 = vmul.f32 %v8526_v52, %v8526_v52 }
 0x103   : > { %v1110_v53 = vmul.f32 %v1078_v47, %v8513_v43  ;;  %v8530_v54 = vadd.f32 %v7120_v51, %v8510_v41  ;;  %v928_v55 = vpop.f32.mrb[3].mxu0  ;;  %v8539_v61 = vadd.f32 %v7162_v58, %v8510_v41  ;;  %v1068_v62 = vpop.f32.mrb[3].mxu1  ;;  %v1138_v30 = vmul.f32 %v1106_v15, %v8521_v48 }
 0x104   : > { %v1109_v56 = vmul.f32 %v1077_v50, %v8516_v45  ;;  %v8534_v57 = vadd.f32 %v8510_v41, %v928_v55  ;;  %v8544_v2 = vadd.f32 %v8510_v41, %v1068_v62  ;;  %v1137_v42 = vmul.f32 %v1105_v26, %v8526_v52 }
 0x105   : > { %v1142_v59 = vmul.f32 0.044715, %v1110_v53  ;;  %v1080_v60 = vmul.f32 %v8530_v54, %v8530_v54  ;;  %v8594_v50 = vmul.f32 0.044715, %v1138_v30 }
 0x106   : > { %v1141_v63 = vmul.f32 0.044715, %v1109_v56  ;;  %v1079_v0 = vmul.f32 %v8534_v57, %v8534_v57  ;;  %v7123_v1 = vpop.f32.mrb[4].mxu0 }
 0x107   : > { %v1174_v3 = vadd.f32 %v1142_v59, %v8513_v43  ;;  %v1112_v4 = vmul.f32 %v1080_v60, %v8530_v54  ;;  %v8549_v5 = vadd.f32 %v7123_v1, %v8510_v41  ;;  %v938_v6 = vpop.f32.mrb[5].mxu0 }
 0x108   : > { %v1173_v7 = vadd.f32 %v1141_v63, %v8516_v45  ;;  %v1111_v8 = vmul.f32 %v1079_v0, %v8534_v57  ;;  %v8554_v9 = vadd.f32 %v8510_v41, %v938_v6 }
 0x109   : > { %v1206_v10 = vmul.f32 0.7978846, %v1174_v3  ;;  %v1144_v11 = vmul.f32 0.044715, %v1112_v4  ;;  %v1082_v12 = vmul.f32 %v8549_v5, %v8549_v5  ;;  %v8608_v4 = vmul.f32 0.044715, %v1137_v42 }
 0x10a   : > { %v1081_v13 = vmul.f32 %v8554_v9, %v8554_v9  ;;  %v7126_v14 = vpop.f32.mrb[6].mxu0  ;;  %v1143_v16 = vmul.f32 0.044715, %v1111_v8  ;;  %v1205_v20 = vmul.f32 0.7978846, %v1173_v7 }
 0x10b   : > { %7957 = vtanh.f32 %v1206_v10  ;;  %v1114_v17 = vmul.f32 %v1082_v12, %v8549_v5  ;;  %v8564_v18 = vadd.f32 %v7126_v14, %v8510_v41  ;;  %v948_v19 = vpop.f32.mrb[7].mxu0  ;;  %v1176_v23 = vadd.f32 %v1144_v11, %v8530_v54 }
 0x10c   : > { %v1113_v21 = vmul.f32 %v1081_v13, %v8554_v9  ;;  %v8568_v22 = vadd.f32 %v8510_v41, %v948_v19  ;;  %v1175_v31 = vadd.f32 %v1143_v16, %v8534_v57  ;;  %7959 = vtanh.f32 %v1205_v20 }
 0x10d   : > { %v1146_v24 = vmul.f32 0.044715, %v1114_v17  ;;  %v1084_v25 = vmul.f32 %v8564_v18, %v8564_v18  ;;  %v1208_v38 = vmul.f32 0.7978846, %v1176_v23  ;;  %v8619_v19 = vmul.f32 %v8539_v61, %v8539_v61 }
 0x10e   : > { %v1145_v27 = vmul.f32 0.044715, %v1113_v21  ;;  %v1083_v28 = vmul.f32 %v8568_v22, %v8568_v22  ;;  %v7129_v29 = vpop.f32.mrb[8].mxu0  ;;  %v1207_v51 = vmul.f32 0.7978846, %v1175_v31 }
 0x10f   : > { %v1116_v32 = vmul.f32 %v1084_v25, %v8564_v18  ;;  %v8581_v33 = vadd.f32 %v7129_v29, %v8510_v41  ;;  %v958_v34 = vpop.f32.mrb[9].mxu0  ;;  %v1178_v35 = vadd.f32 %v1146_v24, %v8549_v5  ;;  %7961 = vtanh.f32 %v1208_v38 }
 0x110   : > { %v1115_v36 = vmul.f32 %v1083_v28, %v8568_v22  ;;  %v8586_v37 = vadd.f32 %v8510_v41, %v958_v34  ;;  %v1177_v44 = vadd.f32 %v1145_v27, %v8554_v9  ;;  %7963 = vtanh.f32 %v1207_v51 }
 0x111   : > { %v1148_v39 = vmul.f32 0.044715, %v1116_v32  ;;  %v1086_v40 = vmul.f32 %v8581_v33, %v8581_v33  ;;  %v1210_v59 = vmul.f32 0.7978846, %v1178_v35 }
 0x112   : > { %v1147_v46 = vmul.f32 0.044715, %v1115_v36  ;;  %v1085_v47 = vmul.f32 %v8586_v37, %v8586_v37  ;;  %v7132_v49 = vpop.f32.mrb[10].mxu0  ;;  %v1209_v7 = vmul.f32 0.7978846, %v1177_v44 }
 0x113   : > { %v1180_v53 = vadd.f32 %v1148_v39, %v8564_v18  ;;  %v1118_v55 = vmul.f32 %v1086_v40, %v8581_v33  ;;  %v8599_v56 = vadd.f32 %v7132_v49, %v8510_v41  ;;  %v968_v58 = vpop.f32.mrb[11].mxu0  ;;  %7965 = vtanh.f32 %v1210_v59 }
 0x114   : > { %v1179_v60 = vadd.f32 %v1147_v46, %v8568_v22  ;;  %v1117_v62 = vmul.f32 %v1085_v47, %v8586_v37  ;;  %v8604_v63 = vadd.f32 %v8510_v41, %v968_v58  ;;  %7967 = vtanh.f32 %v1209_v7 }
 0x115   : > { %v7958_v0 = vpop.eup %7957  ;;  %v1150_v1 = vmul.f32 0.044715, %v1118_v55  ;;  %v1088_v3 = vmul.f32 %v8599_v56, %v8599_v56  ;;  %v1212_v12 = vmul.f32 0.7978846, %v1180_v53 }
 0x116   : > { %v1270_v6 = vadd.f32 1.0, %v7958_v0  ;;  %v1149_v8 = vmul.f32 0.044715, %v1117_v62  ;;  %v1087_v10 = vmul.f32 %v8604_v63, %v8604_v63  ;;  %v7135_v11 = vpop.f32.mrb[12].mxu0  ;;  %v1211_v16 = vmul.f32 0.7978846, %v1179_v60  ;;  %v7960_v25 = vpop.eup %7959 }
 0x117   : > { %v1120_v13 = vmul.f32 %v1088_v3, %v8599_v56  ;;  %v8614_v14 = vadd.f32 %v7135_v11, %v8510_v41  ;;  %v978_v15 = vpop.f32.mrb[13].mxu0  ;;  %v1182_v20 = vadd.f32 %v1150_v1, %v8581_v33  ;;  %7969 = vtanh.f32 %v1212_v12 }
 0x118   : > { %v1119_v17 = vmul.f32 %v1087_v10, %v8604_v63  ;;  %v8625_v24 = vadd.f32 %v8510_v41, %v978_v15  ;;  %v1302_v26 = vmul.f32 0.5, %v1270_v6  ;;  %v1181_v27 = vadd.f32 %v1149_v8, %v8586_v37 }
 0x119   : > { %v1152_v21 = vmul.f32 0.044715, %v1120_v13  ;;  %v1090_v23 = vmul.f32 %v8614_v14, %v8614_v14  ;;  %7971 = vtanh.f32 %v1211_v16  ;;  %v1214_v39 = vmul.f32 0.7978846, %v1182_v20  ;;  %v7962_v55 = vpop.eup %7961 }
 0x11a   : > { %v1151_v28 = vmul.f32 0.044715, %v1119_v17  ;;  %v7138_v29 = vpop.f32.mrb[14].mxu0  ;;  %v1089_v32 = vmul.f32 %v8625_v24, %v8625_v24  ;;  %v1269_v44 = vadd.f32 1.0, %v7960_v25  ;;  %v1334_v46 = vmul.f32 %v1302_v26, %v8513_v43  ;;  %v7964_v7 = vpop.eup %7963 }
 0x11b   : > { %v1184_v30 = vadd.f32 %v1152_v21, %v8599_v56  ;;  %v1122_v31 = vmul.f32 %v1090_v23, %v8614_v14  ;;  %v988_v34 = vpop.f32.mrb[15].mxu0  ;;  %v8634_v36 = vadd.f32 %v7138_v29, %v8510_v41  ;;  %v1213_v47 = vmul.f32 0.7978846, %v1181_v27 }
 0x11c   : > { %v1183_v35 = vadd.f32 %v1151_v28, %v8604_v63  ;;  %v8637_v38 = vadd.f32 %v8510_v41, %v988_v34  ;;  %v1121_v42 = vmul.f32 %v1089_v32, %v8625_v24  ;;  %v1301_v62 = vmul.f32 0.5, %v1269_v44 }
 0x11d   : > { %v1154_v40 = vmul.f32 0.044715, %v1122_v31  ;;  %v1092_v49 = vmul.f32 %v8634_v36, %v8634_v36  ;;  %v1216_v58 = vmul.f32 0.7978846, %v1184_v30  ;;  %v7966_v13 = vpop.eup %7965  ;;  %7973 = vtanh.f32 %v1214_v39 }
 0x11e   : > { %v1091_v51 = vmul.f32 %v8637_v38, %v8637_v38  ;;  %v7141_v53 = vpop.f32.mrb[16].mxu0  ;;  %v1153_v60 = vmul.f32 0.044715, %v1121_v42  ;;  %v1215_v1 = vmul.f32 0.7978846, %v1183_v35  ;;  %v1333_v11 = vmul.f32 %v1301_v62, %v8516_v45  ;;  %v7968_v25 = vpop.eup %7967 }
 0x11f   : > { %v1186_v59 = vadd.f32 %v1154_v40, %v8614_v14  ;;  %v998_v0 = vpop.f32.mrb[17].mxu0  ;;  %v1124_v3 = vmul.f32 %v1092_v49, %v8634_v36  ;;  %v8649_v6 = vadd.f32 %v7141_v53, %v8510_v41  ;;  %7975 = vtanh.f32 %v1213_v47 }
 0x120   : > { %v1123_v43 = vmul.f32 %v1091_v51, %v8637_v38  ;;  %v1185_v10 = vadd.f32 %v1153_v60, %v8625_v24  ;;  %v8654_v12 = vadd.f32 %v8510_v41, %v998_v0  ;;  %v8660_v21 = vadd.f32 %v8594_v50, %v8521_v48  ;;  %7167 = vmatprep.mubr.msk.f32.mxu1 %vm1374_vm4, %v1333_v11 }
 0x121   : > { %v1218_v8 = vmul.f32 0.7978846, %v1186_v59  ;;  %v1156_v15 = vmul.f32 0.044715, %v1124_v3  ;;  %v1094_v17 = vmul.f32 %v8649_v6, %v8649_v6  ;;  %7977 = vtanh.f32 %v1216_v58  ;;  %7168 = vmatmul.mubr.msk.f32.vlgmr.msra.gmra.mrb[4].mxu1 %vm1374_vm4, %v1334_v46  ;;  %v8669_v29 = vpop.eup %7969 }
 0x122   : > { %v1155_v16 = vmul.f32 0.044715, %v1123_v43  ;;  %v7144_v20 = vpop.f32.mrb[18].mxu0  ;;  %v1093_v45 = vmul.f32 %v8654_v12, %v8654_v12  ;;  %7979 = vtanh.f32 %v1215_v1  ;;  %v1217_v50 = vmul.f32 0.7978846, %v1185_v10 }
 0x123   : > { %v1008_v23 = vpop.f32.mrb[19].mxu0  ;;  %v1188_v26 = vadd.f32 %v1156_v15, %v8634_v36  ;;  %v1126_v28 = vmul.f32 %v1094_v17, %v8649_v6  ;;  %v1271_v31 = vadd.f32 1.0, %v7964_v7  ;;  %v7972_v32 = vpop.eup %7971  ;;  %7981 = vtanh.f32 %v1218_v8 }
 0x124   : > { %v1187_v27 = vadd.f32 %v1155_v16, %v8637_v38  ;;  %v1125_v30 = vmul.f32 %v1093_v45, %v8654_v12  ;;  %v8674_v34 = vadd.f32 %v8608_v4, %v8526_v52  ;;  %v8678_v39 = vmul.f32 %v8619_v19, %v8539_v61 }
 0x125   : > { %v1158_v35 = vmul.f32 0.044715, %v1126_v28  ;;  %v1220_v40 = vmul.f32 0.7978846, %v1188_v26  ;;  %v1303_v44 = vmul.f32 0.5, %v1271_v31  ;;  %v8681_v46 = vadd.f32 %v7144_v20, %v8510_v41 }
 0x126   : > { %v1157_v42 = vmul.f32 0.044715, %v1125_v30  ;;  %v7147_v47 = vpop.f32.mrb[20].mxu0  ;;  %v1219_v49 = vmul.f32 0.7978846, %v1187_v27  ;;  %v1272_v53 = vadd.f32 1.0, %v7962_v55  ;;  %v8685_v58 = vadd.f32 %v8510_v41, %v1008_v23 }
 0x127   : > { %v1190_v51 = vadd.f32 %v1158_v35, %v8649_v6  ;;  %v1018_v4 = vpop.f32.mrb[21].mxu0  ;;  %7983 = vtanh.f32 %v1217_v50  ;;  %v8690_v19 = vmul.f32 %v8544_v2, %v8544_v2  ;;  %v1335_v60 = vmul.f32 %v1303_v44, %v8534_v57  ;;  %v8701_v11 = vpop.eup %7973 }
 0x128   : > { %v1189_v59 = vadd.f32 %v1157_v42, %v8654_v12  ;;  %v1096_v0 = vmul.f32 %v8681_v46, %v8681_v46  ;;  %v1304_v1 = vmul.f32 0.5, %v1272_v53  ;;  %v1095_v55 = vmul.f32 %v8685_v58, %v8685_v58 }
 0x129   : > { %v1222_v62 = vmul.f32 0.7978846, %v1190_v51  ;;  %7985 = vtanh.f32 %v1220_v40  ;;  %7170 = vmatprep.mubr.msk.f32.mxu1 %vm1374_vm4, %v1335_v60  ;;  %v1273_v7 = vadd.f32 1.0, %v7968_v25  ;;  %v8699_v8 = vadd.f32 %v7147_v47, %v8510_v41  ;;  %v7976_v17 = vpop.eup %7975 }
 0x12a   : > { %v7150_v3 = vpop.f32.mrb[22].mxu0  ;;  %v1221_v43 = vmul.f32 0.7978846, %v1189_v59  ;;  %7987 = vtanh.f32 %v1219_v49  ;;  %v1128_v57 = vmul.f32 %v1096_v0, %v8681_v46  ;;  %v1336_v15 = vmul.f32 %v1304_v1, %v8530_v54 }
 0x12b   : > { %v1028_v10 = vpop.f32.mrb[23].mxu0  ;;  %v1127_v16 = vmul.f32 %v1095_v55, %v8685_v58  ;;  %7989 = vtanh.f32 %v1222_v62  ;;  %v1305_v20 = vmul.f32 0.5, %v1273_v7  ;;  %v1098_v45 = vmul.f32 %v8699_v8, %v8699_v8  ;;  %v8708_v25 = vpop.eup %7977 }
 0x12c   : > { %v1274_v23 = vadd.f32 1.0, %v7966_v13  ;;  %7991 = vtanh.f32 %v1221_v43  ;;  %v1160_v26 = vmul.f32 0.044715, %v1128_v57  ;;  %7171 = vmatmul.mubr.msk.f32.gmra.mrb[6].mxu1 %vm1374_vm4, %v1336_v15  ;;  %v8712_v28 = vadd.f32 %v8510_v41, %v1018_v4  ;;  %v7980_v50 = vpop.eup %7979 }
 0x12d   : > { %v1159_v27 = vmul.f32 0.044715, %v1127_v16  ;;  %v1337_v30 = vmul.f32 %v1305_v20, %v8554_v9  ;;  %v1130_v31 = vmul.f32 %v1098_v45, %v8699_v8  ;;  %v1275_v40 = vadd.f32 1.0, %v7972_v32  ;;  %v8716_v13 = vpop.eup %7981 }
 0x12e   : > { %v7153_v54 = vpop.f32.mrb[24].mxu0  ;;  %v1306_v35 = vmul.f32 0.5, %v1274_v23  ;;  %v1192_v44 = vadd.f32 %v1160_v26, %v8681_v46  ;;  %v1097_v49 = vmul.f32 %v8712_v28, %v8712_v28  ;;  %v8723_v51 = vadd.f32 %v7150_v3, %v8510_v41 }
 0x12f   : > { %v1038_v42 = vpop.f32.mrb[25].mxu0  ;;  %v1191_v47 = vadd.f32 %v1159_v27, %v8685_v58  ;;  %7173 = vmatprep.mubr.msk.f32.mxu1 %vm1374_vm4, %v1337_v30  ;;  %v1162_v9 = vmul.f32 0.044715, %v1130_v31  ;;  %v1307_v4 = vmul.f32 0.5, %v1275_v40  ;;  %v1276_v32 = vadd.f32 1.0, %v8669_v29 }
 0x130   : > { %v1338_v53 = vmul.f32 %v1306_v35, %v8549_v5  ;;  %v1224_v59 = vmul.f32 0.7978846, %v1192_v44  ;;  %v1129_v62 = vmul.f32 %v1097_v49, %v8712_v28  ;;  %v1100_v0 = vmul.f32 %v8723_v51, %v8723_v51 }
 0x131   : > { %v1223_v60 = vmul.f32 0.7978846, %v1191_v47  ;;  %v7984_v55 = vpop.eup %7983  ;;  %v1194_v3 = vadd.f32 %v1162_v9, %v8699_v8  ;;  %v1339_v43 = vmul.f32 %v1307_v4, %v8568_v22  ;;  %v1308_v7 = vmul.f32 0.5, %v1276_v32 }
 0x132   : > { %v7156_v1 = vpop.f32.mrb[26].mxu0  ;;  %7174 = vmatmul.mubr.msk.f32.gmra.mrb[8].mxu1 %vm1374_vm4, %v1338_v53  ;;  %v8735_v5 = vadd.f32 %v8510_v41, %v1028_v10  ;;  %7993 = vtanh.f32 %v1224_v59  ;;  %v1161_v57 = vmul.f32 0.044715, %v1129_v62  ;;  %v1132_v15 = vmul.f32 %v1100_v0, %v8723_v51 }
 0x133   : > { %v1048_v29 = vpop.f32.mrb[27].mxu0  ;;  %v1277_v16 = vadd.f32 1.0, %v7976_v17  ;;  %v8738_v20 = vpop.eup %7985  ;;  %7995 = vtanh.f32 %v1223_v60  ;;  %v1226_v45 = vmul.f32 0.7978846, %v1194_v3  ;;  %7176 = vmatprep.mubr.msk.f32.mxu1 %vm1374_vm4, %v1339_v43  ;;  %v1340_v23 = vmul.f32 %v1308_v7, %v8564_v18 }
 0x134   : > { %v1099_v22 = vmul.f32 %v8735_v5, %v8735_v5  ;;  %v7988_v26 = vpop.eup %7987  ;;  %v1193_v10 = vadd.f32 %v1161_v57, %v8712_v28  ;;  %v1164_v27 = vmul.f32 0.044715, %v1132_v15  ;;  %v8746_v31 = vadd.f32 %v7153_v54, %v8510_v41 }
 0x135   : > { %v1309_v30 = vmul.f32 0.5, %v1277_v16  ;;  %v8748_v17 = vpop.eup %7989  ;;  %7997 = vtanh.f32 %v1226_v45  ;;  %v1278_v18 = vadd.f32 1.0, %v8701_v11  ;;  %v8754_v40 = vadd.f32 %v8510_v41, %v1038_v42 }
 0x136   : > { %7177 = vmatmul.mubr.msk.f32.gmra.mrb[10].mxu1 %vm1374_vm4, %v1340_v23  ;;  %v1131_v35 = vmul.f32 %v1099_v22, %v8735_v5  ;;  %v7992_v44 = vpop.eup %7991  ;;  %v1225_v47 = vmul.f32 0.7978846, %v1193_v10  ;;  %v1196_v49 = vadd.f32 %v1164_v27, %v8723_v51  ;;  %v1102_v54 = vmul.f32 %v8746_v31, %v8746_v31 }
 0x137   : > { %v1341_v9 = vmul.f32 %v1309_v30, %v8586_v37  ;;  %v1310_v4 = vmul.f32 0.5, %v1278_v18  ;;  %v1101_v32 = vmul.f32 %v8754_v40, %v8754_v40  ;;  %v1279_v59 = vadd.f32 1.0, %v7980_v50 }
 0x138   : > { %v1163_v53 = vmul.f32 0.044715, %v1131_v35  ;;  %v1139_v11 = vmul.f32 %v8690_v19, %v8544_v2  ;;  %7999 = vtanh.f32 %v1225_v47  ;;  %v1134_v42 = vmul.f32 %v1102_v54, %v8746_v31 }
 0x139   : > { %7179 = vmatprep.mubr.msk.f32.mxu1 %vm1374_vm4, %v1341_v9  ;;  %v8767_v60 = vadd.f32 %v7156_v1, %v8510_v41  ;;  %v1342_v62 = vmul.f32 %v1310_v4, %v8581_v33  ;;  %v1133_v0 = vmul.f32 %v1101_v32, %v8754_v40  ;;  %v1311_v3 = vmul.f32 0.5, %v1279_v59 }
 0x13a   : > { %v1195_v37 = vadd.f32 %v1163_v53, %v8735_v5  ;;  %v1228_v43 = vmul.f32 0.7978846, %v1196_v49  ;;  %v1166_v50 = vmul.f32 0.044715, %v1134_v42  ;;  %v1280_v7 = vadd.f32 1.0, %v8708_v25 }
 0x13b   : > { %v1104_v19 = vmul.f32 %v8767_v60, %v8767_v60  ;;  %7180 = vmatmul.mubr.msk.f32.gmra.mrb[12].mxu1 %vm1374_vm4, %v1342_v62  ;;  %v1165_v15 = vmul.f32 0.044715, %v1133_v0  ;;  %v1343_v1 = vmul.f32 %v1311_v3, %v8604_v63  ;;  %v8778_v16 = vadd.f32 %v8510_v41, %v1048_v29 }
 0x13c   : > { %v1227_v57 = vmul.f32 0.7978846, %v1195_v37  ;;  %v7994_v33 = vpop.eup %7993  ;;  %v1198_v45 = vadd.f32 %v1166_v50, %v8746_v31  ;;  %v1312_v22 = vmul.f32 0.5, %v1280_v7  ;;  %v1281_v10 = vadd.f32 1.0, %v7984_v55 }
 0x13d   : > { %v1136_v23 = vmul.f32 %v1104_v19, %v8767_v60  ;;  %v7996_v27 = vpop.eup %7995  ;;  %v1197_v25 = vadd.f32 %v1165_v15, %v8754_v40  ;;  %7182 = vmatprep.mubr.msk.f32.mxu1 %vm1374_vm4, %v1343_v1  ;;  %v1103_v30 = vmul.f32 %v8778_v16, %v8778_v16  ;;  %v1282_v63 = vadd.f32 1.0, %v8716_v13 }
 0x13e   : > { %8001 = vtanh.f32 %v1227_v57  ;;  %v1171_v41 = vmul.f32 0.044715, %v1139_v11  ;;  %v1344_v35 = vmul.f32 %v1312_v22, %v8599_v56  ;;  %v1313_v18 = vmul.f32 0.5, %v1281_v10 }
 0x13f   : > { %v1168_v29 = vmul.f32 0.044715, %v1136_v23  ;;  %v7998_v47 = vpop.eup %7997  ;;  %v1229_v49 = vmul.f32 0.7978846, %v1197_v25  ;;  %v1135_v55 = vmul.f32 %v1103_v30, %v8778_v16  ;;  %v1314_v9 = vmul.f32 0.5, %v1282_v63 }
 0x140   : > { %v1283_v54 = vadd.f32 1.0, %v7988_v26  ;;  %8003 = vtanh.f32 %v1228_v43  ;;  %v1230_v53 = vmul.f32 0.7978846, %v1198_v45  ;;  %7183 = vmatmul.mubr.msk.f32.gmra.mrb[14].mxu1 %vm1374_vm4, %v1344_v35  ;;  %v1345_v4 = vmul.f32 %v1313_v18, %v8625_v24 }
 0x141   : > { %v1284_v32 = vadd.f32 1.0, %v8738_v20  ;;  %8005 = vtanh.f32 %v1229_v49  ;;  %v1200_v13 = vadd.f32 %v1168_v29, %v8767_v60  ;;  %v1167_v59 = vmul.f32 0.044715, %v1135_v55 }
 0x142   : > { %v1315_v56 = vmul.f32 0.5, %v1283_v54  ;;  %v8000_v11 = vpop.eup %7999  ;;  %7185 = vmatprep.mubr.msk.f32.mxu1 %vm1374_vm4, %v1345_v4  ;;  %v1346_v42 = vmul.f32 %v1314_v9, %v8614_v14  ;;  %v1285_v26 = vadd.f32 1.0, %v7992_v44  ;;  %v1286_v62 = vadd.f32 1.0, %v8748_v17 }
 0x143   : > { %v1316_v37 = vmul.f32 0.5, %v1284_v32  ;;  %v1233_v0 = vmul.f32 0.7978846, %v8674_v34  ;;  %v1199_v24 = vadd.f32 %v1167_v59, %v8778_v16  ;;  %v1287_v3 = vadd.f32 1.0, %v7996_v27 }
 0x144   : > { %v1347_v20 = vmul.f32 %v1315_v56, %v8637_v38  ;;  %v1172_v43 = vmul.f32 0.044715, %v8678_v39  ;;  %v1203_v50 = vadd.f32 %v1171_v41, %v8544_v2  ;;  %8007 = vtanh.f32 %v1230_v53  ;;  %7186 = vmatmul.mubr.msk.f32.gmra.mrb[16].mxu1 %vm1374_vm4, %v1346_v42 }
 0x145   : > { %v1317_v19 = vmul.f32 0.5, %v1285_v26  ;;  %v1232_v14 = vmul.f32 0.7978846, %v1200_v13  ;;  %v1231_v7 = vmul.f32 0.7978846, %v1199_v24  ;;  %v1319_v17 = vmul.f32 0.5, %v1287_v3 }
 0x146   : > { %7188 = vmatprep.mubr.msk.f32.mxu1 %vm1374_vm4, %v1347_v20  ;;  %v1289_v44 = vadd.f32 1.0, %v8000_v11  ;;  %v1348_v34 = vmul.f32 %v1316_v37, %v8634_v36  ;;  %v1318_v38 = vmul.f32 0.5, %v1286_v62  ;;  %v1288_v15 = vadd.f32 1.0, %v7994_v33 }
 0x147   : > { %v1349_v57 = vmul.f32 %v1317_v19, %v8654_v12  ;;  %8009 = vtanh.f32 %v1231_v7  ;;  %v1234_v39 = vmul.f32 0.7978846, %v8660_v21  ;;  %v1204_v45 = vadd.f32 %v1172_v43, %v8539_v61 }
 0x148   : > { %v8002_v1 = vpop.eup %8001  ;;  %8011 = vtanh.f32 %v1233_v0  ;;  %7189 = vmatmul.mubr.msk.f32.gmra.mrb[18].mxu1 %vm1374_vm4, %v1348_v34  ;;  %v1351_v23 = vmul.f32 %v1319_v17, %v8685_v58  ;;  %v1321_v22 = vmul.f32 0.5, %v1289_v44  ;;  %v1235_v12 = vmul.f32 0.7978846, %v1203_v50 }
 0x149   : > { %8013 = vtanh.f32 %v1232_v14  ;;  %7191 = vmatprep.mubr.msk.f32.mxu1 %vm1374_vm4, %v1349_v57  ;;  %v1291_v36 = vadd.f32 1.0, %v8002_v1  ;;  %v1350_v33 = vmul.f32 %v1318_v38, %v8649_v6  ;;  %v1320_v27 = vmul.f32 0.5, %v1288_v15 }
 0x14a   : > { %v8004_v10 = vpop.eup %8003  ;;  %v1290_v25 = vadd.f32 1.0, %v7998_v47  ;;  %8015 = vtanh.f32 %v1234_v39  ;;  %v1236_v21 = vmul.f32 0.7978846, %v1204_v45  ;;  %v1353_v63 = vmul.f32 %v1321_v22, %v8712_v28 }
 0x14b   : > { %v8006_v30 = vpop.eup %8005  ;;  %v1323_v41 = vmul.f32 0.5, %v1291_v36  ;;  %8017 = vtanh.f32 %v1235_v12  ;;  %v1352_v35 = vmul.f32 %v1320_v27, %v8681_v46  ;;  %v1292_v49 = vadd.f32 1.0, %v8004_v10 }
 0x14c   : > { %7192 = vmatmul.mubr.msk.f32.gmra.mrb[20].mxu1 %vm1374_vm4, %v1350_v33  ;;  %v1293_v29 = vadd.f32 1.0, %v8006_v30  ;;  %v1322_v18 = vmul.f32 0.5, %v1290_v25  ;;  %8019 = vtanh.f32 %v1236_v21  ;;  %v8246_v7 = vmov 0.0|0.0  }
 0x14d   : > { %7194 = vmatprep.mubr.msk.f32.mxu1 %vm1374_vm4, %v1351_v23  ;;  %v1355_v47 = vmul.f32 %v1323_v41, %v8735_v5  ;;  %v1324_v54 = vmul.f32 0.5, %v1292_v49  ;;  %7682 = vmatprep.subr.bf16.mxu1 %v8246_v7 }
 0x14e   : > { %v8008_v58 = vpop.eup %8007  ;;  %v1325_v55 = vmul.f32 0.5, %v1293_v29  ;;  %v1354_v28 = vmul.f32 %v1322_v18, %v8699_v8 }
 0x14f   : > { %v1294_v53 = vadd.f32 1.0, %v8008_v58  ;;  %v1356_v56 = vmul.f32 %v1324_v54, %v8723_v51 }
 0x150   : > { %7195 = vmatmul.mubr.msk.f32.gmra.mrb[22].mxu1 %vm1374_vm4, %v1352_v35  ;;  %v1357_v46 = vmul.f32 %v1325_v55, %v8754_v40 }
 0x151   : > { %v8010_v6 = vpop.eup %8009  ;;  %7197 = vmatprep.mubr.msk.f32.mxu1 %vm1374_vm4, %v1353_v63  ;;  %v1326_v11 = vmul.f32 0.5, %v1294_v53 }
 0x152   : > { %v8012_v9 = vpop.eup %8011  ;;  %v1295_v4 = vadd.f32 1.0, %v8010_v6 }
 0x153   : > { %v8014_v32 = vpop.eup %8013  ;;  %v1297_v42 = vadd.f32 1.0, %v8012_v9  ;;  %v1358_v26 = vmul.f32 %v1326_v11, %v8746_v31 }
 0x154   : > { %7198 = vmatmul.mubr.msk.f32.gmra.mrb[24].mxu1 %vm1374_vm4, %v1354_v28  ;;  %v1327_v13 = vmul.f32 0.5, %v1295_v4  ;;  %v8016_v59 = vpop.eup %8015  ;;  %v1296_v5 = vadd.f32 1.0, %v8014_v32 }
 0x155   : > { %7200 = vmatprep.mubr.msk.f32.mxu1 %vm1374_vm4, %v1355_v47  ;;  %v8018_v37 = vpop.eup %8017  ;;  %v1298_v0 = vadd.f32 1.0, %v8016_v59  ;;  %v1329_v40 = vmul.f32 0.5, %v1297_v42 }
 0x156   : > { %v1359_v8 = vmul.f32 %v1327_v13, %v8778_v16  ;;  %v1328_v62 = vmul.f32 0.5, %v1296_v5  ;;  %v8020_v24 = vpop.eup %8019  ;;  %v1299_v20 = vadd.f32 1.0, %v8018_v37 }
 0x157   : > { %v1330_v3 = vmul.f32 0.5, %v1298_v0  ;;  %v1300_v43 = vadd.f32 1.0, %v8020_v24  ;;  %v1361_v50 = vmul.f32 %v1329_v40, %v8526_v52  ;;  %v1985_v52 = vld [vmem:[%s10835_s24 + $0x8] sm:$0xff]  ;;  %s8185_s24 = sshll.u32 %s8249_s5, 4  ;;  %s8186_s24 = int_to_ptr.vmem [resolvable:$false] %s8185_s24 }
 0x158   : > { %7201 = vmatmul.mubr.msk.f32.gmra.mrb[26].mxu1 %vm1374_vm4, %v1356_v56  ;;  %v1360_v51 = vmul.f32 %v1328_v62, %v8767_v60  ;;  %v1331_v19 = vmul.f32 0.5, %v1299_v20 }
 0x159   : > { %7203 = vmatprep.mubr.msk.f32.mxu1 %vm1374_vm4, %v1357_v46  ;;  %v1362_v31 = vmul.f32 %v1330_v3, %v8521_v48  ;;  %v1332_v16 = vmul.f32 0.5, %v1300_v43  ;;  %v8846_v48 = vld [vmem:[%s10837_s1] ss:$0 sm:$0xff]  ;;  %s6371_s1 = sshll.u32 %s702_s27, 4  ;;  %s10737_s1 = int_to_ptr.vmem [resolvable:$true] %s6371_s1 }
 0x15a   : > { %v1363_v14 = vmul.f32 %v1331_v19, %v8544_v2  ;;  %s8181_s6 = scalar_lea.vmem %s10737_s1, 16  ;;  %p8188_p0 = scmp.lt.s32.totalorder %s10737_s1, %s8186_s24 }
 0x15b   : > { %v1364_v60 = vmul.f32 %v1332_v16, %v8539_v61  ;;  %p8182_p11 = scmp.ne.s32.totalorder %s10737_s1, %s8181_s6 }
 0x15c   : > { %7204 = vmatmul.mubr.msk.f32.gmra.mrb[28].mxu1 %vm1374_vm4, %v1358_v26 }
 0x15d   : > { %7206 = vmatprep.mubr.msk.f32.mxu1 %vm1374_vm4, %v1359_v8  ;;  %p8183_p12 = pnand %p8182_p11, %p8408_p5 }
 0x15f   : > { %p8184_p13 = pneg %p8183_p12 }
 0x160   : > { %7207 = vmatmul.mubr.msk.f32.gmra.mrb[30].mxu1 %vm1374_vm4, %v1360_v51 }
 0x161   : > { %7209 = vmatprep.mubr.msk.f32.mxu1 %vm1374_vm4, %v1361_v50 }
 0x164   : > { %7210 = vmatmul.mubr.msk.f32.gmra.mrb[32].mxu1 %vm1374_vm4, %v1362_v31 }
 0x165   : > { %7212 = vmatprep.mubr.msk.f32.mxu1 %vm1374_vm4, %v1363_v14 }
 0x168   : > { %7213 = vmatmul.mubr.msk.f32.gmra.mrb[34].mxu1 %vm1374_vm4, %v1364_v60 }
 0x169   : > { %2192 = vmatprep.mubr.f32.mxu1 %v1985_v52 }
 0x1f4   : > { %v7169_v2 = vpop.f32.mrb[4].mxu1 }
 0x1f5   : > { %v8849_v17 = vadd.f32 %v7169_v2, %v8846_v48  ;;  %v1537_v61 = vpop.f32.mrb[5].mxu1 }
 0x1f6   : > { %v8852_v44 = vadd.f32 %v8846_v48, %v1537_v61 }
 0x1f7   : > { %v1697_v34 = vmul.f32 %v8849_v17, %v8849_v17 }
 0x1f8   : > { %v1696_v57 = vmul.f32 %v8852_v44, %v8852_v44 }
 0x1f9   : > { %v1729_v38 = vmul.f32 %v1697_v34, %v8849_v17 }
 0x1fa   : > { %v1728_v15 = vmul.f32 %v1696_v57, %v8852_v44 }
 0x1fb   : > { %v1761_v1 = vmul.f32 0.044715, %v1729_v38 }
 0x1fc   : > { %v1760_v39 = vmul.f32 0.044715, %v1728_v15 }
 0x1fd   : > { %v1793_v45 = vadd.f32 %v1761_v1, %v8849_v17 }
 0x1fe   : > { %v1792_v23 = vadd.f32 %v1760_v39, %v8852_v44 }
 0x1ff   : > { %v7172_v22 = vpop.f32.mrb[6].mxu1  ;;  %v1825_v36 = vmul.f32 0.7978846, %v1793_v45 }
 0x200   : > { %v8863_v10 = vadd.f32 %v7172_v22, %v8846_v48  ;;  %v1547_v12 = vpop.f32.mrb[7].mxu1  ;;  %v1824_v33 = vmul.f32 0.7978846, %v1792_v23 }
 0x201   : > { %v8866_v27 = vadd.f32 %v8846_v48, %v1547_v12  ;;  %8021 = vtanh.f32 %v1825_v36 }
 0x202   : > { %v1699_v25 = vmul.f32 %v8863_v10, %v8863_v10  ;;  %8023 = vtanh.f32 %v1824_v33 }
 0x203   : > { %v1698_v30 = vmul.f32 %v8866_v27, %v8866_v27 }
 0x204   : > { %v1731_v21 = vmul.f32 %v1699_v25, %v8863_v10 }
 0x205   : > { %v7175_v63 = vpop.f32.mrb[8].mxu1  ;;  %v1730_v41 = vmul.f32 %v1698_v30, %v8866_v27 }
 0x206   : > { %v8875_v29 = vadd.f32 %v7175_v63, %v8846_v48  ;;  %v1557_v58 = vpop.f32.mrb[9].mxu1  ;;  %v1763_v35 = vmul.f32 0.044715, %v1731_v21 }
 0x207   : > { %v8878_v18 = vadd.f32 %v8846_v48, %v1557_v58  ;;  %v1762_v49 = vmul.f32 0.044715, %v1730_v41 }
 0x208   : > { %v1701_v6 = vmul.f32 %v8875_v29, %v8875_v29  ;;  %v1795_v47 = vadd.f32 %v1763_v35, %v8863_v10 }
 0x209   : > { %v1700_v55 = vmul.f32 %v8878_v18, %v8878_v18  ;;  %v7178_v9 = vpop.f32.mrb[10].mxu1  ;;  %v1794_v28 = vadd.f32 %v1762_v49, %v8866_v27 }
 0x20a   : > { %v1733_v54 = vmul.f32 %v1701_v6, %v8875_v29  ;;  %v8888_v53 = vadd.f32 %v7178_v9, %v8846_v48  ;;  %v1567_v4 = vpop.f32.mrb[11].mxu1  ;;  %v1827_v32 = vmul.f32 0.7978846, %v1795_v47 }
 0x20b   : > { %v1732_v46 = vmul.f32 %v1700_v55, %v8878_v18  ;;  %v8892_v13 = vadd.f32 %v8846_v48, %v1567_v4  ;;  %v1826_v59 = vmul.f32 0.7978846, %v1794_v28  ;;  %v8022_v5 = vpop.eup %8021 }
 0x20c   : > { %v1765_v56 = vmul.f32 0.044715, %v1733_v54  ;;  %v1703_v11 = vmul.f32 %v8888_v53, %v8888_v53  ;;  %8025 = vtanh.f32 %v1827_v32  ;;  %v8024_v8 = vpop.eup %8023  ;;  %v1889_v26 = vadd.f32 1.0, %v8022_v5 }
 0x20d   : > { %v1764_v42 = vmul.f32 0.044715, %v1732_v46  ;;  %v1702_v37 = vmul.f32 %v8892_v13, %v8892_v13  ;;  %8027 = vtanh.f32 %v1826_v59  ;;  %v1888_v24 = vadd.f32 1.0, %v8024_v8 }
 0x20e   : > { %v1797_v62 = vadd.f32 %v1765_v56, %v8875_v29  ;;  %v1735_v0 = vmul.f32 %v1703_v11, %v8888_v53  ;;  %v7181_v51 = vpop.f32.mrb[12].mxu1  ;;  %v1921_v3 = vmul.f32 0.5, %v1889_v26 }
 0x20f   : > { %v1796_v40 = vadd.f32 %v1764_v42, %v8878_v18  ;;  %v1734_v20 = vmul.f32 %v1702_v37, %v8892_v13  ;;  %v8903_v19 = vadd.f32 %v7181_v51, %v8846_v48  ;;  %v1577_v31 = vpop.f32.mrb[13].mxu1  ;;  %v1920_v16 = vmul.f32 0.5, %v1888_v24 }
 0x210   : > { %v1829_v43 = vmul.f32 0.7978846, %v1797_v62  ;;  %v1767_v50 = vmul.f32 0.044715, %v1735_v0  ;;  %v8906_v52 = vadd.f32 %v8846_v48, %v1577_v31  ;;  %v1953_v2 = vmul.f32 %v1921_v3, %v8849_v17 }
 0x211   : > { %v1828_v14 = vmul.f32 0.7978846, %v1796_v40  ;;  %v1766_v60 = vmul.f32 0.044715, %v1734_v20  ;;  %v1705_v34 = vmul.f32 %v8903_v19, %v8903_v19  ;;  %v1952_v57 = vmul.f32 %v1920_v16, %v8852_v44 }
 0x212   : > { %8029 = vtanh.f32 %v1829_v43  ;;  %v1799_v61 = vadd.f32 %v1767_v50, %v8888_v53  ;;  %v1704_v15 = vmul.f32 %v8906_v52, %v8906_v52 }
 0x213   : > { %8031 = vtanh.f32 %v1828_v14  ;;  %v1798_v38 = vadd.f32 %v1766_v60, %v8892_v13  ;;  %v1737_v39 = vmul.f32 %v1705_v34, %v8903_v19  ;;  %v7184_v45 = vpop.f32.mrb[14].mxu1  ;;  %v7683_v12 = vpack.c.bf16 %v1953_v2, %v1952_v57 }
 0x214   : > { %v1831_v1 = vmul.f32 0.7978846, %v1799_v61  ;;  %v1736_v17 = vmul.f32 %v1704_v15, %v8906_v52  ;;  %v8919_v22 = vadd.f32 %v7184_v45, %v8846_v48  ;;  %v1587_v36 = vpop.f32.mrb[15].mxu1 }
 0x215   : > { %v1830_v23 = vmul.f32 0.7978846, %v1798_v38  ;;  %v1769_v44 = vmul.f32 0.044715, %v1737_v39  ;;  %v8922_v33 = vadd.f32 %v8846_v48, %v1587_v36  ;;  %7684 = vmatpush1.bf16.msra.mxu1 %v7683_v12 }
 0x216   : > { %8033 = vtanh.f32 %v1831_v1  ;;  %v8026_v25 = vpop.eup %8025  ;;  %v1768_v30 = vmul.f32 0.044715, %v1736_v17  ;;  %v1707_v21 = vmul.f32 %v8919_v22, %v8919_v22  ;;  %7685 = vmatprep.subr.bf16.mxu1 %v8246_v7 }
 0x217   : > { %8035 = vtanh.f32 %v1830_v23  ;;  %v8028_v63 = vpop.eup %8027  ;;  %v1891_v41 = vadd.f32 1.0, %v8026_v25  ;;  %v1801_v58 = vadd.f32 %v1769_v44, %v8903_v19  ;;  %v1706_v35 = vmul.f32 %v8922_v33, %v8922_v33  ;;  %v7187_v49 = vpop.f32.mrb[16].mxu1 }
 0x218   : > { %v1890_v6 = vadd.f32 1.0, %v8028_v63  ;;  %v1800_v47 = vadd.f32 %v1768_v30, %v8906_v52  ;;  %v1739_v55 = vmul.f32 %v1707_v21, %v8919_v22  ;;  %v8933_v9 = vadd.f32 %v7187_v49, %v8846_v48  ;;  %v1597_v28 = vpop.f32.mrb[17].mxu1 }
 0x219   : > { %v1923_v54 = vmul.f32 0.5, %v1891_v41  ;;  %v1833_v4 = vmul.f32 0.7978846, %v1801_v58  ;;  %v1738_v32 = vmul.f32 %v1706_v35, %v8922_v33  ;;  %v8937_v46 = vadd.f32 %v8846_v48, %v1597_v28 }
 0x21a   : > { %v1922_v59 = vmul.f32 0.5, %v1890_v6  ;;  %v1832_v56 = vmul.f32 0.7978846, %v1800_v47  ;;  %v1771_v11 = vmul.f32 0.044715, %v1739_v55  ;;  %v1709_v5 = vmul.f32 %v8933_v9, %v8933_v9 }
 0x21b   : > { %v1955_v37 = vmul.f32 %v1923_v54, %v8863_v10  ;;  %8037 = vtanh.f32 %v1833_v4  ;;  %v1770_v8 = vmul.f32 0.044715, %v1738_v32  ;;  %v1708_v26 = vmul.f32 %v8937_v46, %v8937_v46  ;;  %v7190_v62 = vpop.f32.mrb[18].mxu1 }
 0x21c   : > { %v8030_v42 = vpop.eup %8029  ;;  %v1954_v24 = vmul.f32 %v1922_v59, %v8866_v27  ;;  %8039 = vtanh.f32 %v1832_v56  ;;  %v1803_v20 = vadd.f32 %v1771_v11, %v8919_v22  ;;  %v1607_v51 = vpop.f32.mrb[19].mxu1  ;;  %v1741_v50 = vmul.f32 %v1709_v5, %v8933_v9 }
 0x21d   : > { %v8032_v0 = vpop.eup %8031  ;;  %v1893_v40 = vadd.f32 1.0, %v8030_v42  ;;  %v1802_v43 = vadd.f32 %v1770_v8, %v8922_v33  ;;  %v1740_v10 = vmul.f32 %v1708_v26, %v8937_v46  ;;  %v8950_v14 = vadd.f32 %v7190_v62, %v8846_v48 }
 0x21e   : > { %v1892_v3 = vadd.f32 1.0, %v8032_v0  ;;  %v1835_v16 = vmul.f32 0.7978846, %v1803_v20  ;;  %v8953_v60 = vadd.f32 %v8846_v48, %v1607_v51  ;;  %v1773_v34 = vmul.f32 0.044715, %v1741_v50 }
 0x21f   : > { %v1925_v31 = vmul.f32 0.5, %v1893_v40  ;;  %v1834_v61 = vmul.f32 0.7978846, %v1802_v43  ;;  %v7193_v57 = vpop.f32.mrb[20].mxu1  ;;  %v7686_v38 = vpack.c.bf16 %v1955_v37, %v1954_v24  ;;  %v1772_v45 = vmul.f32 0.044715, %v1740_v10 }
 0x220   : > { %v8034_v27 = vpop.eup %8033  ;;  %v1924_v2 = vmul.f32 0.5, %v1892_v3  ;;  %8041 = vtanh.f32 %v1835_v16  ;;  %v1617_v23 = vpop.f32.mrb[21].mxu1  ;;  %v1805_v12 = vadd.f32 %v1773_v34, %v8933_v9  ;;  %v1711_v30 = vmul.f32 %v8950_v14, %v8950_v14 }
 0x221   : > { %v8036_v15 = vpop.eup %8035  ;;  %v8956_v1 = vmul.f32 %v1925_v31, %v8875_v29  ;;  %v1895_v39 = vadd.f32 1.0, %v8034_v27  ;;  %8043 = vtanh.f32 %v1834_v61  ;;  %7687 = vmatpush1.bf16.msra.mxu1 %v7686_v38  ;;  %v1804_v25 = vadd.f32 %v1772_v45, %v8937_v46 }
 0x222   : > { %v8959_v17 = vmul.f32 %v1924_v2, %v8878_v18  ;;  %v1894_v36 = vadd.f32 1.0, %v8036_v15  ;;  %v1710_v29 = vmul.f32 %v8953_v60, %v8953_v60  ;;  %7688 = vmatprep.subr.bf16.mxu1 %v8246_v7  ;;  %v1837_v63 = vmul.f32 0.7978846, %v1805_v12 }
 0x223   : > { %v1927_v44 = vmul.f32 0.5, %v1895_v39  ;;  %v8969_v18 = vadd.f32 %v7193_v57, %v8846_v48  ;;  %v8972_v41 = vadd.f32 %v8846_v48, %v1617_v23  ;;  %v7196_v58 = vpop.f32.mrb[22].mxu1  ;;  %v1836_v49 = vmul.f32 0.7978846, %v1804_v25 }
 0x224   : > { %v1926_v21 = vmul.f32 0.5, %v1894_v36  ;;  %v1743_v6 = vmul.f32 %v1711_v30, %v8950_v14  ;;  %v1742_v47 = vmul.f32 %v1710_v29, %v8953_v60  ;;  %v1627_v55 = vpop.f32.mrb[23].mxu1  ;;  %8045 = vtanh.f32 %v1837_v63 }
 0x225   : > { %v8975_v35 = vmul.f32 %v1927_v44, %v8888_v53  ;;  %v8038_v28 = vpop.eup %8037  ;;  %v1713_v4 = vmul.f32 %v8969_v18, %v8969_v18  ;;  %v1712_v32 = vmul.f32 %v8972_v41, %v8972_v41  ;;  %8047 = vtanh.f32 %v1836_v49 }
 0x226   : > { %v8980_v54 = vmul.f32 %v1926_v21, %v8892_v13  ;;  %v8040_v59 = vpop.eup %8039  ;;  %v1897_v53 = vadd.f32 1.0, %v8038_v28  ;;  %v1775_v56 = vmul.f32 0.044715, %v1743_v6  ;;  %v1774_v11 = vmul.f32 0.044715, %v1742_v47 }
 0x227   : > { %v1896_v5 = vadd.f32 1.0, %v8040_v59  ;;  %v1745_v42 = vmul.f32 %v1713_v4, %v8969_v18  ;;  %v1744_v37 = vmul.f32 %v1712_v32, %v8972_v41  ;;  %v8989_v13 = vadd.f32 %v7196_v58, %v8846_v48  ;;  %v7199_v8 = vpop.f32.mrb[24].mxu1 }
 0x228   : > { %v1929_v26 = vmul.f32 0.5, %v1897_v53  ;;  %v1807_v62 = vadd.f32 %v1775_v56, %v8950_v14  ;;  %v1806_v0 = vadd.f32 %v1774_v11, %v8953_v60  ;;  %v8994_v24 = vadd.f32 %v8846_v48, %v1627_v55  ;;  %v1637_v40 = vpop.f32.mrb[25].mxu1 }
 0x229   : > { %v1928_v20 = vmul.f32 0.5, %v1896_v5  ;;  %v1777_v51 = vmul.f32 0.044715, %v1745_v42  ;;  %v1776_v3 = vmul.f32 0.044715, %v1744_v37  ;;  %v1715_v43 = vmul.f32 %v8989_v13, %v8989_v13 }
 0x22a   : > { %v8042_v50 = vpop.eup %8041  ;;  %v8999_v10 = vmul.f32 %v1929_v26, %v8903_v19  ;;  %v1839_v31 = vmul.f32 0.7978846, %v1807_v62  ;;  %v1838_v16 = vmul.f32 0.7978846, %v1806_v0  ;;  %v1714_v27 = vmul.f32 %v8994_v24, %v8994_v24 }
 0x22b   : > { %v8044_v2 = vpop.eup %8043  ;;  %v9004_v61 = vmul.f32 %v1928_v20, %v8906_v52  ;;  %v1899_v34 = vadd.f32 1.0, %v8042_v50  ;;  %v1809_v57 = vadd.f32 %v1777_v51, %v8969_v18  ;;  %v1808_v38 = vadd.f32 %v1776_v3, %v8972_v41  ;;  %v7202_v15 = vpop.f32.mrb[26].mxu1 }
 0x22c   : > { %v1898_v39 = vadd.f32 1.0, %v8044_v2  ;;  %8049 = vtanh.f32 %v1839_v31  ;;  %v1747_v19 = vmul.f32 %v1715_v43, %v8989_v13  ;;  %v1746_v45 = vmul.f32 %v1714_v27, %v8994_v24  ;;  %v1647_v23 = vpop.f32.mrb[27].mxu1 }
 0x22d   : > { %v1931_v36 = vmul.f32 0.5, %v1899_v34  ;;  %8051 = vtanh.f32 %v1838_v16  ;;  %v1841_v12 = vmul.f32 0.7978846, %v1809_v57  ;;  %v1840_v44 = vmul.f32 0.7978846, %v1808_v38 }
 0x22e   : > { %v1930_v25 = vmul.f32 0.5, %v1898_v39  ;;  %v1779_v52 = vmul.f32 0.044715, %v1747_v19  ;;  %v1778_v30 = vmul.f32 0.044715, %v1746_v45  ;;  %v9011_v29 = vadd.f32 %v7199_v8, %v8846_v48  ;;  %v8046_v21 = vpop.eup %8045 }
 0x22f   : > { %v9014_v63 = vmul.f32 %v1931_v36, %v8919_v22  ;;  %8053 = vtanh.f32 %v1841_v12  ;;  %v9017_v58 = vadd.f32 %v8846_v48, %v1637_v40  ;;  %v7689_v49 = vpack.c.bf16 %v8956_v1, %v8959_v17  ;;  %v7205_v6 = vpop.f32.mrb[28].mxu1  ;;  %v8048_v47 = vpop.eup %8047 }
 0x230   : > { %v9022_v55 = vmul.f32 %v1930_v25, %v8922_v33  ;;  %v1901_v28 = vadd.f32 1.0, %v8046_v21  ;;  %8055 = vtanh.f32 %v1840_v44  ;;  %v1811_v4 = vadd.f32 %v1779_v52, %v8989_v13  ;;  %v1657_v32 = vpop.f32.mrb[29].mxu1 }
 0x231   : > { %v1900_v59 = vadd.f32 1.0, %v8048_v47  ;;  %v1810_v22 = vadd.f32 %v1778_v30, %v8994_v24  ;;  %v1717_v53 = vmul.f32 %v9011_v29, %v9011_v29  ;;  %v1716_v56 = vmul.f32 %v9017_v58, %v9017_v58  ;;  %7690 = vmatpush1.bf16.msra.mxu1 %v7689_v49 }
 0x232   : > { %v1933_v1 = vmul.f32 0.5, %v1901_v28  ;;  %v1843_v17 = vmul.f32 0.7978846, %v1811_v4  ;;  %v9031_v33 = vadd.f32 %v7202_v15, %v8846_v48  ;;  %7691 = vmatprep.subr.bf16.mxu1 %v8246_v7  ;;  %v9035_v11 = vadd.f32 %v8846_v48, %v1647_v23 }
 0x233   : > { %v1932_v5 = vmul.f32 0.5, %v1900_v59  ;;  %v1842_v42 = vmul.f32 0.7978846, %v1810_v22  ;;  %v1749_v37 = vmul.f32 %v1717_v53, %v9011_v29  ;;  %v1748_v8 = vmul.f32 %v1716_v56, %v9017_v58  ;;  %v7208_v26 = vpop.f32.mrb[30].mxu1 }
 0x234   : > { %v9040_v62 = vmul.f32 %v1933_v1, %v8933_v9  ;;  %8057 = vtanh.f32 %v1843_v17  ;;  %v1719_v0 = vmul.f32 %v9031_v33, %v9031_v33  ;;  %v1718_v40 = vmul.f32 %v9035_v11, %v9035_v11  ;;  %v1667_v20 = vpop.f32.mrb[31].mxu1 }
 0x235   : > { %v9047_v51 = vmul.f32 %v1932_v5, %v8937_v46  ;;  %8059 = vtanh.f32 %v1842_v42  ;;  %v1781_v3 = vmul.f32 0.044715, %v1749_v37  ;;  %v1780_v43 = vmul.f32 0.044715, %v1748_v8 }
 0x236   : > { %v8050_v50 = vpop.eup %8049  ;;  %v1751_v31 = vmul.f32 %v1719_v0, %v9031_v33  ;;  %v1750_v9 = vmul.f32 %v1718_v40, %v9035_v11  ;;  %v7692_v16 = vpack.c.bf16 %v8975_v35, %v8980_v54  ;;  %v9054_v27 = vadd.f32 %v7205_v6, %v8846_v48 }
 0x237   : > { %v8052_v2 = vpop.eup %8051  ;;  %v1903_v34 = vadd.f32 1.0, %v8050_v50  ;;  %v1813_v57 = vadd.f32 %v1781_v3, %v9011_v29  ;;  %v1812_v46 = vadd.f32 %v1780_v43, %v9017_v58  ;;  %v9059_v38 = vadd.f32 %v8846_v48, %v1657_v32  ;;  %v7211_v15 = vpop.f32.mrb[32].mxu1 }
 0x238   : > { %v1902_v39 = vadd.f32 1.0, %v8052_v2  ;;  %v1783_v19 = vmul.f32 0.044715, %v1751_v31  ;;  %v1782_v45 = vmul.f32 0.044715, %v1750_v9  ;;  %7693 = vmatpush1.bf16.msra.mxu1 %v7692_v16  ;;  %v1721_v35 = vmul.f32 %v9054_v27, %v9054_v27  ;;  %v1677_v54 = vpop.f32.mrb[33].mxu1 }
 0x239   : > { %v8054_v23 = vpop.eup %8053  ;;  %v1935_v36 = vmul.f32 0.5, %v1903_v34  ;;  %v1845_v12 = vmul.f32 0.7978846, %v1813_v57  ;;  %v1844_v44 = vmul.f32 0.7978846, %v1812_v46  ;;  %7694 = vmatprep.subr.bf16.mxu1 %v8246_v7  ;;  %v1720_v25 = vmul.f32 %v9059_v38, %v9059_v38 }
 0x23a   : > { %v8056_v52 = vpop.eup %8055  ;;  %v1934_v30 = vmul.f32 0.5, %v1902_v39  ;;  %v1905_v21 = vadd.f32 1.0, %v8054_v23  ;;  %v1815_v49 = vadd.f32 %v1783_v19, %v9031_v33  ;;  %v1814_v6 = vadd.f32 %v1782_v45, %v9035_v11 }
 0x23b   : > { %v9069_v47 = vmul.f32 %v1935_v36, %v8950_v14  ;;  %v1904_v28 = vadd.f32 1.0, %v8056_v52  ;;  %8061 = vtanh.f32 %v1845_v12  ;;  %v1753_v4 = vmul.f32 %v1721_v35, %v9054_v27  ;;  %v7214_v32 = vpop.f32.mrb[34].mxu1 }
 0x23c   : > { %v9073_v59 = vmul.f32 %v1934_v30, %v8953_v60  ;;  %v1937_v22 = vmul.f32 0.5, %v1905_v21  ;;  %8063 = vtanh.f32 %v1844_v44  ;;  %v1847_v53 = vmul.f32 0.7978846, %v1815_v49  ;;  %v1687_v56 = vpop.f32.mrb[35].mxu1 }
 0x23d   : > { %v1936_v1 = vmul.f32 0.5, %v1904_v28  ;;  %v1846_v17 = vmul.f32 0.7978846, %v1814_v6  ;;  %v1785_v5 = vmul.f32 0.044715, %v1753_v4  ;;  %v1752_v42 = vmul.f32 %v1720_v25, %v9059_v38 }
 0x23e   : > { %v8058_v37 = vpop.eup %8057  ;;  %v9077_v14 = vmul.f32 %v1937_v22, %v8969_v18  ;;  %8065 = vtanh.f32 %v1847_v53  ;;  %v7695_v8 = vpack.c.bf16 %v8999_v10, %v9004_v61  ;;  %v9082_v60 = vadd.f32 %v7208_v26, %v8846_v48 }
 0x23f   : > { %v8060_v0 = vpop.eup %8059  ;;  %v9085_v40 = vmul.f32 %v1936_v1, %v8972_v41  ;;  %v1907_v3 = vadd.f32 1.0, %v8058_v37  ;;  %8067 = vtanh.f32 %v1846_v17  ;;  %v1817_v43 = vadd.f32 %v1785_v5, %v9054_v27 }
 0x240   : > { %v1906_v50 = vadd.f32 1.0, %v8060_v0  ;;  %v1784_v31 = vmul.f32 0.044715, %v1752_v42  ;;  %7696 = vmatpush1.bf16.msra.mxu1 %v7695_v8  ;;  %v1723_v18 = vmul.f32 %v9082_v60, %v9082_v60  ;;  %v9091_v9 = vadd.f32 %v8846_v48, %v1667_v20 }
 0x241   : > { %v1939_v10 = vmul.f32 0.5, %v1907_v3  ;;  %v1849_v61 = vmul.f32 0.7978846, %v1817_v43  ;;  %7697 = vmatprep.subr.bf16.mxu1 %v8246_v7  ;;  %v7698_v41 = vpack.c.bf16 %v9014_v63, %v9022_v55  ;;  %v9097_v26 = vadd.f32 %v7211_v15, %v8846_v48 }
 0x242   : > { %v1938_v16 = vmul.f32 0.5, %v1906_v50  ;;  %v1816_v2 = vadd.f32 %v1784_v31, %v9059_v38  ;;  %v1755_v34 = vmul.f32 %v1723_v18, %v9082_v60  ;;  %v1722_v57 = vmul.f32 %v9091_v9, %v9091_v9 }
 0x243   : > { %v9104_v20 = vmul.f32 %v1939_v10, %v8989_v13  ;;  %8069 = vtanh.f32 %v1849_v61  ;;  %v1725_v46 = vmul.f32 %v9097_v26, %v9097_v26  ;;  %v9109_v63 = vadd.f32 %v8846_v48, %v1677_v54 }
 0x244   : > { %v9112_v55 = vmul.f32 %v1938_v16, %v8994_v24  ;;  %v1848_v15 = vmul.f32 0.7978846, %v1816_v2  ;;  %v1787_v39 = vmul.f32 0.044715, %v1755_v34  ;;  %v1754_v19 = vmul.f32 %v1722_v57, %v9091_v9  ;;  %7699 = vmatpush1.bf16.msra.mxu1 %v7698_v41 }
 0x245   : > { %v8062_v45 = vpop.eup %8061  ;;  %v1757_v35 = vmul.f32 %v1725_v46, %v9097_v26  ;;  %7700 = vmatprep.subr.bf16.mxu1 %v8246_v7  ;;  %v1724_v13 = vmul.f32 %v9109_v63, %v9109_v63  ;;  %v7701_v54 = vpack.c.bf16 %v9040_v62, %v9047_v51  ;;  %v9122_v23 = vadd.f32 %v7214_v32, %v8846_v48 }
 0x246   : > { %v8064_v24 = vpop.eup %8063  ;;  %v1909_v36 = vadd.f32 1.0, %v8062_v45  ;;  %8071 = vtanh.f32 %v1848_v15  ;;  %v1819_v12 = vadd.f32 %v1787_v39, %v9082_v60  ;;  %v1786_v44 = vmul.f32 0.044715, %v1754_v19 }
 0x247   : > { %v1908_v25 = vadd.f32 1.0, %v8064_v24  ;;  %v1789_v52 = vmul.f32 0.044715, %v1757_v35  ;;  %v1756_v30 = vmul.f32 %v1724_v13, %v9109_v63  ;;  %v1727_v21 = vmul.f32 %v9122_v23, %v9122_v23 }
 0x248   : > { %v8066_v49 = vpop.eup %8065  ;;  %v1941_v6 = vmul.f32 0.5, %v1909_v36  ;;  %v1851_v28 = vmul.f32 0.7978846, %v1819_v12  ;;  %v1818_v62 = vadd.f32 %v1786_v44, %v9091_v9  ;;  %7702 = vmatpush1.bf16.msra.mxu1 %v7701_v54  ;;  %v9130_v51 = vadd.f32 %v8846_v48, %v1687_v56 }
 0x249   : > { %v8068_v4 = vpop.eup %8067  ;;  %v1940_v32 = vmul.f32 0.5, %v1908_v25  ;;  %v1911_v22 = vadd.f32 1.0, %v8066_v49  ;;  %v1821_v53 = vadd.f32 %v1789_v52, %v9097_v26  ;;  %v1788_v1 = vmul.f32 0.044715, %v1756_v30  ;;  %7703 = vmatprep.subr.bf16.mxu1 %v8246_v7 }
 0x24a   : > { %v1973_v17 = vmul.f32 %v1941_v6, %v9011_v29  ;;  %v1910_v5 = vadd.f32 1.0, %v8068_v4  ;;  %8073 = vtanh.f32 %v1851_v28  ;;  %v1850_v42 = vmul.f32 0.7978846, %v1818_v62 }
 0x24b   : > { %v1972_v37 = vmul.f32 %v1940_v32, %v9017_v58  ;;  %v1943_v8 = vmul.f32 0.5, %v1911_v22  ;;  %v1853_v0 = vmul.f32 0.7978846, %v1821_v53  ;;  %v1820_v48 = vadd.f32 %v1788_v1, %v9109_v63 }
 0x24c   : > { %v1942_v56 = vmul.f32 0.5, %v1910_v5  ;;  %8075 = vtanh.f32 %v1850_v42  ;;  %v1759_v3 = vmul.f32 %v1727_v21, %v9122_v23  ;;  %v1726_v43 = vmul.f32 %v9130_v51, %v9130_v51  ;;  %v1989_v5 = vld [vmem:[%s10836_s26 + $0x28] sm:$0xff]  ;;  %v1988_v42 = vld [vmem:[%s10836_s26 + $0x20] sm:$0xff] }
 0x24d   : > { %v8070_v50 = vpop.eup %8069  ;;  %v1975_v31 = vmul.f32 %v1943_v8, %v9031_v33  ;;  %8077 = vtanh.f32 %v1853_v0  ;;  %v1852_v29 = vmul.f32 0.7978846, %v1820_v48  ;;  %v7704_v18 = vpack.c.bf16 %v9069_v47, %v9073_v59  ;;  %v1990_v8 = vld [vmem:[%s10836_s26 + $0x30] sm:$0xff]  ;;  %v1993_v0 = vld [vmem:[%s10836_s26 + $0x48] sm:$0xff]  ;;  %v1992_v48 = vld [vmem:[%s10836_s26 + $0x40] sm:$0xff] }
 0x24e   : > { %v1974_v58 = vmul.f32 %v1942_v56, %v9035_v11  ;;  %v1913_v10 = vadd.f32 1.0, %v8070_v50  ;;  %v1791_v61 = vmul.f32 0.044715, %v1759_v3  ;;  %v1758_v41 = vmul.f32 %v1726_v43, %v9130_v51  ;;  %v1995_v56 = vld [vmem:[%s10836_s26 + $0x58] sm:$0xff]  ;;  %v1994_v3 = vld [vmem:[%s10836_s26 + $0x50] sm:$0xff]  ;;  %v1997_v43 = vld [vmem:[%s10836_s26 + $0x68] sm:$0xff] }
 0x24f   : > { %8079 = vtanh.f32 %v1852_v29  ;;  %7705 = vmatpush1.bf16.msra.mxu1 %v7704_v18  ;;  %v7707_v16 = vpack.c.bf16 %v9077_v14, %v9085_v40  ;;  %v7710_v2 = vpack.c.bf16 %v9104_v20, %v9112_v55  ;;  %v7713_v33 = vpack.c.bf16 %v1973_v17, %v1972_v37  ;;  %v1991_v37 = vld [vmem:[%s10836_s26 + $0x38] sm:$0xff]  ;;  %v1996_v50 = vld [vmem:[%s10836_s26 + $0x60] sm:$0xff]  ;;  %v1998_v29 = vld [vmem:[%s10836_s26 + $0x70] sm:$0xff] }
 0x250   : > { %v8072_v34 = vpop.eup %8071  ;;  %v1945_v57 = vmul.f32 0.5, %v1913_v10  ;;  %v1823_v46 = vadd.f32 %v1791_v61, %v9122_v23  ;;  %v1790_v47 = vmul.f32 0.044715, %v1758_v41  ;;  %7706 = vmatprep.subr.bf16.mxu1 %v8246_v7  ;;  %v7716_v11 = vpack.c.bf16 %v1975_v31, %v1974_v58  ;;  %v1999_v31 = vld [vmem:[%s10836_s26 + $0x78] sm:$0xff]  ;;  %v2001_v18 = vld [vmem:[%s10836_s26 + $0x88] sm:$0xff]  ;;  %v2000_v58 = vld [vmem:[%s10836_s26 + $0x80] sm:$0xff] }
 0x251   : > { %v1912_v59 = vadd.f32 1.0, %v8072_v34  ;;  %v2003_v10 = vld [vmem:[%s10836_s26 + $0x98] sm:$0xff]  ;;  %v2002_v61 = vld [vmem:[%s10836_s26 + $0x90] sm:$0xff]  ;;  %v2005_v41 = vld [vmem:[%s10836_s26 + $0xa8] sm:$0xff] }
 0x252   : > { %v1855_v15 = vmul.f32 0.7978846, %v1823_v46  ;;  %v1822_v39 = vadd.f32 %v1790_v47, %v9130_v51  ;;  %v1977_v19 = vmul.f32 %v1945_v57, %v9054_v27  ;;  %v2009_v34 = vld [vmem:[%s10836_s26 + $0xc8] sm:$0xff]  ;;  %v2008_v57 = vld [vmem:[%s10836_s26 + $0xc0] sm:$0xff]  ;;  %v2011_v46 = vld [vmem:[%s10836_s26 + $0xd8] sm:$0xff] }
 0x253   : > { %v1944_v45 = vmul.f32 0.5, %v1912_v59  ;;  %7708 = vmatpush1.bf16.msra.mxu1 %v7707_v16  ;;  %v2004_v16 = vld [vmem:[%s10836_s26 + $0xa0] sm:$0xff]  ;;  %v2010_v47 = vld [vmem:[%s10836_s26 + $0xd0] sm:$0xff] }
 0x254   : > { %v8074_v14 = vpop.eup %8073  ;;  %8081 = vtanh.f32 %v1855_v15  ;;  %v1854_v40 = vmul.f32 0.7978846, %v1822_v39  ;;  %7709 = vmatprep.subr.bf16.mxu1 %v8246_v7  ;;  %v2012_v59 = vld [vmem:[%s10836_s26 + $0xe0] sm:$0xff]  ;;  %v2015_v15 = vld [vmem:[%s10836_s26 + $0xf8] sm:$0xff]  ;;  %v2014_v39 = vld [vmem:[%s10836_s26 + $0xf0] sm:$0xff] }
 0x255   : > { %v1976_v20 = vmul.f32 %v1944_v45, %v9059_v38  ;;  %v1915_v55 = vadd.f32 1.0, %v8074_v14  ;;  %v2016_v45 = vld [vmem:[%s10836_s26 + $0x100] sm:$0xff]  ;;  %v2019_v14 = vld [vmem:[%s10836_s26 + $0x118] sm:$0xff] }
 0x256   : > { %v8076_v35 = vpop.eup %8075  ;;  %8083 = vtanh.f32 %v1854_v40  ;;  %v2018_v40 = vld [vmem:[%s10836_s26 + $0x110] sm:$0xff] }
 0x257   : > { %v8078_v13 = vpop.eup %8077  ;;  %v1947_v54 = vmul.f32 0.5, %v1915_v55  ;;  %v1914_v24 = vadd.f32 1.0, %v8076_v35  ;;  %7711 = vmatpush1.bf16.msra.mxu1 %v7710_v2  ;;  %v7719_v36 = vpack.c.bf16 %v1977_v19, %v1976_v20  ;;  %v2007_v2 = vld [vmem:[%s10836_s26 + $0xb8] sm:$0xff]  ;;  %v2017_v19 = vld [vmem:[%s10836_s26 + $0x108] sm:$0xff]  ;;  %v2020_v55 = vld [vmem:[%s10836_s26 + $0x120] sm:$0xff] }
 0x258   : > { %v1917_v12 = vadd.f32 1.0, %v8078_v13  ;;  %7712 = vmatprep.subr.bf16.mxu1 %v8246_v7  ;;  %v2021_v20 = vld [vmem:[%s10836_s26 + $0x128] sm:$0xff]  ;;  %v2023_v35 = vld [vmem:[%s10836_s26 + $0x138] sm:$0xff]  ;;  %v2022_v13 = vld [vmem:[%s10836_s26 + $0x130] sm:$0xff] }
 0x259   : > { %v8080_v27 = vpop.eup %8079  ;;  %v1979_v44 = vmul.f32 %v1947_v54, %v9082_v60  ;;  %v1946_v25 = vmul.f32 0.5, %v1914_v24  ;;  %v2025_v54 = vld [vmem:[%s10836_s26 + $0x148] sm:$0xff]  ;;  %v2024_v24 = vld [vmem:[%s10836_s26 + $0x140] sm:$0xff] }
 0x25a   : > { %v1949_v52 = vmul.f32 0.5, %v1917_v12  ;;  %v1916_v30 = vadd.f32 1.0, %v8080_v27  ;;  %v2026_v12 = vld [vmem:[%s10836_s26 + $0x150] sm:$0xff]  ;;  %v2029_v27 = vld [vmem:[%s10836_s26 + $0x168] sm:$0xff] }
 0x25b   : > { %v1978_v21 = vmul.f32 %v1946_v25, %v9091_v9  ;;  %7714 = vmatpush1.bf16.msra.mxu1 %v7713_v33  ;;  %v2006_v33 = vld [vmem:[%s10836_s26 + $0xb0] sm:$0xff]  ;;  %v2031_v25 = vld [vmem:[%s10836_s26 + $0x178] sm:$0xff] }
 0x25c   : > { %v1981_v38 = vmul.f32 %v1949_v52, %v9097_v26  ;;  %v1948_v49 = vmul.f32 0.5, %v1916_v30  ;;  %7715 = vmatprep.subr.bf16.mxu1 %v8246_v7  ;;  %v2030_v52 = vld [vmem:[%s10836_s26 + $0x170] sm:$0xff]  ;;  %v2033_v30 = vld [vmem:[%s10836_s26 + $0x188] sm:$0xff] }
 0x25d   : > { %v7722_v6 = vpack.c.bf16 %v1979_v44, %v1978_v21  ;;  %v2028_v44 = vld [vmem:[%s10836_s26 + $0x160] sm:$0xff] }
 0x25e   : > { %v8082_v28 = vpop.eup %8081  ;;  %v1980_v62 = vmul.f32 %v1948_v49, %v9109_v63  ;;  %v1984_v63 = vld [vmem:[%s10836_s26] sm:$0xff]  ;;  %v2034_v49 = vld [vmem:[%s10836_s26 + $0x190] sm:$0xff] }
 0x25f   : > { %v1919_v4 = vadd.f32 1.0, %v8082_v28  ;;  %7717 = vmatpush1.bf16.msra.mxu1 %v7716_v11  ;;  %v2013_v11 = vld [vmem:[%s10836_s26 + $0xe8] sm:$0xff]  ;;  %v2032_v21 = vld [vmem:[%s10836_s26 + $0x180] sm:$0xff] }
 0x260   : > { %v8084_v32 = vpop.eup %8083  ;;  %7718 = vmatprep.subr.bf16.mxu1 %v8246_v7  ;;  %v7725_v60 = vpack.c.bf16 %v1981_v38, %v1980_v62  ;;  %v2035_v38 = vld [vmem:[%s10836_s26 + $0x198] sm:$0xff]  ;;  %v2036_v28 = vld [vmem:[%s10836_s26 + $0x1a0] sm:$0xff] }
 0x261   : > { %v1951_v22 = vmul.f32 0.5, %v1919_v4  ;;  %v1918_v53 = vadd.f32 1.0, %v8084_v32  ;;  %v2039_v62 = vld [vmem:[%s10836_s26 + $0x1b8] sm:$0xff]  ;;  %v2038_v4 = vld [vmem:[%s10836_s26 + $0x1b0] sm:$0xff]  ;;  %v2041_v32 = vld [vmem:[%s10836_s26 + $0x1c8] sm:$0xff] }
 0x263   : > { %v1983_v9 = vmul.f32 %v1951_v22, %v9122_v23  ;;  %v1950_v1 = vmul.f32 0.5, %v1918_v53  ;;  %7720 = vmatpush1.bf16.msra.mxu1 %v7719_v36  ;;  %v1987_v23 = vld [vmem:[%s10836_s26 + $0x18] sm:$0xff]  ;;  %v2042_v53 = vld [vmem:[%s10836_s26 + $0x1d0] sm:$0xff] }
 0x264   : > { %7721 = vmatprep.subr.bf16.mxu1 %v8246_v7  ;;  %v2027_v36 = vld [vmem:[%s10836_s26 + $0x158] sm:$0xff] }
 0x265   : > { %v1982_v26 = vmul.f32 %v1950_v1, %v9130_v51  ;;  %v1986_v51 = vld [vmem:[%s10836_s26 + $0x10] sm:$0xff]  ;;  %v2043_v22 = vld [vmem:[%s10836_s26 + $0x1d8] sm:$0xff]  ;;  %v2044_v1 = vld [vmem:[%s10836_s26 + $0x1e0] sm:$0xff] }
 0x267   : > { %7723 = vmatpush1.bf16.msra.mxu1 %v7722_v6  ;;  %v7728_v17 = vpack.c.bf16 %v1983_v9, %v1982_v26  ;;  %v2037_v6 = vld [vmem:[%s10836_s26 + $0x1a8] sm:$0xff]  ;;  %v2047_v26 = vld [vmem:[%s10836_s26 + $0x1f8] sm:$0xff] }
 0x268   : > { %7724 = vmatprep.subr.bf16.mxu1 %v8246_v7  ;;  %v2045_v9 = vld [vmem:[%s10836_s26 + $0x1e8] sm:$0xff] }
 0x26b   : > { %7726 = vmatpush1.bf16.msra.mxu1 %v7725_v60  ;;  %v2040_v60 = vld [vmem:[%s10836_s26 + $0x1c0] sm:$0xff] }
 0x26c   : > { %7727 = vmatprep.subr.bf16.mxu1 %v8246_v7 }
 0x26f   : > { %7729 = vmatpush1.bf16.msra.mxu1 %v7728_v17  ;;  %v2046_v17 = vld [vmem:[%s10836_s26 + $0x1f0] sm:$0xff] }
 0x272   : > { %2193 = vmatmul.mubr.f32.vlgmr.msra.gmra.mrb[36].mxu1 %v1984_v63  ;;  %v2049_v63 = vld [vmem:[%s10836_s26 + $0x208] sm:$0xff] }
 0x273   : > { %2197 = vmatprep.mubr.f32.mxu1 %v1987_v23  ;;  %v2048_v23 = vld [vmem:[%s10836_s26 + $0x200] sm:$0xff] }
 0x276   : > { %2198 = vmatmul.mubr.f32.gmra.mrb[38].mxu1 %v1986_v51  ;;  %v2051_v51 = vld [vmem:[%s10836_s26 + $0x218] sm:$0xff] }
 0x277   : > { %2202 = vmatprep.mubr.f32.mxu1 %v1989_v5  ;;  %v2050_v5 = vld [vmem:[%s10836_s26 + $0x210] sm:$0xff] }
 0x27a   : > { %2203 = vmatmul.mubr.f32.gmra.mrb[40].mxu1 %v1988_v42  ;;  %v2053_v42 = vld [vmem:[%s10836_s26 + $0x228] sm:$0xff] }
 0x27b   : > { %2207 = vmatprep.mubr.f32.mxu1 %v1991_v37  ;;  %v2052_v37 = vld [vmem:[%s10836_s26 + $0x220] sm:$0xff] }
 0x27e   : > { %2208 = vmatmul.mubr.f32.gmra.mrb[42].mxu1 %v1990_v8  ;;  %v2055_v8 = vld [vmem:[%s10836_s26 + $0x238] sm:$0xff] }
 0x27f   : > { %2212 = vmatprep.mubr.f32.mxu1 %v1993_v0  ;;  %v2054_v0 = vld [vmem:[%s10836_s26 + $0x230] sm:$0xff] }
 0x282   : > { %2213 = vmatmul.mubr.f32.gmra.mrb[44].mxu1 %v1992_v48  ;;  %v2057_v48 = vld [vmem:[%s10836_s26 + $0x248] sm:$0xff] }
 0x283   : > { %2217 = vmatprep.mubr.f32.mxu1 %v1995_v56  ;;  %v2056_v56 = vld [vmem:[%s10836_s26 + $0x240] sm:$0xff] }
 0x286   : > { %2218 = vmatmul.mubr.f32.gmra.mrb[46].mxu1 %v1994_v3  ;;  %v2059_v3 = vld [vmem:[%s10836_s26 + $0x258] sm:$0xff] }
 0x287   : > { %2222 = vmatprep.mubr.f32.mxu1 %v1997_v43  ;;  %v2058_v43 = vld [vmem:[%s10836_s26 + $0x250] sm:$0xff] }
 0x28a   : > { %2223 = vmatmul.mubr.f32.gmra.mrb[48].mxu1 %v1996_v50  ;;  %v2061_v50 = vld [vmem:[%s10836_s26 + $0x268] sm:$0xff] }
 0x28b   : > { %2227 = vmatprep.mubr.f32.mxu1 %v1999_v31  ;;  %v2060_v31 = vld [vmem:[%s10836_s26 + $0x260] sm:$0xff] }
 0x28e   : > { %2228 = vmatmul.mubr.f32.gmra.mrb[50].mxu1 %v1998_v29  ;;  %v2063_v29 = vld [vmem:[%s10836_s26 + $0x278] sm:$0xff] }
 0x28f   : > { %2232 = vmatprep.mubr.f32.mxu1 %v2001_v18  ;;  %v2062_v18 = vld [vmem:[%s10836_s26 + $0x270] sm:$0xff] }
 0x292   : > { %2233 = vmatmul.mubr.f32.gmra.mrb[52].mxu1 %v2000_v58  ;;  %v2065_v58 = vld [vmem:[%s10836_s26 + $0x288] sm:$0xff] }
 0x293   : > { %2237 = vmatprep.mubr.f32.mxu1 %v2003_v10  ;;  %v2064_v10 = vld [vmem:[%s10836_s26 + $0x280] sm:$0xff] }
 0x296   : > { %2238 = vmatmul.mubr.f32.gmra.mrb[54].mxu1 %v2002_v61  ;;  %v2067_v61 = vld [vmem:[%s10836_s26 + $0x298] sm:$0xff] }
 0x297   : > { %2242 = vmatprep.mubr.f32.mxu1 %v2005_v41  ;;  %v2066_v41 = vld [vmem:[%s10836_s26 + $0x290] sm:$0xff] }
 0x29a   : > { %2243 = vmatmul.mubr.f32.gmra.mrb[56].mxu1 %v2004_v16  ;;  %v2069_v16 = vld [vmem:[%s10836_s26 + $0x2a8] sm:$0xff] }
 0x29b   : > { %2247 = vmatprep.mubr.f32.mxu1 %v2007_v2  ;;  %v2068_v2 = vld [vmem:[%s10836_s26 + $0x2a0] sm:$0xff] }
 0x29e   : > { %2248 = vmatmul.mubr.f32.gmra.mrb[58].mxu1 %v2006_v33  ;;  %v2071_v33 = vld [vmem:[%s10836_s26 + $0x2b8] sm:$0xff] }
 0x29f   : > { %2252 = vmatprep.mubr.f32.mxu1 %v2009_v34  ;;  %v2070_v34 = vld [vmem:[%s10836_s26 + $0x2b0] sm:$0xff] }
 0x2a2   : > { %2253 = vmatmul.mubr.f32.gmra.mrb[60].mxu1 %v2008_v57  ;;  %v2073_v57 = vld [vmem:[%s10836_s26 + $0x2c8] sm:$0xff] }
 0x2a3   : > { %2257 = vmatprep.mubr.f32.mxu1 %v2011_v46  ;;  %v2072_v46 = vld [vmem:[%s10836_s26 + $0x2c0] sm:$0xff] }
 0x2a6   : > { %2258 = vmatmul.mubr.f32.gmra.mrb[62].mxu1 %v2010_v47  ;;  %v2075_v47 = vld [vmem:[%s10836_s26 + $0x2d8] sm:$0xff] }
 0x2a7   : > { %2262 = vmatprep.mubr.f32.mxu1 %v2013_v11  ;;  %v2074_v11 = vld [vmem:[%s10836_s26 + $0x2d0] sm:$0xff] }
 0x2aa   : > { %2263 = vmatmul.mubr.f32.gmra.mrb[64].mxu1 %v2012_v59  ;;  %v2077_v59 = vld [vmem:[%s10836_s26 + $0x2e8] sm:$0xff] }
 0x2ab   : > { %2267 = vmatprep.mubr.f32.mxu1 %v2015_v15  ;;  %v2076_v15 = vld [vmem:[%s10836_s26 + $0x2e0] sm:$0xff] }
 0x2ae   : > { %2268 = vmatmul.mubr.f32.gmra.mrb[66].mxu1 %v2014_v39  ;;  %v2079_v39 = vld [vmem:[%s10836_s26 + $0x2f8] sm:$0xff] }
 0x2af   : > { %2272 = vmatprep.mubr.f32.mxu1 %v2017_v19  ;;  %v2078_v19 = vld [vmem:[%s10836_s26 + $0x2f0] sm:$0xff] }
 0x2b2   : > { %2273 = vmatmul.mubr.f32.gmra.mrb[68].mxu1 %v2016_v45  ;;  %v2081_v45 = vld [vmem:[%s10836_s26 + $0x308] sm:$0xff] }
 0x2b3   : > { %2277 = vmatprep.mubr.f32.mxu1 %v2019_v14  ;;  %v2080_v14 = vld [vmem:[%s10836_s26 + $0x300] sm:$0xff] }
 0x2b6   : > { %2278 = vmatmul.mubr.f32.gmra.mrb[70].mxu1 %v2018_v40  ;;  %v2083_v40 = vld [vmem:[%s10836_s26 + $0x318] sm:$0xff] }
 0x2b7   : > { %2282 = vmatprep.mubr.f32.mxu1 %v2021_v20  ;;  %v2082_v20 = vld [vmem:[%s10836_s26 + $0x310] sm:$0xff] }
 0x2ba   : > { %2283 = vmatmul.mubr.f32.gmra.mrb[72].mxu1 %v2020_v55  ;;  %v2085_v55 = vld [vmem:[%s10836_s26 + $0x328] sm:$0xff] }
 0x2bb   : > { %2287 = vmatprep.mubr.f32.mxu1 %v2023_v35  ;;  %v2084_v35 = vld [vmem:[%s10836_s26 + $0x320] sm:$0xff] }
 0x2be   : > { %2288 = vmatmul.mubr.f32.gmra.mrb[74].mxu1 %v2022_v13  ;;  %v2087_v13 = vld [vmem:[%s10836_s26 + $0x338] sm:$0xff] }
 0x2bf   : > { %2292 = vmatprep.mubr.f32.mxu1 %v2025_v54  ;;  %v2086_v54 = vld [vmem:[%s10836_s26 + $0x330] sm:$0xff] }
 0x2c2   : > { %2293 = vmatmul.mubr.f32.gmra.mrb[76].mxu1 %v2024_v24  ;;  %v2089_v24 = vld [vmem:[%s10836_s26 + $0x348] sm:$0xff] }
 0x2c3   : > { %2297 = vmatprep.mubr.f32.mxu1 %v2027_v36  ;;  %v2088_v36 = vld [vmem:[%s10836_s26 + $0x340] sm:$0xff] }
 0x2c6   : > { %2298 = vmatmul.mubr.f32.gmra.mrb[78].mxu1 %v2026_v12  ;;  %v2091_v12 = vld [vmem:[%s10836_s26 + $0x358] sm:$0xff] }
 0x2c7   : > { %2302 = vmatprep.mubr.f32.mxu1 %v2029_v27  ;;  %v2090_v27 = vld [vmem:[%s10836_s26 + $0x350] sm:$0xff] }
 0x2ca   : > { %2303 = vmatmul.mubr.f32.gmra.mrb[80].mxu1 %v2028_v44  ;;  %v2093_v44 = vld [vmem:[%s10836_s26 + $0x368] sm:$0xff] }
 0x2cb   : > { %2307 = vmatprep.mubr.f32.mxu1 %v2031_v25 }
 0x2ce   : > { %2308 = vmatmul.mubr.f32.gmra.mrb[82].mxu1 %v2030_v52 }
 0x2cf   : > { %2312 = vmatprep.mubr.f32.mxu1 %v2033_v30  ;;  %v2092_v30 = vld [vmem:[%s10836_s26 + $0x360] sm:$0xff] }
 0x2d2   : > { %2313 = vmatmul.mubr.f32.gmra.mrb[84].mxu1 %v2032_v21  ;;  %v2095_v21 = vld [vmem:[%s10836_s26 + $0x378] sm:$0xff] }
 0x2d3   : > { %2317 = vmatprep.mubr.f32.mxu1 %v2035_v38 }
 0x2d6   : > { %2318 = vmatmul.mubr.f32.gmra.mrb[86].mxu1 %v2034_v49 }
 0x2d7   : > { %2322 = vmatprep.mubr.f32.mxu1 %v2037_v6  ;;  %v2094_v6 = vld [vmem:[%s10836_s26 + $0x370] sm:$0xff] }
 0x2da   : > { %2323 = vmatmul.mubr.f32.gmra.mrb[88].mxu1 %v2036_v28  ;;  %v2097_v28 = vld [vmem:[%s10836_s26 + $0x388] sm:$0xff] }
 0x2db   : > { %2327 = vmatprep.mubr.f32.mxu1 %v2039_v62 }
 0x2de   : > { %2328 = vmatmul.mubr.f32.gmra.mrb[90].mxu1 %v2038_v4 }
 0x2df   : > { %2332 = vmatprep.mubr.f32.mxu1 %v2041_v32  ;;  %v2096_v32 = vld [vmem:[%s10836_s26 + $0x380] sm:$0xff] }
 0x2e2   : > { %2333 = vmatmul.mubr.f32.gmra.mrb[92].mxu1 %v2040_v60  ;;  %v2099_v60 = vld [vmem:[%s10836_s26 + $0x398] sm:$0xff] }
 0x2e3   : > { %2337 = vmatprep.mubr.f32.mxu1 %v2043_v22 }
 0x2e6   : > { %2338 = vmatmul.mubr.f32.gmra.mrb[94].mxu1 %v2042_v53 }
 0x2e7   : > { %2342 = vmatprep.mubr.f32.mxu1 %v2045_v9  ;;  %v2098_v9 = vld [vmem:[%s10836_s26 + $0x390] sm:$0xff] }
 0x2ea   : > { %2343 = vmatmul.mubr.f32.gmra.mrb[96].mxu1 %v2044_v1  ;;  %v2101_v1 = vld [vmem:[%s10836_s26 + $0x3a8] sm:$0xff] }
 0x2eb   : > { %2347 = vmatprep.mubr.f32.mxu1 %v2047_v26 }
 0x2ee   : > { %2348 = vmatmul.mubr.f32.gmra.mrb[98].mxu1 %v2046_v17 }
 0x2ef   : > { %2352 = vmatprep.mubr.f32.mxu1 %v2049_v63  ;;  %v2100_v63 = vld [vmem:[%s10836_s26 + $0x3a0] sm:$0xff] }
 0x2f2   : > { %2353 = vmatmul.mubr.f32.gmra.mrb[100].mxu1 %v2048_v23  ;;  %v2103_v23 = vld [vmem:[%s10836_s26 + $0x3b8] sm:$0xff] }
 0x2f3   : > { %2357 = vmatprep.mubr.f32.mxu1 %v2051_v51 }
 0x2f6   : > { %2358 = vmatmul.mubr.f32.gmra.mrb[102].mxu1 %v2050_v5 }
 0x2f7   : > { %2362 = vmatprep.mubr.f32.mxu1 %v2053_v42  ;;  %v2102_v42 = vld [vmem:[%s10836_s26 + $0x3b0] sm:$0xff] }
 0x2fa   : > { %2363 = vmatmul.mubr.f32.gmra.mrb[104].mxu1 %v2052_v37  ;;  %v2105_v37 = vld [vmem:[%s10836_s26 + $0x3c8] sm:$0xff] }
 0x2fb   : > { %2367 = vmatprep.mubr.f32.mxu1 %v2055_v8 }
 0x2fe   : > { %2368 = vmatmul.mubr.f32.gmra.mrb[106].mxu1 %v2054_v0 }
 0x2ff   : > { %2372 = vmatprep.mubr.f32.mxu1 %v2057_v48  ;;  %v2104_v48 = vld [vmem:[%s10836_s26 + $0x3c0] sm:$0xff] }
 0x302   : > { %2373 = vmatmul.mubr.f32.gmra.mrb[108].mxu1 %v2056_v56  ;;  %v2107_v56 = vld [vmem:[%s10836_s26 + $0x3d8] sm:$0xff] }
 0x303   : > { %2377 = vmatprep.mubr.f32.mxu1 %v2059_v3 }
 0x306   : > { %2378 = vmatmul.mubr.f32.gmra.mrb[110].mxu1 %v2058_v43 }
 0x307   : > { %2382 = vmatprep.mubr.f32.mxu1 %v2061_v50  ;;  %v9544_v50 = vld [vmem:[%s10838_s29] ss:$0 sm:$0xff] }
 0x30a   : > { %2383 = vmatmul.mubr.f32.gmra.mrb[112].mxu1 %v2060_v31  ;;  %v9549_v31 = vld [vmem:[%s10838_s29 + $0x1] ss:$0 sm:$0xff] }
 0x30b   : > { %2387 = vmatprep.mubr.f32.mxu1 %v2063_v29  ;;  %v2106_v29 = vld [vmem:[%s10836_s26 + $0x3d0] sm:$0xff] }
 0x30e   : > { %2388 = vmatmul.mubr.f32.gmra.mrb[114].mxu1 %v2062_v18  ;;  %v2109_v18 = vld [vmem:[%s10836_s26 + $0x3e8] sm:$0xff] }
 0x30f   : > { %2392 = vmatprep.mubr.f32.mxu1 %v2065_v58 }
 0x312   : > { %2393 = vmatmul.mubr.f32.gmra.mrb[116].mxu1 %v2064_v10 }
 0x313   : > { %2397 = vmatprep.mubr.f32.mxu1 %v2067_v61 }
 0x316   : > { %2398 = vmatmul.mubr.f32.gmra.mrb[118].mxu1 %v2066_v41 }
 0x317   : > { %2402 = vmatprep.mubr.f32.mxu1 %v2069_v16  ;;  %v2108_v16 = vld [vmem:[%s10836_s26 + $0x3e0] sm:$0xff] }
 0x31a   : > { %2403 = vmatmul.mubr.f32.gmra.mrb[120].mxu1 %v2068_v2 }
 0x31b   : > { %2407 = vmatprep.mubr.f32.mxu1 %v2071_v33  ;;  %v2111_v33 = vld [vmem:[%s10836_s26 + $0x3f8] sm:$0xff] }
 0x31e   : > { %2408 = vmatmul.mubr.f32.gmra.mrb[122].mxu1 %v2070_v34 }
 0x31f   : > { %2412 = vmatprep.mubr.f32.mxu1 %v2073_v57 }
 0x322   : > { %2413 = vmatmul.mubr.f32.gmra.mrb[124].mxu1 %v2072_v46 }
 0x323   : > { %2417 = vmatprep.mubr.f32.mxu1 %v2075_v47 }
 0x326   : > { %2418 = vmatmul.mubr.f32.gmra.mrb[126].mxu1 %v2074_v11  ;;  %v2110_v11 = vld [vmem:[%s10836_s26 + $0x3f0] sm:$0xff] }
 0x327   : > { %2422 = vmatprep.mubr.f32.mxu1 %v2077_v59 }
 0x32a   : > { %2423 = vmatmul.mubr.f32.gmra.mrb[128].mxu1 %v2076_v15  ;;  %v2113_v15 = vld [vmem:[%s10836_s26 + $0x408] sm:$0xff] }
 0x32b   : > { %2427 = vmatprep.mubr.f32.mxu1 %v2079_v39 }
 0x32e   : > { %2428 = vmatmul.mubr.f32.gmra.mrb[130].mxu1 %v2078_v19 }
 0x32f   : > { %2432 = vmatprep.mubr.f32.mxu1 %v2081_v45 }
 0x332   : > { %2433 = vmatmul.mubr.f32.gmra.mrb[132].mxu1 %v2080_v14 }
 0x333   : > { %2437 = vmatprep.mubr.f32.mxu1 %v2083_v40  ;;  %v2112_v40 = vld [vmem:[%s10836_s26 + $0x400] sm:$0xff] }
 0x336   : > { %2438 = vmatmul.mubr.f32.gmra.mrb[134].mxu1 %v2082_v20 }
 0x337   : > { %2442 = vmatprep.mubr.f32.mxu1 %v2085_v55  ;;  %v2115_v55 = vld [vmem:[%s10836_s26 + $0x418] sm:$0xff] }
 0x33a   : > { %2443 = vmatmul.mubr.f32.gmra.mrb[136].mxu1 %v2084_v35 }
 0x33b   : > { %2447 = vmatprep.mubr.f32.mxu1 %v2087_v13 }
 0x33e   : > { %2448 = vmatmul.mubr.f32.gmra.mrb[138].mxu1 %v2086_v54 }
 0x33f   : > { %2452 = vmatprep.mubr.f32.mxu1 %v2089_v24 }
 0x342   : > { %2453 = vmatmul.mubr.f32.gmra.mrb[140].mxu1 %v2088_v36  ;;  %v2114_v36 = vld [vmem:[%s10836_s26 + $0x410] sm:$0xff] }
 0x343   : > { %2457 = vmatprep.mubr.f32.mxu1 %v2091_v12 }
 0x345   : > { %v2194_v25 = vpop.f32.mrb[36].mxu1 }
 0x346   : > { %v2196_v52 = vpop.f32.mrb[37].mxu1  ;;  %2458 = vmatmul.mubr.f32.gmra.mrb[142].mxu1 %v2090_v27  ;;  %v2560_v10 = vmul.f32 %v9544_v50, %v2194_v25  ;;  %v2117_v27 = vld [vmem:[%s10836_s26 + $0x428] sm:$0xff] }
 0x347   : > { %2462 = vmatprep.mubr.f32.mxu1 %v2093_v44 }
 0x349   : > { %v2199_v38 = vpop.f32.mrb[38].mxu1 }
 0x34a   : > { %v2201_v49 = vpop.f32.mrb[39].mxu1  ;;  %2463 = vmatmul.mubr.f32.gmra.mrb[144].mxu1 %v2092_v30  ;;  %v2561_v57 = vmul.f32 %v9544_v50, %v2199_v38 }
 0x34b   : > { %2467 = vmatprep.mubr.f32.mxu1 %v2095_v21  ;;  %v2116_v21 = vld [vmem:[%s10836_s26 + $0x420] sm:$0xff]  ;;  %v2119_v49 = vld [vmem:[%s10836_s26 + $0x438] sm:$0xff] }
 0x34d   : > { %v2204_v62 = vpop.f32.mrb[40].mxu1 }
 0x34e   : > { %v2206_v4 = vpop.f32.mrb[41].mxu1  ;;  %2468 = vmatmul.mubr.f32.gmra.mrb[146].mxu1 %v2094_v6  ;;  %v2562_v19 = vmul.f32 %v9544_v50, %v2204_v62 }
 0x34f   : > { %2472 = vmatprep.mubr.f32.mxu1 %v2097_v28 }
 0x351   : > { %v2209_v22 = vpop.f32.mrb[42].mxu1 }
 0x352   : > { %v2211_v53 = vpop.f32.mrb[43].mxu1  ;;  %2473 = vmatmul.mubr.f32.gmra.mrb[148].mxu1 %v2096_v32  ;;  %v2563_v13 = vmul.f32 %v9544_v50, %v2209_v22  ;;  %v2118_v32 = vld [vmem:[%s10836_s26 + $0x430] sm:$0xff]  ;;  %v2121_v22 = vld [vmem:[%s10836_s26 + $0x448] sm:$0xff] }
 0x353   : > { %2477 = vmatprep.mubr.f32.mxu1 %v2099_v60 }
 0x355   : > { %v9515_v26 = vpop.f32.mrb[44].mxu1 }
 0x356   : > { %v2216_v17 = vpop.f32.mrb[45].mxu1  ;;  %2478 = vmatmul.mubr.f32.gmra.mrb[150].mxu1 %v2098_v9  ;;  %v2564_v25 = vmul.f32 %v9544_v50, %v9515_v26 }
 0x357   : > { %2482 = vmatprep.mubr.f32.mxu1 %v2101_v1  ;;  %v2120_v17 = vld [vmem:[%s10836_s26 + $0x440] sm:$0xff] }
 0x359   : > { %v9523_v51 = vpop.f32.mrb[46].mxu1 }
 0x35a   : > { %v2221_v5 = vpop.f32.mrb[47].mxu1  ;;  %2483 = vmatmul.mubr.f32.gmra.mrb[152].mxu1 %v2100_v63  ;;  %v2565_v28 = vmul.f32 %v9544_v50, %v9523_v51 }
 0x35b   : > { %2487 = vmatprep.mubr.f32.mxu1 %v2103_v23  ;;  %v2123_v23 = vld [vmem:[%s10836_s26 + $0x458] sm:$0xff] }
 0x35d   : > { %v9531_v8 = vpop.f32.mrb[48].mxu1 }
 0x35e   : > { %v2226_v0 = vpop.f32.mrb[49].mxu1  ;;  %2488 = vmatmul.mubr.f32.gmra.mrb[154].mxu1 %v2102_v42  ;;  %v2566_v9 = vmul.f32 %v9544_v50, %v9531_v8  ;;  %v6503_v8 = vld [vmem:[%s10838_s29 + $0x2] ss:$0 sm:$0xff] }
 0x35f   : > { %2492 = vmatprep.mubr.f32.mxu1 %v2105_v37  ;;  %v2122_v0 = vld [vmem:[%s10836_s26 + $0x450] sm:$0xff] }
 0x361   : > { %v9539_v3 = vpop.f32.mrb[50].mxu1 }
 0x362   : > { %v2231_v43 = vpop.f32.mrb[51].mxu1  ;;  %2493 = vmatmul.mubr.f32.gmra.mrb[156].mxu1 %v2104_v48  ;;  %v2567_v5 = vmul.f32 %v9544_v50, %v9539_v3 }
 0x363   : > { %2497 = vmatprep.mubr.f32.mxu1 %v2107_v56  ;;  %v2125_v56 = vld [vmem:[%s10836_s26 + $0x468] sm:$0xff] }
 0x365   : > { %v2234_v58 = vpop.f32.mrb[52].mxu1 }
 0x366   : > { %v2584_v61 = vmul.f32 %v9549_v31, %v2234_v58  ;;  %v2236_v41 = vpop.f32.mrb[53].mxu1  ;;  %2498 = vmatmul.mubr.f32.gmra.mrb[158].mxu1 %v2106_v29 }
 0x367   : > { %2502 = vmatprep.mubr.f32.mxu1 %v2109_v18  ;;  %v2127_v18 = vld [vmem:[%s10836_s26 + $0x478] sm:$0xff]  ;;  %v2126_v41 = vld [vmem:[%s10836_s26 + $0x470] sm:$0xff] }
 0x368   : > { %v9562_v2 = vadd.f32 %v2584_v61, %v2560_v10 }
 0x369   : > { %v2239_v34 = vpop.f32.mrb[54].mxu1 }
 0x36a   : > { %v2585_v46 = vmul.f32 %v9549_v31, %v2239_v34  ;;  %v2241_v47 = vpop.f32.mrb[55].mxu1  ;;  %2503 = vmatmul.mubr.f32.gmra.mrb[160].mxu1 %v2108_v16 }
 0x36b   : > { %2507 = vmatprep.mubr.f32.mxu1 %v2111_v33 }
 0x36c   : > { %v9572_v59 = vadd.f32 %v2585_v46, %v2561_v57 }
 0x36d   : > { %v2244_v39 = vpop.f32.mrb[56].mxu1 }
 0x36e   : > { %v2586_v45 = vmul.f32 %v9549_v31, %v2244_v39  ;;  %v2246_v14 = vpop.f32.mrb[57].mxu1  ;;  %2508 = vmatmul.mubr.f32.gmra.mrb[162].mxu1 %v2110_v11 }
 0x36f   : > { %2512 = vmatprep.mubr.f32.mxu1 %v2113_v15 }
 0x370   : > { %v9582_v20 = vadd.f32 %v2586_v45, %v2562_v19 }
 0x371   : > { %v2249_v35 = vpop.f32.mrb[58].mxu1 }
 0x372   : > { %v2587_v54 = vmul.f32 %v9549_v31, %v2249_v35  ;;  %v2251_v24 = vpop.f32.mrb[59].mxu1  ;;  %2513 = vmatmul.mubr.f32.gmra.mrb[164].mxu1 %v2112_v40 }
 0x373   : > { %2517 = vmatprep.mubr.f32.mxu1 %v2115_v55 }
 0x374   : > { %v2595_v12 = vadd.f32 %v2587_v54, %v2563_v13 }
 0x375   : > { %v2254_v44 = vpop.f32.mrb[60].mxu1 }
 0x376   : > { %v2588_v52 = vmul.f32 %v9549_v31, %v2254_v44  ;;  %v2256_v30 = vpop.f32.mrb[61].mxu1  ;;  %2518 = vmatmul.mubr.f32.gmra.mrb[166].mxu1 %v2114_v36 }
 0x377   : > { %2522 = vmatprep.mubr.f32.mxu1 %v2117_v27 }
 0x378   : > { %v2596_v38 = vadd.f32 %v2588_v52, %v2564_v25 }
 0x379   : > { %v2259_v6 = vpop.f32.mrb[62].mxu1 }
 0x37a   : > { %v2589_v62 = vmul.f32 %v9549_v31, %v2259_v6  ;;  %v2261_v4 = vpop.f32.mrb[63].mxu1  ;;  %2523 = vmatmul.mubr.f32.gmra.mrb[168].mxu1 %v2116_v21 }
 0x37b   : > { %2527 = vmatprep.mubr.f32.mxu1 %v2119_v49 }
 0x37c   : > { %v2597_v60 = vadd.f32 %v2589_v62, %v2565_v28 }
 0x37d   : > { %v2264_v53 = vpop.f32.mrb[64].mxu1 }
 0x37e   : > { %v2590_v1 = vmul.f32 %v9549_v31, %v2264_v53  ;;  %v2266_v26 = vpop.f32.mrb[65].mxu1  ;;  %2528 = vmatmul.mubr.f32.gmra.mrb[170].mxu1 %v2118_v32 }
 0x37f   : > { %2532 = vmatprep.mubr.f32.mxu1 %v2121_v22 }
 0x380   : > { %v2598_v63 = vadd.f32 %v2590_v1, %v2566_v9 }
 0x381   : > { %v2269_v51 = vpop.f32.mrb[66].mxu1 }
 0x382   : > { %v2591_v42 = vmul.f32 %v9549_v31, %v2269_v51  ;;  %v2271_v37 = vpop.f32.mrb[67].mxu1  ;;  %2533 = vmatmul.mubr.f32.gmra.mrb[172].mxu1 %v2120_v17  ;;  %v2124_v31 = vld [vmem:[%s10836_s26 + $0x460] sm:$0xff] }
 0x383   : > { %2537 = vmatprep.mubr.f32.mxu1 %v2123_v23 }
 0x384   : > { %v2599_v48 = vadd.f32 %v2591_v42, %v2567_v5 }
 0x385   : > { %v2274_v43 = vpop.f32.mrb[68].mxu1 }
 0x386   : > { %v2608_v3 = vmul.f32 %v6503_v8, %v2274_v43  ;;  %v2276_v50 = vpop.f32.mrb[69].mxu1  ;;  %2538 = vmatmul.mubr.f32.gmra.mrb[174].mxu1 %v2122_v0 }
 0x387   : > { %2542 = vmatprep.mubr.f32.mxu1 %v2125_v56  ;;  %v2841_v50 = vld [vmem:[%s10839_s8 + $0x8] sm:$0xff] }
 0x388   : > { %v2616_v29 = vadd.f32 %v2608_v3, %v9562_v2  ;;  %v2840_v3 = vld [vmem:[%s10839_s8] sm:$0xff] }
 0x389   : > { %v2279_v58 = vpop.f32.mrb[70].mxu1 }
 0x38a   : > { %v2609_v10 = vmul.f32 %v6503_v8, %v2279_v58  ;;  %v2281_v61 = vpop.f32.mrb[71].mxu1  ;;  %2543 = vmatmul.mubr.f32.gmra.mrb[176].mxu1 %v2124_v31 }
 0x38b   : > { %2547 = vmatprep.mubr.f32.mxu1 %v2127_v18 }
 0x38c   : > { %v2617_v16 = vadd.f32 %v2609_v10, %v9572_v59  ;;  %v6507_v10 = vld [vmem:[%s10838_s29 + $0x4] ss:$0 sm:$0xff] }
 0x38d   : > { %v2284_v33 = vpop.f32.mrb[72].mxu1 }
 0x38e   : > { %v2610_v34 = vmul.f32 %v6503_v8, %v2284_v33  ;;  %v2286_v57 = vpop.f32.mrb[73].mxu1  ;;  %2548 = vmatmul.mubr.f32.gmra.mrb[178].mxu1 %v2126_v41 }
 0x390   : > { %v2618_v2 = vadd.f32 %v2610_v34, %v9582_v20  ;;  %v6505_v20 = vld [vmem:[%s10838_s29 + $0x3] ss:$0 sm:$0xff] }
 0x391   : > { %v2289_v46 = vpop.f32.mrb[74].mxu1 }
 0x392   : > { %v2611_v47 = vmul.f32 %v6503_v8, %v2289_v46  ;;  %v2291_v11 = vpop.f32.mrb[75].mxu1 }
 0x394   : > { %v2619_v15 = vadd.f32 %v2611_v47, %v2595_v12 }
 0x395   : > { %v2294_v39 = vpop.f32.mrb[76].mxu1 }
 0x396   : > { %v2612_v19 = vmul.f32 %v6503_v8, %v2294_v39  ;;  %v2296_v45 = vpop.f32.mrb[77].mxu1 }
 0x398   : > { %v2620_v14 = vadd.f32 %v2612_v19, %v2596_v38 }
 0x399   : > { %v2299_v40 = vpop.f32.mrb[78].mxu1 }
 0x39a   : > { %v2613_v55 = vmul.f32 %v6503_v8, %v2299_v40  ;;  %v2301_v35 = vpop.f32.mrb[79].mxu1 }
 0x39c   : > { %v2621_v13 = vadd.f32 %v2613_v55, %v2597_v60 }
 0x39d   : > { %v2304_v54 = vpop.f32.mrb[80].mxu1 }
 0x39e   : > { %v2614_v59 = vmul.f32 %v6503_v8, %v2304_v54  ;;  %v2306_v24 = vpop.f32.mrb[81].mxu1 }
 0x3a0   : > { %v2622_v36 = vadd.f32 %v2614_v59, %v2598_v63 }
 0x3a1   : > { %v2309_v27 = vpop.f32.mrb[82].mxu1 }
 0x3a2   : > { %v2615_v44 = vmul.f32 %v6503_v8, %v2309_v27  ;;  %v2311_v25 = vpop.f32.mrb[83].mxu1 }
 0x3a4   : > { %v2623_v12 = vadd.f32 %v2615_v44, %v2599_v48 }
 0x3a5   : > { %v2314_v52 = vpop.f32.mrb[84].mxu1 }
 0x3a6   : > { %v2632_v30 = vmul.f32 %v6505_v20, %v2314_v52  ;;  %v2316_v21 = vpop.f32.mrb[85].mxu1 }
 0x3a8   : > { %v2640_v38 = vadd.f32 %v2632_v30, %v2616_v29  ;;  %v7730_v29 = vpack.c.bf16 %v2841_v50, %v2840_v3 }
 0x3a9   : > { %v2319_v49 = vpop.f32.mrb[86].mxu1 }
 0x3aa   : > { %v2633_v6 = vmul.f32 %v6505_v20, %v2319_v49  ;;  %v2321_v28 = vpop.f32.mrb[87].mxu1  ;;  %7731 = vmatprep.subr.bf16.mxu0 %v7730_v29  ;;  %v2842_v49 = vld [vmem:[%s10839_s8 + $0x10] sm:$0xff] }
 0x3ab   : > { %7733 = vmatpush3.bf16.msra.mxu0 %v7730_v29  ;;  %v6509_v28 = vld [vmem:[%s10838_s29 + $0x5] ss:$0 sm:$0xff] }
 0x3ac   : > { %v2641_v62 = vadd.f32 %v2633_v6, %v2617_v16  ;;  %v2843_v6 = vld [vmem:[%s10839_s8 + $0x18] sm:$0xff]  ;;  %s10841_s8 = sld [smem:[#allocation12_spill]] }
 0x3ad   : > { %v2324_v4 = vpop.f32.mrb[88].mxu1 }
 0x3ae   : > { %v2634_v32 = vmul.f32 %v6505_v20, %v2324_v4  ;;  %v2326_v60 = vpop.f32.mrb[89].mxu1 }
 0x3b0   : > { %v2642_v22 = vadd.f32 %v2634_v32, %v2618_v2 }
 0x3b1   : > { %v2329_v53 = vpop.f32.mrb[90].mxu1 }
 0x3b2   : > { %v2635_v9 = vmul.f32 %v6505_v20, %v2329_v53  ;;  %v2331_v1 = vpop.f32.mrb[91].mxu1 }
 0x3b4   : > { %v2643_v26 = vadd.f32 %v2635_v9, %v2619_v15 }
 0x3b5   : > { %v2334_v17 = vpop.f32.mrb[92].mxu1 }
 0x3b6   : > { %v2636_v63 = vmul.f32 %v6505_v20, %v2334_v17  ;;  %v2336_v23 = vpop.f32.mrb[93].mxu1 }
 0x3b8   : > { %v2644_v51 = vadd.f32 %v2636_v63, %v2620_v14 }
 0x3b9   : > { %v2339_v5 = vpop.f32.mrb[94].mxu1 }
 0x3ba   : > { %v2637_v42 = vmul.f32 %v6505_v20, %v2339_v5  ;;  %v2341_v37 = vpop.f32.mrb[95].mxu1 }
 0x3bc   : > { %v2645_v8 = vadd.f32 %v2637_v42, %v2621_v13 }
 0x3bd   : > { %v2344_v0 = vpop.f32.mrb[96].mxu1 }
 0x3be   : > { %v2638_v48 = vmul.f32 %v6505_v20, %v2344_v0  ;;  %v2346_v56 = vpop.f32.mrb[97].mxu1 }
 0x3c0   : > { %v2646_v43 = vadd.f32 %v2638_v48, %v2622_v36 }
 0x3c1   : > { %v2349_v31 = vpop.f32.mrb[98].mxu1 }
 0x3c2   : > { %v2639_v18 = vmul.f32 %v6505_v20, %v2349_v31  ;;  %v2351_v58 = vpop.f32.mrb[99].mxu1 }
 0x3c4   : > { %v2647_v61 = vadd.f32 %v2639_v18, %v2623_v12 }
 0x3c5   : > { %v2354_v41 = vpop.f32.mrb[100].mxu1 }
 0x3c6   : > { %v2656_v16 = vmul.f32 %v6507_v10, %v2354_v41  ;;  %v2356_v33 = vpop.f32.mrb[101].mxu1 }
 0x3c7   : > { %v2982_v33 = vld [vmem:[%s10787_s10] sm:$0xff] }
 0x3c8   : > { %v2664_v34 = vadd.f32 %v2656_v16, %v2640_v38 }
 0x3c9   : > { %v2359_v57 = vpop.f32.mrb[102].mxu1 }
 0x3ca   : > { %v2657_v2 = vmul.f32 %v6507_v10, %v2359_v57  ;;  %v2361_v46 = vpop.f32.mrb[103].mxu1 }
 0x3cc   : > { %v2665_v47 = vadd.f32 %v2657_v2, %v2641_v62  ;;  %v7734_v62 = vpack.c.bf16 %v2843_v6, %v2842_v49 }
 0x3cd   : > { %v2364_v11 = vpop.f32.mrb[104].mxu1 }
 0x3ce   : > { %v2658_v15 = vmul.f32 %v6507_v10, %v2364_v11  ;;  %v2366_v39 = vpop.f32.mrb[105].mxu1  ;;  %7735 = vmatprep.subr.bf16.mxu0 %v7734_v62 }
 0x3cf   : > { %7737 = vmatpush3.bf16.msra.mxu0 %v7734_v62 }
 0x3d0   : > { %v2666_v19 = vadd.f32 %v2658_v15, %v2642_v22 }
 0x3d1   : > { %v2369_v45 = vpop.f32.mrb[106].mxu1 }
 0x3d2   : > { %v2659_v14 = vmul.f32 %v6507_v10, %v2369_v45  ;;  %v2371_v40 = vpop.f32.mrb[107].mxu1 }
 0x3d4   : > { %v2667_v55 = vadd.f32 %v2659_v14, %v2643_v26 }
 0x3d5   : > { %v2374_v35 = vpop.f32.mrb[108].mxu1 }
 0x3d6   : > { %v2660_v13 = vmul.f32 %v6507_v10, %v2374_v35  ;;  %v2376_v54 = vpop.f32.mrb[109].mxu1 }
 0x3d8   : > { %v2668_v59 = vadd.f32 %v2660_v13, %v2644_v51 }
 0x3d9   : > { %v2379_v24 = vpop.f32.mrb[110].mxu1 }
 0x3da   : > { %v2661_v36 = vmul.f32 %v6507_v10, %v2379_v24  ;;  %v2381_v27 = vpop.f32.mrb[111].mxu1 }
 0x3dc   : > { %v2669_v44 = vadd.f32 %v2661_v36, %v2645_v8 }
 0x3dd   : > { %v2384_v25 = vpop.f32.mrb[112].mxu1 }
 0x3de   : > { %v2662_v20 = vmul.f32 %v6507_v10, %v2384_v25  ;;  %v2386_v12 = vpop.f32.mrb[113].mxu1 }
 0x3e0   : > { %v2670_v52 = vadd.f32 %v2662_v20, %v2646_v43 }
 0x3e1   : > { %v2389_v30 = vpop.f32.mrb[114].mxu1 }
 0x3e2   : > { %v2663_v21 = vmul.f32 %v6507_v10, %v2389_v30  ;;  %v2391_v38 = vpop.f32.mrb[115].mxu1 }
 0x3e4   : > { %v2671_v4 = vadd.f32 %v2663_v21, %v2647_v61 }
 0x3e5   : > { %v2394_v32 = vpop.f32.mrb[116].mxu1 }
 0x3e6   : > { %v2680_v60 = vmul.f32 %v6509_v28, %v2394_v32  ;;  %v2396_v22 = vpop.f32.mrb[117].mxu1 }
 0x3e8   : > { %v2688_v53 = vadd.f32 %v2680_v60, %v2664_v34  ;;  %v2983_v34 = vld [vmem:[%s10787_s10 + $0x8] sm:$0xff] }
 0x3e9   : > { %v2399_v9 = vpop.f32.mrb[118].mxu1  ;;  %v9673_v46 = vpack.c.bf16 %v2983_v34, %v2982_v33 }
 0x3ea   : > { %v2681_v1 = vmul.f32 %v6509_v28, %v2399_v9  ;;  %v2401_v26 = vpop.f32.mrb[119].mxu1  ;;  %v6513_v9 = vld [vmem:[%s10838_s29 + $0x7] ss:$0 sm:$0xff] }
 0x3eb   : > { %7739 = vmatprep.subr.bf16.mxu0 %v9673_v46 }
 0x3ec   : > { %v2689_v17 = vadd.f32 %v2681_v1, %v2665_v47  ;;  %v6511_v47 = vld [vmem:[%s10838_s29 + $0x6] ss:$0 sm:$0xff] }
 0x3ed   : > { %v2404_v63 = vpop.f32.mrb[120].mxu1 }
 0x3ee   : > { %v2682_v23 = vmul.f32 %v6509_v28, %v2404_v63  ;;  %v2406_v51 = vpop.f32.mrb[121].mxu1 }
 0x3f0   : > { %v2690_v5 = vadd.f32 %v2682_v23, %v2666_v19 }
 0x3f1   : > { %v2409_v42 = vpop.f32.mrb[122].mxu1 }
 0x3f2   : > { %v2683_v37 = vmul.f32 %v6509_v28, %v2409_v42  ;;  %v2411_v8 = vpop.f32.mrb[123].mxu1 }
 0x3f4   : > { %v2691_v0 = vadd.f32 %v2683_v37, %v2667_v55 }
 0x3f5   : > { %v2414_v48 = vpop.f32.mrb[124].mxu1 }
 0x3f6   : > { %v2684_v56 = vmul.f32 %v6509_v28, %v2414_v48  ;;  %v2416_v43 = vpop.f32.mrb[125].mxu1 }
 0x3f8   : > { %v2692_v3 = vadd.f32 %v2684_v56, %v2668_v59 }
 0x3f9   : > { %v2419_v50 = vpop.f32.mrb[126].mxu1 }
 0x3fa   : > { %v2685_v31 = vmul.f32 %v6509_v28, %v2419_v50  ;;  %v2421_v29 = vpop.f32.mrb[127].mxu1 }
 0x3fc   : > { %v2693_v18 = vadd.f32 %v2685_v31, %v2669_v44 }
 0x3fd   : > { %v2424_v58 = vpop.f32.mrb[128].mxu1 }
 0x3fe   : > { %v2686_v10 = vmul.f32 %v6509_v28, %v2424_v58  ;;  %v2426_v61 = vpop.f32.mrb[129].mxu1 }
 0x400   : > { %v2694_v41 = vadd.f32 %v2686_v10, %v2670_v52 }
 0x401   : > { %v2429_v16 = vpop.f32.mrb[130].mxu1 }
 0x402   : > { %v2687_v57 = vmul.f32 %v6509_v28, %v2429_v16  ;;  %v2431_v2 = vpop.f32.mrb[131].mxu1 }
 0x404   : > { %v2695_v11 = vadd.f32 %v2687_v57, %v2671_v4 }
 0x405   : > { %v2434_v15 = vpop.f32.mrb[132].mxu1 }
 0x406   : > { %v2704_v39 = vmul.f32 %v6511_v47, %v2434_v15  ;;  %v2436_v19 = vpop.f32.mrb[133].mxu1 }
 0x407   : > { %v9687_v19 = vld [vmem:[%s10838_s29 + $0x8] ss:$0 sm:$0xff] }
 0x408   : > { %v2712_v45 = vadd.f32 %v2704_v39, %v2688_v53 }
 0x409   : > { %v2439_v14 = vpop.f32.mrb[134].mxu1 }
 0x40a   : > { %v2705_v40 = vmul.f32 %v6511_v47, %v2439_v14  ;;  %v2441_v55 = vpop.f32.mrb[135].mxu1 }
 0x40c   : > { %v2713_v35 = vadd.f32 %v2705_v40, %v2689_v17 }
 0x40d   : > { %v2444_v13 = vpop.f32.mrb[136].mxu1 }
 0x40e   : > { %v2706_v54 = vmul.f32 %v6511_v47, %v2444_v13  ;;  %v2446_v59 = vpop.f32.mrb[137].mxu1 }
 0x410   : > { %v2714_v24 = vadd.f32 %v2706_v54, %v2690_v5 }
 0x411   : > { %v2449_v36 = vpop.f32.mrb[138].mxu1 }
 0x412   : > { %v2707_v27 = vmul.f32 %v6511_v47, %v2449_v36  ;;  %v2451_v44 = vpop.f32.mrb[139].mxu1 }
 0x414   : > { %v2715_v25 = vadd.f32 %v2707_v27, %v2691_v0 }
 0x415   : > { %v2454_v20 = vpop.f32.mrb[140].mxu1 }
 0x416   : > { %v2708_v12 = vmul.f32 %v6511_v47, %v2454_v20  ;;  %v2456_v52 = vpop.f32.mrb[141].mxu1 }
 0x418   : > { %v2716_v30 = vadd.f32 %v2708_v12, %v2692_v3 }
 0x419   : > { %v2459_v21 = vpop.f32.mrb[142].mxu1 }
 0x41a   : > { %v2709_v38 = vmul.f32 %v6511_v47, %v2459_v21  ;;  %v2461_v49 = vpop.f32.mrb[143].mxu1 }
 0x41c   : > { %v2717_v6 = vadd.f32 %v2709_v38, %v2693_v18 }
 0x41d   : > { %v2464_v28 = vpop.f32.mrb[144].mxu1 }
 0x41e   : > { %v2710_v62 = vmul.f32 %v6511_v47, %v2464_v28  ;;  %v2466_v4 = vpop.f32.mrb[145].mxu1 }
 0x420   : > { %v2718_v32 = vadd.f32 %v2710_v62, %v2694_v41 }
 0x421   : > { %v2469_v60 = vpop.f32.mrb[146].mxu1 }
 0x422   : > { %v2711_v22 = vmul.f32 %v6511_v47, %v2469_v60  ;;  %v2471_v53 = vpop.f32.mrb[147].mxu1 }
 0x424   : > { %v2719_v1 = vadd.f32 %v2711_v22, %v2695_v11 }
 0x425   : > { %v2474_v26 = vpop.f32.mrb[148].mxu1 }
 0x426   : > { %v2728_v17 = vmul.f32 %v6513_v9, %v2474_v26  ;;  %v2476_v63 = vpop.f32.mrb[149].mxu1 }
 0x428   : > { %v2736_v23 = vadd.f32 %v2728_v17, %v2712_v45 }
 0x429   : > { %v2479_v51 = vpop.f32.mrb[150].mxu1 }
 0x42a   : > { %v2729_v5 = vmul.f32 %v6513_v9, %v2479_v51  ;;  %v2481_v42 = vpop.f32.mrb[151].mxu1 }
 0x42c   : > { %v2737_v37 = vadd.f32 %v2729_v5, %v2713_v35 }
 0x42d   : > { %v2484_v8 = vpop.f32.mrb[152].mxu1 }
 0x42e   : > { %v2730_v0 = vmul.f32 %v6513_v9, %v2484_v8  ;;  %v2486_v48 = vpop.f32.mrb[153].mxu1 }
 0x430   : > { %v2738_v56 = vadd.f32 %v2730_v0, %v2714_v24 }
 0x431   : > { %v2489_v43 = vpop.f32.mrb[154].mxu1 }
 0x432   : > { %v2731_v3 = vmul.f32 %v6513_v9, %v2489_v43  ;;  %v2491_v50 = vpop.f32.mrb[155].mxu1 }
 0x434   : > { %v2739_v31 = vadd.f32 %v2731_v3, %v2715_v25 }
 0x435   : > { %v2494_v29 = vpop.f32.mrb[156].mxu1 }
 0x436   : > { %v2732_v18 = vmul.f32 %v6513_v9, %v2494_v29  ;;  %v2496_v58 = vpop.f32.mrb[157].mxu1 }
 0x438   : > { %v2740_v10 = vadd.f32 %v2732_v18, %v2716_v30 }
 0x439   : > { %v2499_v61 = vpop.f32.mrb[158].mxu1 }
 0x43a   : > { %v2733_v41 = vmul.f32 %v6513_v9, %v2499_v61  ;;  %v2501_v16 = vpop.f32.mrb[159].mxu1 }
 0x43c   : > { %v2741_v33 = vadd.f32 %v2733_v41, %v2717_v6 }
 0x43d   : > { %v2504_v34 = vpop.f32.mrb[160].mxu1 }
 0x43e   : > { %v2734_v57 = vmul.f32 %v6513_v9, %v2504_v34  ;;  %v2506_v2 = vpop.f32.mrb[161].mxu1 }
 0x440   : > { %v9682_v47 = vadd.f32 %v2734_v57, %v2718_v32 }
 0x441   : > { %v2509_v11 = vpop.f32.mrb[162].mxu1 }
 0x442   : > { %v2735_v15 = vmul.f32 %v6513_v9, %v2509_v11  ;;  %v2511_v39 = vpop.f32.mrb[163].mxu1 }
 0x444   : > { %v9689_v45 = vadd.f32 %v2735_v15, %v2719_v1 }
 0x445   : > { %v2514_v14 = vpop.f32.mrb[164].mxu1 }
 0x446   : > { %v2752_v40 = vmul.f32 %v9687_v19, %v2514_v14  ;;  %v2516_v55 = vpop.f32.mrb[165].mxu1 }
 0x448   : > { %v9692_v35 = vadd.f32 %v2752_v40, %v2736_v23 }
 0x449   : > { %v2519_v13 = vpop.f32.mrb[166].mxu1 }
 0x44a   : > { %v2768_v54 = vmul.f32 %v9692_v35, %v9692_v35  ;;  %v2753_v59 = vmul.f32 %v9687_v19, %v2519_v13  ;;  %v2521_v24 = vpop.f32.mrb[167].mxu1 }
 0x44c   : > { %v2776_v36 = vmul.f32 %v2768_v54, %v9692_v35  ;;  %v9698_v27 = vadd.f32 %v2753_v59, %v2737_v37 }
 0x44d   : > { %v2524_v44 = vpop.f32.mrb[168].mxu1 }
 0x44e   : > { %v2784_v25 = vmul.f32 0.044715, %v2776_v36  ;;  %v2769_v20 = vmul.f32 %v9698_v27, %v9698_v27  ;;  %v2754_v12 = vmul.f32 %v9687_v19, %v2524_v44  ;;  %v2526_v52 = vpop.f32.mrb[169].mxu1 }
 0x450   : > { %v2792_v30 = vadd.f32 %v2784_v25, %v9692_v35  ;;  %v2777_v21 = vmul.f32 %v2769_v20, %v9698_v27  ;;  %v9705_v38 = vadd.f32 %v2754_v12, %v2738_v56 }
 0x451   : > { %v2529_v49 = vpop.f32.mrb[170].mxu1 }
 0x452   : > { %v2800_v6 = vmul.f32 0.7978846, %v2792_v30  ;;  %v2785_v28 = vmul.f32 0.044715, %v2777_v21  ;;  %v2770_v62 = vmul.f32 %v9705_v38, %v9705_v38  ;;  %v2755_v4 = vmul.f32 %v9687_v19, %v2529_v49  ;;  %v2531_v32 = vpop.f32.mrb[171].mxu1 }
 0x454   : > { %8085 = vtanh.f32 %v2800_v6  ;;  %v2793_v60 = vadd.f32 %v2785_v28, %v9698_v27  ;;  %v2778_v22 = vmul.f32 %v2770_v62, %v9705_v38  ;;  %v9712_v53 = vadd.f32 %v2755_v4, %v2739_v31 }
 0x455   : > { %v2534_v9 = vpop.f32.mrb[172].mxu1 }
 0x456   : > { %v2801_v1 = vmul.f32 0.7978846, %v2793_v60  ;;  %v2786_v26 = vmul.f32 0.044715, %v2778_v22  ;;  %v2771_v17 = vmul.f32 %v9712_v53, %v9712_v53  ;;  %v2756_v63 = vmul.f32 %v9687_v19, %v2534_v9  ;;  %v2536_v23 = vpop.f32.mrb[173].mxu1 }
 0x458   : > { %8087 = vtanh.f32 %v2801_v1  ;;  %v2794_v51 = vadd.f32 %v2786_v26, %v9705_v38  ;;  %v2779_v5 = vmul.f32 %v2771_v17, %v9712_v53  ;;  %v9719_v42 = vadd.f32 %v2756_v63, %v2740_v10 }
 0x459   : > { %v2539_v37 = vpop.f32.mrb[174].mxu1 }
 0x45a   : > { %v2802_v8 = vmul.f32 0.7978846, %v2794_v51  ;;  %v2787_v0 = vmul.f32 0.044715, %v2779_v5  ;;  %v2772_v48 = vmul.f32 %v9719_v42, %v9719_v42  ;;  %v2757_v56 = vmul.f32 %v9687_v19, %v2539_v37  ;;  %v2541_v43 = vpop.f32.mrb[175].mxu1 }
 0x45c   : > { %8089 = vtanh.f32 %v2802_v8  ;;  %v2795_v3 = vadd.f32 %v2787_v0, %v9712_v53  ;;  %v2780_v50 = vmul.f32 %v2772_v48, %v9719_v42  ;;  %v9726_v31 = vadd.f32 %v2757_v56, %v2741_v33 }
 0x45d   : > { %v2544_v29 = vpop.f32.mrb[176].mxu1 }
 0x45e   : > { %v8086_v18 = vpop.eup %8085  ;;  %v2803_v58 = vmul.f32 0.7978846, %v2795_v3  ;;  %v2788_v10 = vmul.f32 0.044715, %v2780_v50  ;;  %v2773_v61 = vmul.f32 %v9726_v31, %v9726_v31  ;;  %v2758_v41 = vmul.f32 %v9687_v19, %v2544_v29  ;;  %v2546_v16 = vpop.f32.mrb[177].mxu1  ;;  %v2985_v3 = vld [vmem:[%s10787_s10 + $0x18] sm:$0xff] }
 0x45f   : > { %v2816_v34 = vadd.f32 1.0, %v8086_v18  ;;  %v6535_v29 = vld [vmem:[%s10787_s10 + $0x48] sm:$0xff] }
 0x460   : > { %8091 = vtanh.f32 %v2803_v58  ;;  %v2796_v57 = vadd.f32 %v2788_v10, %v9719_v42  ;;  %v2781_v2 = vmul.f32 %v2773_v61, %v9726_v31  ;;  %v2766_v11 = vadd.f32 %v2758_v41, %v9682_v47  ;;  %v6516_v58 = vld [vmem:[%s10840_s9] ss:$0 sm:$0xff]  ;;  %v6536_v61 = vld [vmem:[%s10787_s10 + $0x50] sm:$0xff]  ;;  %v6537_v41 = vld [vmem:[%s10787_s10 + $0x58] sm:$0xff]  ;;  %s10735_s9 = scalar_lea.hbm %s10800_s23, %s6760_s3 }
 0x461   : > { %v2549_v33 = vpop.f32.mrb[178].mxu1  ;;  %v2824_v15 = vmul.f32 0.5, %v2816_v34 }
 0x462   : > { %v8088_v39 = vpop.eup %8087  ;;  %v2804_v14 = vmul.f32 0.7978846, %v2796_v57  ;;  %v2789_v40 = vmul.f32 0.044715, %v2781_v2  ;;  %v2774_v55 = vmul.f32 %v2766_v11, %v2766_v11  ;;  %v2759_v13 = vmul.f32 %v9687_v19, %v2549_v33  ;;  %v2551_v54 = vpop.f32.mrb[179].mxu1  ;;  %v6549_v33 = vld [vmem:[%s10787_s10 + $0x88] sm:$0xff] }
 0x463   : > { %v2817_v59 = vadd.f32 1.0, %v8088_v39  ;;  %v2832_v24 = vmul.f32 %v2824_v15, %v9692_v35  ;;  %v7750_v2 = vpack.c.bf16 %v6537_v41, %v6536_v61  ;;  %v6553_v61 = vld [vmem:[%s10788_s11 + $0x4] ss:$0 sm:$0xff] }
 0x464   : > { %8093 = vtanh.f32 %v2804_v14  ;;  %v2797_v36 = vadd.f32 %v2789_v40, %v9726_v31  ;;  %v2782_v44 = vmul.f32 %v2774_v55, %v2766_v11  ;;  %v2767_v25 = vadd.f32 %v2759_v13, %v9689_v45 }
 0x465   : > { %v2825_v47 = vmul.f32 0.5, %v2817_v59  ;;  %7223 = vmatprep.mubr.msk.f32.mxu0 %vm2851_vm5, %v2832_v24 }
 0x466   : > { %v8090_v20 = vpop.eup %8089  ;;  %v2805_v12 = vmul.f32 0.7978846, %v2797_v36  ;;  %v2790_v52 = vmul.f32 0.044715, %v2782_v44  ;;  %v2775_v30 = vmul.f32 %v2767_v25, %v2767_v25 }
 0x467   : > { %v2833_v21 = vmul.f32 %v2825_v47, %v9698_v27  ;;  %v2818_v19 = vadd.f32 1.0, %v8090_v20  ;;  %v6550_v20 = vld [vmem:[%s10787_s10 + $0x90] sm:$0xff] }
 0x468   : > { %8095 = vtanh.f32 %v2805_v12  ;;  %v2798_v49 = vadd.f32 %v2790_v52, %v2766_v11  ;;  %v2783_v6 = vmul.f32 %v2775_v30, %v2767_v25  ;;  %v6551_v12 = vld [vmem:[%s10787_s10 + $0x98] sm:$0xff] }
 0x469   : > { %7224 = vmatmul.mubr.msk.f32.vlgmr.msra.gmra.mrb[28].mxu0 %vm2851_vm5, %v2833_v21  ;;  %v2826_v35 = vmul.f32 0.5, %v2818_v19  ;;  %v7758_v52 = vpack.c.bf16 %v6551_v12, %v6550_v20 }
 0x46a   : > { %v8092_v28 = vpop.eup %8091  ;;  %v2806_v62 = vmul.f32 0.7978846, %v2798_v49  ;;  %v2791_v4 = vmul.f32 0.044715, %v2783_v6  ;;  %7741 = vmatpush3.bf16.msra.mxu0 %v9673_v46 }
 0x46b   : > { %v2834_v45 = vmul.f32 %v2826_v35, %v9705_v38  ;;  %v2819_v32 = vadd.f32 1.0, %v8092_v28 }
 0x46c   : > { %8097 = vtanh.f32 %v2806_v62  ;;  %v2799_v60 = vadd.f32 %v2791_v4, %v2767_v25  ;;  %v6539_v4 = vld [vmem:[%s10788_s11 + $0x2] ss:$0 sm:$0xff] }
 0x46d   : > { %7226 = vmatprep.mubr.msk.f32.mxu0 %vm2851_vm5, %v2834_v45  ;;  %v2827_v27 = vmul.f32 0.5, %v2819_v32 }
 0x46e   : > { %v8094_v22 = vpop.eup %8093  ;;  %v2807_v9 = vmul.f32 0.7978846, %v2799_v60 }
 0x46f   : > { %v2835_v1 = vmul.f32 %v2827_v27, %v9712_v53  ;;  %v2820_v26 = vadd.f32 1.0, %v8094_v22 }
 0x470   : > { %8099 = vtanh.f32 %v2807_v9 }
 0x471   : > { %7227 = vmatmul.mubr.msk.f32.gmra.mrb[30].mxu0 %vm2851_vm5, %v2835_v1  ;;  %v2828_v17 = vmul.f32 0.5, %v2820_v26 }
 0x472   : > { %v8096_v63 = vpop.eup %8095 }
 0x473   : > { %v2836_v46 = vmul.f32 %v2828_v17, %v9719_v42  ;;  %v2821_v23 = vadd.f32 1.0, %v8096_v63  ;;  %v2984_v42 = vld [vmem:[%s10787_s10 + $0x10] sm:$0xff] }
 0x474   : > { %v7742_v50 = vpack.c.bf16 %v2985_v3, %v2984_v42 }
 0x475   : > { %7229 = vmatprep.mubr.msk.f32.mxu0 %vm2851_vm5, %v2836_v46  ;;  %v2829_v38 = vmul.f32 0.5, %v2821_v23 }
 0x476   : > { %v8098_v51 = vpop.eup %8097  ;;  %7743 = vmatprep.subr.bf16.mxu0 %v7742_v50 }
 0x477   : > { %v2837_v5 = vmul.f32 %v2829_v38, %v9726_v31  ;;  %v2822_v37 = vadd.f32 1.0, %v8098_v51  ;;  %7745 = vmatpush3.bf16.msra.mxu0 %v7742_v50  ;;  %v6534_v31 = vld [vmem:[%s10787_s10 + $0x40] sm:$0xff] }
 0x478   : > { %v7746_v18 = vpack.c.bf16 %v6535_v29, %v6534_v31 }
 0x479   : > { %7230 = vmatmul.mubr.msk.f32.gmra.mrb[32].mxu0 %vm2851_vm5, %v2837_v5  ;;  %v2830_v8 = vmul.f32 0.5, %v2822_v37 }
 0x47a   : > { %v8100_v53 = vpop.eup %8099  ;;  %7747 = vmatprep.subr.bf16.mxu0 %v7746_v18 }
 0x47b   : > { %v2838_v0 = vmul.f32 %v2830_v8, %v2766_v11  ;;  %v2823_v48 = vadd.f32 1.0, %v8100_v53  ;;  %v6548_v11 = vld [vmem:[%s10787_s10 + $0x80] sm:$0xff] }
 0x47c   : > { %v7754_v15 = vpack.c.bf16 %v6549_v33, %v6548_v11 }
 0x47d   : > { %7232 = vmatprep.mubr.msk.f32.mxu0 %vm2851_vm5, %v2838_v0  ;;  %v2831_v56 = vmul.f32 0.5, %v2823_v48 }
 0x47f   : > { %v2839_v43 = vmul.f32 %v2831_v56, %v2767_v25 }
 0x481   : > { %7233 = vmatmul.mubr.msk.f32.gmra.mrb[34].mxu0 %vm2851_vm5, %v2839_v43 }
 0x53c   : > { %v7225_v10 = vpop.f32.mrb[28].mxu0 }
 0x53d   : > { %v2942_v16 = vpop.f32.mrb[29].mxu0  ;;  %v9775_v57 = vadd.f32 %v7225_v10, %v6516_v58 }
 0x53e   : > { %v9773_v34 = vadd.f32 %v6516_v58, %v2942_v16 }
 0x540   : > { %7243 = vmatprep.mubr.msk.f32.mxu0 %vm2851_vm5, %v9773_v34 }
 0x541   : > { %7244 = vmatmul.mubr.msk.f32.vlgmr.msra.gmra.mrb[36].mxu0 %vm2851_vm5, %v9775_v57 }
 0x542   : > { %7749 = vmatpush3.bf16.msra.mxu0 %v7746_v18 }
 0x543   : > { %7751 = vmatprep.subr.bf16.mxu0 %v7750_v2 }
 0x544   : > { %v7228_v39 = vpop.f32.mrb[30].mxu0 }
 0x545   : > { %v2952_v14 = vpop.f32.mrb[31].mxu0  ;;  %v9789_v55 = vadd.f32 %v7228_v39, %v6516_v58 }
 0x546   : > { %v9787_v40 = vadd.f32 %v6516_v58, %v2952_v14  ;;  %7753 = vmatpush3.bf16.msra.mxu0 %v7750_v2 }
 0x547   : > { %7755 = vmatprep.subr.bf16.mxu0 %v7754_v15 }
 0x548   : > { %7246 = vmatprep.mubr.msk.f32.mxu0 %vm2851_vm5, %v9787_v40 }
 0x549   : > { %7247 = vmatmul.mubr.msk.f32.gmra.mrb[38].mxu0 %vm2851_vm5, %v9789_v55 }
 0x54c   : > { %v7231_v13 = vpop.f32.mrb[32].mxu0 }
 0x54d   : > { %v2962_v54 = vpop.f32.mrb[33].mxu0  ;;  %v9797_v24 = vadd.f32 %v7231_v13, %v6516_v58 }
 0x54e   : > { %v9795_v59 = vadd.f32 %v6516_v58, %v2962_v54 }
 0x550   : > { %7249 = vmatprep.mubr.msk.f32.mxu0 %vm2851_vm5, %v9795_v59 }
 0x551   : > { %7250 = vmatmul.mubr.msk.f32.gmra.mrb[40].mxu0 %vm2851_vm5, %v9797_v24 }
 0x554   : > { %v7234_v36 = vpop.f32.mrb[34].mxu0 }
 0x555   : > { %v2972_v44 = vpop.f32.mrb[35].mxu0  ;;  %v9805_v47 = vadd.f32 %v7234_v36, %v6516_v58 }
 0x556   : > { %v9803_v25 = vadd.f32 %v6516_v58, %v2972_v44 }
 0x558   : > { %7252 = vmatprep.mubr.msk.f32.mxu0 %vm2851_vm5, %v9803_v25 }
 0x559   : > { %7253 = vmatmul.mubr.msk.f32.gmra.mrb[42].mxu0 %vm2851_vm5, %v9805_v47 }
 0x55a   : > { %7263 = vmatprep.mubr.msk.f32.mxu0 %vm2851_vm5, %v9773_v34 }
 0x55d   : > { %7264 = vmatmul.mubr.msk.f32.vlgmr.msra.gmra.mrb[44].mxu0 %vm2851_vm5, %v9775_v57 }
 0x55e   : > { %7266 = vmatprep.mubr.msk.f32.mxu0 %vm2851_vm5, %v9787_v40  ;;  %7757 = vmatpush3.bf16.msra.mxu0 %v7754_v15 }
 0x55f   : > { %7759 = vmatprep.subr.bf16.mxu0 %v7758_v52 }
 0x561   : > { %7267 = vmatmul.mubr.msk.f32.gmra.mrb[46].mxu0 %vm2851_vm5, %v9789_v55 }
 0x562   : > { %7269 = vmatprep.mubr.msk.f32.mxu0 %vm2851_vm5, %v9795_v59  ;;  %7761 = vmatpush3.bf16.msra.mxu0 %v7758_v52 }
 0x565   : > { %7270 = vmatmul.mubr.msk.f32.gmra.mrb[48].mxu0 %vm2851_vm5, %v9797_v24 }
 0x566   : > { %7272 = vmatprep.mubr.msk.f32.mxu0 %vm2851_vm5, %v9803_v25 }
 0x569   : > { %7273 = vmatmul.mubr.msk.f32.gmra.mrb[50].mxu0 %vm2851_vm5, %v9805_v47 }
 0x56a   : > { %7283 = vmatprep.mubr.msk.f32.mxu0 %vm2851_vm5, %v9773_v34 }
 0x56d   : > { %7284 = vmatmul.mubr.msk.f32.vlgmr.msra.gmra.mrb[52].mxu0 %vm2851_vm5, %v9775_v57 }
 0x56e   : > { %7286 = vmatprep.mubr.msk.f32.mxu0 %vm2851_vm5, %v9787_v40 }
 0x571   : > { %7287 = vmatmul.mubr.msk.f32.gmra.mrb[54].mxu0 %vm2851_vm5, %v9789_v55 }
 0x572   : > { %7289 = vmatprep.mubr.msk.f32.mxu0 %vm2851_vm5, %v9795_v59 }
 0x575   : > { %7290 = vmatmul.mubr.msk.f32.gmra.mrb[56].mxu0 %vm2851_vm5, %v9797_v24 }
 0x576   : > { %7292 = vmatprep.mubr.msk.f32.mxu0 %vm2851_vm5, %v9803_v25 }
 0x579   : > { %7293 = vmatmul.mubr.msk.f32.gmra.mrb[58].mxu0 %vm2851_vm5, %v9805_v47 }
 0x614   : > { %v9849_v30 = vpop.f32.mrb[36].mxu0 }
 0x615   : > { %v9851_v21 = vpop.f32.mrb[37].mxu0 }
 0x61c   : > { %v9853_v19 = vpop.f32.mrb[38].mxu0 }
 0x61d   : > { %v9855_v49 = vpop.f32.mrb[39].mxu0 }
 0x624   : > { %v9857_v6 = vpop.f32.mrb[40].mxu0 }
 0x625   : > { %v9859_v35 = vpop.f32.mrb[41].mxu0 }
 0x62c   : > { %v9861_v28 = vpop.f32.mrb[42].mxu0 }
 0x62d   : > { %v9863_v62 = vpop.f32.mrb[43].mxu0 }
 0x630   : > { %v7265_v45 = vpop.f32.mrb[44].mxu0 }
 0x631   : > { %v3215_v32 = vadd.f32 %v7265_v45, %v6539_v4  ;;  %v3209_v60 = vpop.f32.mrb[45].mxu0 }
 0x632   : > { %v3210_v27 = vadd.f32 %v6539_v4, %v3209_v60 }
 0x633   : > { %v3249_v22 = vmax.f32 %v3215_v32, 0.0 }
 0x634   : > { %v3248_v9 = vmax.f32 %v3210_v27, 0.0  ;;  %v7268_v1 = vpop.f32.mrb[46].mxu0 }
 0x635   : > { %v3489_v26 = vsel %vm1374_vm4, %v3249_v22, 0.0  ;;  %v3225_v17 = vadd.f32 %v7268_v1, %v6539_v4  ;;  %v3219_v63 = vpop.f32.mrb[47].mxu0 }
 0x636   : > { %v3488_v46 = vsel %vm1374_vm4, %v3248_v9, 0.0  ;;  %v3220_v23 = vadd.f32 %v6539_v4, %v3219_v63  ;;  %3374 = vxpose.xlu0.b32.start [1/8] (short) (narrow) %v3248_v9, 16 }
 0x637   : > { %v3490_v38 = vadd.f32 %v3489_v26, %v3488_v46  ;;  %v3251_v51 = vmax.f32 %v3225_v17, 0.0  ;;  %v6525_v17 = vld [vmem:[%s10788_s11] ss:$0 sm:$0xff] }
 0x638   : > { %v3250_v5 = vmax.f32 %v3220_v23, 0.0  ;;  %v7271_v37 = vpop.f32.mrb[48].mxu0 }
 0x639   : > { %v3235_v8 = vadd.f32 %v7271_v37, %v6539_v4  ;;  %v3229_v53 = vpop.f32.mrb[49].mxu0  ;;  %v3493_v43 = vsel %vm1374_vm4, %v3251_v51, 0.0 }
 0x63a   : > { %v3491_v0 = vsel %vm1374_vm4, %v3250_v5, 0.0  ;;  %v3230_v48 = vadd.f32 %v6539_v4, %v3229_v53  ;;  %3375 = vxpose.xlu0.b32.cont [2/8] (short) (narrow) %v3249_v22, 16 }
 0x63b   : > { %v3492_v56 = vadd.f32 %v3491_v0, %v3490_v38  ;;  %v3253_v42 = vmax.f32 %v3235_v8, 0.0  ;;  %v3089_v0 = vadd.f32 %v9849_v30, %v6525_v17 }
 0x63c   : > { %v3252_v3 = vmax.f32 %v3230_v48, 0.0  ;;  %v7274_v50 = vpop.f32.mrb[50].mxu0 }
 0x63d   : > { %v3494_v31 = vadd.f32 %v3493_v43, %v3492_v56  ;;  %v3245_v29 = vadd.f32 %v7274_v50, %v6539_v4  ;;  %v3239_v18 = vpop.f32.mrb[51].mxu0  ;;  %v3497_v16 = vsel %vm1374_vm4, %v3253_v42, 0.0  ;;  %v3094_v50 = vadd.f32 %v6525_v17, %v9855_v49 }
 0x63e   : > { %v3495_v58 = vsel %vm1374_vm4, %v3252_v3, 0.0  ;;  %v3240_v10 = vadd.f32 %v6539_v4, %v3239_v18  ;;  %3376 = vxpose.xlu0.b32.cont [3/8] (short) (narrow) %v3250_v5, 16  ;;  %v3099_v18 = vadd.f32 %v9853_v19, %v6525_v17  ;;  %v3109_v49 = vadd.f32 %v9857_v6, %v6525_v17 }
 0x63f   : > { %v3496_v41 = vadd.f32 %v3495_v58, %v3494_v31  ;;  %v3255_v2 = vmax.f32 %v3245_v29, 0.0  ;;  %v3124_v58 = vmax.f32 %v3094_v50, 0.0 }
 0x640   : > { %v3254_v11 = vmax.f32 %v3240_v10, 0.0  ;;  %v7285_v33 = vpop.f32.mrb[52].mxu0  ;;  %v3127_v19 = vmax.f32 %v3109_v49, 0.0 }
 0x641   : > { %v3498_v15 = vadd.f32 %v3497_v16, %v3496_v41  ;;  %v3341_v39 = vadd.f32 %v7285_v33, %v6553_v61  ;;  %v3335_v14 = vpop.f32.mrb[53].mxu0  ;;  %v3501_v44 = vsel %vm1374_vm4, %v3255_v2, 0.0  ;;  %v3104_v41 = vadd.f32 %v6525_v17, %v9859_v35 }
 0x642   : > { %v3499_v13 = vsel %vm1374_vm4, %v3254_v11, 0.0  ;;  %v3336_v54 = vadd.f32 %v6553_v61, %v3335_v14  ;;  %3377 = vxpose.xlu0.b32.cont [4/8] (short) (narrow) %v3251_v51, 16  ;;  %v3084_v51 = vadd.f32 %v6525_v17, %v9851_v21  ;;  %v3119_v35 = vadd.f32 %v9861_v28, %v6525_v17  ;;  %v3694_v28 = vld [vmem:[%s10789_s12] sm:$0xff] }
 0x643   : > { %v3500_v36 = vadd.f32 %v3499_v13, %v3498_v15 }
 0x644   : > { %v7762_v20 = vpack.c.bf16 %v3341_v39, %v3336_v54  ;;  %v7288_v12 = vpop.f32.mrb[54].mxu0  ;;  %v3122_v43 = vmax.f32 %v3084_v51, 0.0  ;;  %v3114_v39 = vadd.f32 %v6525_v17, %v9863_v62  ;;  %v3129_v6 = vmax.f32 %v3119_v35, 0.0 }
 0x645   : > { %v3502_v52 = vadd.f32 %v3501_v44, %v3500_v36  ;;  %v3351_v4 = vadd.f32 %v7288_v12, %v6553_v61  ;;  %v3345_v45 = vpop.f32.mrb[55].mxu0 }
 0x646   : > { %v3346_v32 = vadd.f32 %v6553_v61, %v3345_v45  ;;  %7763 = vmatprep.subr.bf16.mxu0 %v7762_v20  ;;  %3378 = vxpose.xlu0.b32.cont [5/8] (short) (narrow) %v3252_v3, 16  ;;  %v3128_v54 = vmax.f32 %v3114_v39, 0.0  ;;  %v3695_v45 = vld [vmem:[%s10789_s12 + $0x8] sm:$0xff] }
 0x647   : > { %v3503_v60 = vrot.slane %v3502_v52, 4  ;;  %7765 = vmatpush3.bf16.msra.mxu0 %v7762_v20 }
 0x648   : > { %v7766_v27 = vpack.c.bf16 %v3351_v4, %v3346_v32  ;;  %v7291_v22 = vpop.f32.mrb[56].mxu0 }
 0x649   : > { %v3504_v9 = vadd.f32 %v3503_v60, %v3502_v52  ;;  %v3361_v1 = vadd.f32 %v7291_v22, %v6553_v61  ;;  %v3355_v26 = vpop.f32.mrb[57].mxu0  ;;  %v7782_v22 = vpack.c.bf16 %v3695_v45, %v3694_v28  ;;  %v6597_v28 = vld [vmem:[%s10787_s10 + $0x70] sm:$0xff]  ;;  %v6598_v45 = vld [vmem:[%s10787_s10 + $0x78] sm:$0xff] }
 0x64a   : > { %v3356_v63 = vadd.f32 %v6553_v61, %v3355_v26  ;;  %7767 = vmatprep.subr.bf16.mxu0 %v7766_v27  ;;  %3379 = vxpose.xlu0.b32.cont [6/8] (short) (narrow) %v3253_v42, 16  ;;  %v3123_v42 = vmax.f32 %v3089_v0, 0.0 }
 0x64b   : > { %v3505_v46 = vrot.slane %v3504_v9, 2  ;;  %7769 = vmatpush3.bf16.msra.mxu0 %v7766_v27 }
 0x64c   : > { %v7770_v23 = vpack.c.bf16 %v3361_v1, %v3356_v63  ;;  %v7294_v38 = vpop.f32.mrb[58].mxu0  ;;  %v6582_v1 = vld [vmem:[%s10787_s10 + $0x28] sm:$0xff] }
 0x64d   : > { %v3506_v5 = vadd.f32 %v3505_v46, %v3504_v9  ;;  %v3371_v37 = vadd.f32 %v7294_v38, %v6553_v61  ;;  %v3365_v8 = vpop.f32.mrb[59].mxu0  ;;  %v6581_v9 = vld [vmem:[%s10787_s10 + $0x20] sm:$0xff] }
 0x64e   : > { %v3366_v53 = vadd.f32 %v6553_v61, %v3365_v8  ;;  %7771 = vmatprep.subr.bf16.mxu0 %v7770_v23  ;;  %3380 = vxpose.xlu0.b32.cont [7/8] (short) (narrow) %v3254_v11, 16  ;;  %v3125_v61 = vmax.f32 %v3099_v18, 0.0  ;;  %v3126_v11 = vmax.f32 %v3104_v41, 0.0  ;;  %v7786_v26 = vpack.c.bf16 %v6582_v1, %v6581_v9  ;;  %v6611_v9 = vld [vmem:[%s10787_s10 + $0xb0] sm:$0xff]  ;;  %v6612_v1 = vld [vmem:[%s10787_s10 + $0xb8] sm:$0xff] }
 0x64f   : > { %v3507_v48 = vrot.slane %v3506_v5, 1  ;;  %7773 = vmatpush3.bf16.msra.mxu0 %v7770_v23 }
 0x650   : > { %v7774_v56 = vpack.c.bf16 %v3371_v37, %v3366_v53 }
 0x651   : > { %v3508_v3 = vadd.f32 %v3507_v48, %v3506_v5 }
 0x652   : > { %7775 = vmatprep.subr.bf16.mxu0 %v7774_v56  ;;  %3381 = vxpose.xlu0.b32.end [8/8] (short) (narrow) %v3255_v2, 16 }
 0x653   : > { %7777 = vmatpush3.bf16.msra.mxu0 %v7774_v56  ;;  %v3638_v21 = vmul.f32 %v3508_v3, %v3122_v43  ;;  %v3639_v29 = vmul.f32 %v3508_v3, %v3123_v42  ;;  %v3640_v10 = vmul.f32 %v3508_v3, %v3124_v58  ;;  %v3641_v2 = vmul.f32 %v3508_v3, %v3125_v61 }
 0x654   : > { %v3642_v15 = vmul.f32 %v3508_v3, %v3126_v11  ;;  %v3643_v13 = vmul.f32 %v3508_v3, %v3127_v19  ;;  %v3644_v44 = vmul.f32 %v3508_v3, %v3128_v54  ;;  %v3645_v12 = vmul.f32 %v3508_v3, %v3129_v6 }
 0x655   : > { %v3646_v31 = vsel %vm1374_vm4, %v3638_v21, 0.0  ;;  %v3649_v30 = vsel %vm1374_vm4, %v3639_v29, 0.0  ;;  %v3652_v16 = vsel %vm1374_vm4, %v3640_v10, 0.0  ;;  %v3655_v33 = vsel %vm1374_vm4, %v3641_v2, 0.0  ;;  %v6583_v21 = vld [vmem:[%s10787_s10 + $0x30] sm:$0xff]  ;;  %v6596_v2 = vld [vmem:[%s10787_s10 + $0x68] sm:$0xff] }
 0x656   : > { %3647 = vadd.xlane.f32.xlu1 %v3646_v31  ;;  %v3658_v14 = vsel %vm1374_vm4, %v3642_v15, 0.0  ;;  %v3661_v36 = vsel %vm1374_vm4, %v3643_v13, 0.0  ;;  %v3664_v20 = vsel %vm1374_vm4, %v3644_v44, 0.0  ;;  %v3667_v52 = vsel %vm1374_vm4, %v3645_v12, 0.0  ;;  %v6584_v31 = vld [vmem:[%s10787_s10 + $0x38] sm:$0xff] }
 0x65a   : > { %3650 = vadd.xlane.f32.xlu1 %v3649_v30 }
 0x65e   : > { %3653 = vadd.xlane.f32.xlu1 %v3652_v16  ;;  %v6595_v16 = vld [vmem:[%s10787_s10 + $0x60] sm:$0xff] }
 0x65f   : > { %v7794_v39 = vpack.c.bf16 %v6596_v2, %v6595_v16 }
 0x662   : > { %3656 = vadd.xlane.f32.xlu1 %v3655_v33 }
 0x666   : > { %3659 = vadd.xlane.f32.xlu1 %v3658_v14 }
 0x66a   : > { %3662 = vadd.xlane.f32.xlu1 %v3661_v36 }
 0x66e   : > { %3665 = vadd.xlane.f32.xlu1 %v3664_v20 }
 0x672   : > { %3668 = vadd.xlane.f32.xlu1 %v3667_v52 }
 0x6b6   : > { %v3390_v62 = vpop.trf.xlu0 }
 0x6b7   : > { %7311 = vmatprep.mubr.msk.f32.mxu0 %vm3406_vm6, %v3390_v62 }
 0x6ba   : > { %v3391_v4 = vpop.trf.xlu0 }
 0x6bb   : > { %7312 = vmatmul.mubr.msk.f32.vlgmr.msra.gmra.mrb[60].mxu0 %vm3406_vm6, %v3391_v4 }
 0x6bc   : > { %7318 = vmatprep.mubr.msk.f32.mxu0 %vm1374_vm4, %v3122_v43 }
 0x6e3   : > { %v3648_v17 = vpop.xlane.xlu1 %3647 }
 0x6e4   : > { %v3670_v5 = vadd.f32 1e-06, %v3648_v17 }
 0x6e6   : > { %8101 = vrcp.f32 %v3670_v5 }
 0x6e7   : > { %v3651_v63 = vpop.xlane.xlu1 %3650 }
 0x6e8   : > { %v3671_v37 = vadd.f32 1e-06, %v3651_v63 }
 0x6ea   : > { %8103 = vrcp.f32 %v3671_v37 }
 0x6eb   : > { %v3654_v46 = vpop.xlane.xlu1 %3653 }
 0x6ec   : > { %v3672_v8 = vadd.f32 1e-06, %v3654_v46 }
 0x6ee   : > { %8105 = vrcp.f32 %v3672_v8  ;;  %v6600_v8 = vld [vmem:[%s10788_s11 + $0x3] ss:$0 sm:$0xff] }
 0x6ef   : > { %v3657_v23 = vpop.xlane.xlu1 %3656 }
 0x6f0   : > { %v3673_v0 = vadd.f32 1e-06, %v3657_v23  ;;  %v8102_v29 = vpop.eup %8101 }
 0x6f2   : > { %8107 = vrcp.f32 %v3673_v0 }
 0x6f3   : > { %v3660_v38 = vpop.xlane.xlu1 %3659 }
 0x6f4   : > { %v3674_v48 = vadd.f32 1e-06, %v3660_v38 }
 0x6f6   : > { %8109 = vrcp.f32 %v3674_v48 }
 0x6f7   : > { %v3663_v51 = vpop.xlane.xlu1 %3662 }
 0x6f8   : > { %v3675_v56 = vadd.f32 1e-06, %v3663_v51 }
 0x6fa   : > { %8111 = vrcp.f32 %v3675_v56 }
 0x6fb   : > { %v3666_v53 = vpop.xlane.xlu1 %3665 }
 0x6fc   : > { %v3676_v3 = vadd.f32 1e-06, %v3666_v53 }
 0x6fe   : > { %8113 = vrcp.f32 %v3676_v3 }
 0x6ff   : > { %v3669_v43 = vpop.xlane.xlu1 %3668 }
 0x78e   : > { %v7313_v32 = vpop.f32.mrb[60].mxu0 }
 0x78f   : > { %v3479_v60 = vpop.f32.mrb[61].mxu0 }
 0x790   : > { %v7778_v27 = vpack.c.bf16 %v7313_v32, %v3479_v60  ;;  %v7798_v32 = vpack.c.bf16 %v6598_v45, %v6597_v28  ;;  %v6609_v60 = vld [vmem:[%s10787_s10 + $0xa0] sm:$0xff] }
 0x792   : > { %7779 = vmatprep.subr.bf16.mxu0 %v7778_v27 }
 0x793   : > { %7781 = vmatpush3.bf16.msra.mxu0 %v7778_v27  ;;  %v6610_v27 = vld [vmem:[%s10787_s10 + $0xa8] sm:$0xff] }
 0x794   : > { %7783 = vmatprep.subr.bf16.mxu0 %v7782_v22 }
 0x796   : > { %7319 = vmatmul.mubr.msk.f32.vlgmr.msra.gmra.mrb[62].mxu0 %vm1374_vm4, %v3123_v42  ;;  %v3677_v42 = vadd.f32 1e-06, %v3669_v43 }
 0x797   : > { %7321 = vmatprep.mubr.msk.f32.mxu0 %vm1374_vm4, %v3124_v58  ;;  %7785 = vmatpush3.bf16.msra.mxu0 %v7782_v22  ;;  %v8104_v58 = vpop.eup %8103  ;;  %v7802_v22 = vpack.c.bf16 %v6610_v27, %v6609_v60 }
 0x798   : > { %7787 = vmatprep.subr.bf16.mxu0 %v7786_v26  ;;  %8115 = vrcp.f32 %v3677_v42  ;;  %v8106_v49 = vpop.eup %8105 }
 0x799   : > { %v8108_v33 = vpop.eup %8107 }
 0x79a   : > { %7322 = vmatmul.mubr.msk.f32.gmra.mrb[64].mxu0 %vm1374_vm4, %v3125_v61  ;;  %v7790_v61 = vpack.c.bf16 %v6584_v31, %v6583_v21  ;;  %v8110_v13 = vpop.eup %8109 }
 0x79b   : > { %7324 = vmatprep.mubr.msk.f32.mxu0 %vm1374_vm4, %v3126_v11 }
 0x79e   : > { %7325 = vmatmul.mubr.msk.f32.gmra.mrb[66].mxu0 %vm1374_vm4, %v3127_v19 }
 0x79f   : > { %7327 = vmatprep.mubr.msk.f32.mxu0 %vm1374_vm4, %v3128_v54  ;;  %v8112_v54 = vpop.eup %8111 }
 0x7a0   : > { %v8114_v20 = vpop.eup %8113 }
 0x7a2   : > { %7328 = vmatmul.mubr.msk.f32.gmra.mrb[68].mxu0 %vm1374_vm4, %v3129_v6  ;;  %v8116_v52 = vpop.eup %8115 }
 0x869   : > { %v7320_v50 = vpop.f32.mrb[62].mxu0 }
 0x86a   : > { %v3599_v18 = vpop.f32.mrb[63].mxu0  ;;  %v3687_v10 = vmul.f32 %v8104_v58, %v7320_v50 }
 0x86b   : > { %v3686_v30 = vmul.f32 %v8102_v29, %v3599_v18 }
 0x86d   : > { %v7323_v41 = vpop.f32.mrb[64].mxu0  ;;  %7334 = vmatprep.mubr.msk.f32.mxu0 %vm1374_vm4, %v3686_v30 }
 0x86e   : > { %v3609_v11 = vpop.f32.mrb[65].mxu0  ;;  %7335 = vmatmul.mubr.msk.f32.vlgmr.msra.gmra.mrb[70].mxu0 %vm1374_vm4, %v3687_v10  ;;  %v3689_v19 = vmul.f32 %v8108_v33, %v7323_v41 }
 0x86f   : > { %v3688_v15 = vmul.f32 %v8106_v49, %v3609_v11  ;;  %7789 = vmatpush3.bf16.msra.mxu0 %v7786_v26  ;;  %v7806_v26 = vpack.c.bf16 %v6612_v1, %v6611_v9 }
 0x870   : > { %7791 = vmatprep.subr.bf16.mxu0 %v7790_v61 }
 0x871   : > { %v7326_v14 = vpop.f32.mrb[66].mxu0  ;;  %7337 = vmatprep.mubr.msk.f32.mxu0 %vm1374_vm4, %v3688_v15 }
 0x872   : > { %v3619_v35 = vpop.f32.mrb[67].mxu0  ;;  %7338 = vmatmul.mubr.msk.f32.gmra.mrb[72].mxu0 %vm1374_vm4, %v3689_v19  ;;  %v3691_v44 = vmul.f32 %v8112_v54, %v7326_v14 }
 0x873   : > { %v3690_v36 = vmul.f32 %v8110_v13, %v3619_v35  ;;  %7793 = vmatpush3.bf16.msra.mxu0 %v7790_v61 }
 0x874   : > { %7795 = vmatprep.subr.bf16.mxu0 %v7794_v39 }
 0x875   : > { %v7329_v6 = vpop.f32.mrb[68].mxu0  ;;  %7340 = vmatprep.mubr.msk.f32.mxu0 %vm1374_vm4, %v3690_v36 }
 0x876   : > { %v3629_v12 = vpop.f32.mrb[69].mxu0  ;;  %7341 = vmatmul.mubr.msk.f32.gmra.mrb[74].mxu0 %vm1374_vm4, %v3691_v44  ;;  %v3693_v4 = vmul.f32 %v8116_v52, %v7329_v6  ;;  %v6614_v44 = vld [vmem:[%s10788_s11 + $0x5] ss:$0 sm:$0xff] }
 0x877   : > { %v3692_v62 = vmul.f32 %v8114_v20, %v3629_v12 }
 0x879   : > { %7343 = vmatprep.mubr.msk.f32.mxu0 %vm1374_vm4, %v3692_v62 }
 0x87a   : > { %7344 = vmatmul.mubr.msk.f32.gmra.mrb[76].mxu0 %vm1374_vm4, %v3693_v4 }
 0x87b   : > { %7354 = vmatprep.mubr.msk.f32.mxu0 %vm2851_vm5, %v9773_v34 }
 0x87e   : > { %7355 = vmatmul.mubr.msk.f32.vlgmr.msra.gmra.mrb[78].mxu0 %vm2851_vm5, %v9775_v57 }
 0x87f   : > { %7357 = vmatprep.mubr.msk.f32.mxu0 %vm2851_vm5, %v9787_v40  ;;  %7797 = vmatpush3.bf16.msra.mxu0 %v7794_v39 }
 0x880   : > { %7799 = vmatprep.subr.bf16.mxu0 %v7798_v32 }
 0x882   : > { %7358 = vmatmul.mubr.msk.f32.gmra.mrb[80].mxu0 %vm2851_vm5, %v9789_v55 }
 0x883   : > { %7360 = vmatprep.mubr.msk.f32.mxu0 %vm2851_vm5, %v9795_v59  ;;  %7801 = vmatpush3.bf16.msra.mxu0 %v7798_v32 }
 0x884   : > { %7803 = vmatprep.subr.bf16.mxu0 %v7802_v22 }
 0x886   : > { %7361 = vmatmul.mubr.msk.f32.gmra.mrb[82].mxu0 %vm2851_vm5, %v9797_v24 }
 0x887   : > { %7363 = vmatprep.mubr.msk.f32.mxu0 %vm2851_vm5, %v9803_v25 }
 0x88a   : > { %7364 = vmatmul.mubr.msk.f32.gmra.mrb[84].mxu0 %vm2851_vm5, %v9805_v47 }
 0x88b   : > { %7374 = vmatprep.mubr.msk.f32.mxu0 %vm2851_vm5, %v9773_v34 }
 0x88e   : > { %7375 = vmatmul.mubr.msk.f32.vlgmr.msra.gmra.mrb[86].mxu0 %vm2851_vm5, %v9775_v57 }
 0x88f   : > { %7377 = vmatprep.mubr.msk.f32.mxu0 %vm2851_vm5, %v9787_v40  ;;  %7805 = vmatpush3.bf16.msra.mxu0 %v7802_v22 }
 0x890   : > { %7807 = vmatprep.subr.bf16.mxu0 %v7806_v26 }
 0x892   : > { %7378 = vmatmul.mubr.msk.f32.gmra.mrb[88].mxu0 %vm2851_vm5, %v9789_v55 }
 0x893   : > { %7380 = vmatprep.mubr.msk.f32.mxu0 %vm2851_vm5, %v9795_v59  ;;  %7809 = vmatpush3.bf16.msra.mxu0 %v7806_v26 }
 0x896   : > { %7381 = vmatmul.mubr.msk.f32.gmra.mrb[90].mxu0 %vm2851_vm5, %v9797_v24 }
 0x897   : > { %7383 = vmatprep.mubr.msk.f32.mxu0 %vm2851_vm5, %v9803_v25 }
 0x89a   : > { %7384 = vmatmul.mubr.msk.f32.gmra.mrb[92].mxu0 %vm2851_vm5, %v9805_v47 }
 0x89b   : > { %7394 = vmatprep.mubr.msk.f32.mxu0 %vm2851_vm5, %v9773_v34 }
 0x89e   : > { %7395 = vmatmul.mubr.msk.f32.vlgmr.msra.gmra.mrb[94].mxu0 %vm2851_vm5, %v9775_v57 }
 0x89f   : > { %7397 = vmatprep.mubr.msk.f32.mxu0 %vm2851_vm5, %v9787_v40 }
 0x8a2   : > { %7398 = vmatmul.mubr.msk.f32.gmra.mrb[96].mxu0 %vm2851_vm5, %v9789_v55 }
 0x8a3   : > { %7400 = vmatprep.mubr.msk.f32.mxu0 %vm2851_vm5, %v9795_v59 }
 0x8a6   : > { %7401 = vmatmul.mubr.msk.f32.gmra.mrb[98].mxu0 %vm2851_vm5, %v9797_v24 }
 0x8a7   : > { %7403 = vmatprep.mubr.msk.f32.mxu0 %vm2851_vm5, %v9803_v25 }
 0x8aa   : > { %7404 = vmatmul.mubr.msk.f32.gmra.mrb[100].mxu0 %vm2851_vm5, %v9805_v47 }
 0x951   : > { %v10006_v17 = vpop.f32.mrb[78].mxu0 }
 0x952   : > { %v10008_v63 = vpop.f32.mrb[79].mxu0 }
 0x955   : > { %v10010_v46 = vpop.f32.mrb[80].mxu0 }
 0x956   : > { %v10012_v23 = vpop.f32.mrb[81].mxu0 }
 0x959   : > { %v10014_v38 = vpop.f32.mrb[82].mxu0 }
 0x95a   : > { %v10016_v51 = vpop.f32.mrb[83].mxu0 }
 0x95d   : > { %v10018_v5 = vpop.f32.mrb[84].mxu0 }
 0x95e   : > { %v10020_v37 = vpop.f32.mrb[85].mxu0 }
 0x961   : > { %v7376_v53 = vpop.f32.mrb[86].mxu0 }
 0x962   : > { %v4050_v0 = vadd.f32 %v7376_v53, %v6600_v8  ;;  %v4044_v48 = vpop.f32.mrb[87].mxu0 }
 0x963   : > { %v4045_v56 = vadd.f32 %v6600_v8, %v4044_v48 }
 0x964   : > { %v4084_v43 = vmax.f32 %v4050_v0, 0.0 }
 0x965   : > { %v4083_v3 = vmax.f32 %v4045_v56, 0.0  ;;  %v7379_v42 = vpop.f32.mrb[88].mxu0 }
 0x966   : > { %v4323_v50 = vsel %vm1374_vm4, %v4084_v43, 0.0  ;;  %v4060_v21 = vadd.f32 %v7379_v42, %v6600_v8  ;;  %v4054_v31 = vpop.f32.mrb[89].mxu0 }
 0x967   : > { %v4322_v29 = vsel %vm1374_vm4, %v4083_v3, 0.0  ;;  %v4055_v18 = vadd.f32 %v6600_v8, %v4054_v31  ;;  %4209 = vxpose.xlu0.b32.start [1/8] (short) (narrow) %v4083_v3, 16 }
 0x968   : > { %v4324_v58 = vadd.f32 %v4323_v50, %v4322_v29  ;;  %v4086_v30 = vmax.f32 %v4060_v21, 0.0  ;;  %v6586_v21 = vld [vmem:[%s10788_s11 + $0x1] ss:$0 sm:$0xff] }
 0x969   : > { %v4085_v10 = vmax.f32 %v4055_v18, 0.0  ;;  %v7382_v61 = vpop.f32.mrb[90].mxu0 }
 0x96a   : > { %v4070_v41 = vadd.f32 %v7382_v61, %v6600_v8  ;;  %v4064_v16 = vpop.f32.mrb[91].mxu0  ;;  %v4327_v33 = vsel %vm1374_vm4, %v4086_v30, 0.0 }
 0x96b   : > { %v4325_v2 = vsel %vm1374_vm4, %v4085_v10, 0.0  ;;  %v4065_v49 = vadd.f32 %v6600_v8, %v4064_v16  ;;  %4210 = vxpose.xlu0.b32.cont [2/8] (short) (narrow) %v4084_v43, 16 }
 0x96c   : > { %v4326_v11 = vadd.f32 %v4325_v2, %v4324_v58  ;;  %v4088_v15 = vmax.f32 %v4070_v41, 0.0  ;;  %v3924_v2 = vadd.f32 %v10006_v17, %v6586_v21 }
 0x96d   : > { %v4087_v19 = vmax.f32 %v4065_v49, 0.0  ;;  %v7385_v39 = vpop.f32.mrb[92].mxu0 }
 0x96e   : > { %v4328_v14 = vadd.f32 %v4327_v33, %v4326_v11  ;;  %v4080_v13 = vadd.f32 %v7385_v39, %v6600_v8  ;;  %v4074_v35 = vpop.f32.mrb[93].mxu0  ;;  %v4331_v20 = vsel %vm1374_vm4, %v4088_v15, 0.0  ;;  %v3929_v39 = vadd.f32 %v6586_v21, %v10012_v23 }
 0x96f   : > { %v4329_v54 = vsel %vm1374_vm4, %v4087_v19, 0.0  ;;  %v4075_v36 = vadd.f32 %v6600_v8, %v4074_v35  ;;  %4211 = vxpose.xlu0.b32.cont [3/8] (short) (narrow) %v4085_v10, 16  ;;  %v3934_v35 = vadd.f32 %v10010_v46, %v6586_v21  ;;  %v3944_v23 = vadd.f32 %v10014_v38, %v6586_v21 }
 0x970   : > { %v4330_v6 = vadd.f32 %v4329_v54, %v4328_v14  ;;  %v4090_v12 = vmax.f32 %v4080_v13, 0.0  ;;  %v3959_v54 = vmax.f32 %v3929_v39, 0.0 }
 0x971   : > { %v4089_v52 = vmax.f32 %v4075_v36, 0.0  ;;  %v7396_v62 = vpop.f32.mrb[94].mxu0  ;;  %v3962_v46 = vmax.f32 %v3944_v23, 0.0 }
 0x972   : > { %v4332_v4 = vadd.f32 %v4331_v20, %v4330_v6  ;;  %v4176_v28 = vadd.f32 %v7396_v62, %v6614_v44  ;;  %v4170_v45 = vpop.f32.mrb[95].mxu0  ;;  %v4335_v22 = vsel %vm1374_vm4, %v4090_v12, 0.0  ;;  %v3939_v6 = vadd.f32 %v6586_v21, %v10016_v51 }
 0x973   : > { %v4333_v32 = vsel %vm1374_vm4, %v4089_v52, 0.0  ;;  %v4171_v60 = vadd.f32 %v6614_v44, %v4170_v45  ;;  %4212 = vxpose.xlu0.b32.cont [4/8] (short) (narrow) %v4086_v30, 16  ;;  %v3919_v30 = vadd.f32 %v6586_v21, %v10008_v63  ;;  %v3954_v51 = vadd.f32 %v10018_v5, %v6586_v21  ;;  %v6633_v5 = vld [vmem:[%s10789_s12 + $0x10] sm:$0xff] }
 0x974   : > { %v4334_v27 = vadd.f32 %v4333_v32, %v4332_v4 }
 0x975   : > { %v7810_v9 = vpack.c.bf16 %v4176_v28, %v4171_v60  ;;  %v7399_v1 = vpop.f32.mrb[96].mxu0  ;;  %v3957_v33 = vmax.f32 %v3919_v30, 0.0  ;;  %v3949_v28 = vadd.f32 %v6586_v21, %v10020_v37  ;;  %v3964_v38 = vmax.f32 %v3954_v51, 0.0 }
 0x976   : > { %v4336_v26 = vadd.f32 %v4335_v22, %v4334_v27  ;;  %v4186_v8 = vadd.f32 %v7399_v1, %v6614_v44  ;;  %v4180_v53 = vpop.f32.mrb[97].mxu0 }
 0x977   : > { %v4181_v0 = vadd.f32 %v6614_v44, %v4180_v53  ;;  %7811 = vmatprep.subr.bf16.mxu0 %v7810_v9  ;;  %4213 = vxpose.xlu0.b32.cont [5/8] (short) (narrow) %v4087_v19, 16  ;;  %v3963_v60 = vmax.f32 %v3949_v28, 0.0  ;;  %v6634_v53 = vld [vmem:[%s10789_s12 + $0x18] sm:$0xff] }
 0x978   : > { %v4337_v48 = vrot.slane %v4336_v26, 4  ;;  %7813 = vmatpush3.bf16.msra.mxu0 %v7810_v9 }
 0x979   : > { %v7814_v56 = vpack.c.bf16 %v4186_v8, %v4181_v0  ;;  %v7402_v43 = vpop.f32.mrb[98].mxu0 }
 0x97a   : > { %v4338_v3 = vadd.f32 %v4337_v48, %v4336_v26  ;;  %v4196_v42 = vadd.f32 %v7402_v43, %v6614_v44  ;;  %v4190_v50 = vpop.f32.mrb[99].mxu0  ;;  %v7830_v43 = vpack.c.bf16 %v6634_v53, %v6633_v5 }
 0x97b   : > { %v4191_v31 = vadd.f32 %v6614_v44, %v4190_v50  ;;  %7815 = vmatprep.subr.bf16.mxu0 %v7814_v56  ;;  %4214 = vxpose.xlu0.b32.cont [6/8] (short) (narrow) %v4088_v15, 16  ;;  %v3958_v15 = vmax.f32 %v3924_v2, 0.0 }
 0x97c   : > { %v4339_v29 = vrot.slane %v4338_v3, 2  ;;  %7817 = vmatpush3.bf16.msra.mxu0 %v7814_v56 }
 0x97d   : > { %v7818_v18 = vpack.c.bf16 %v4196_v42, %v4191_v31  ;;  %v7405_v58 = vpop.f32.mrb[100].mxu0  ;;  %v4677_v42 = vld [vmem:[%s10791_s14 + $0x8] sm:$0xff] }
 0x97e   : > { %v4340_v10 = vadd.f32 %v4339_v29, %v4338_v3  ;;  %v4206_v61 = vadd.f32 %v7405_v58, %v6614_v44  ;;  %v4200_v41 = vpop.f32.mrb[101].mxu0  ;;  %v4676_v3 = vld [vmem:[%s10791_s14] sm:$0xff] }
 0x97f   : > { %v4201_v16 = vadd.f32 %v6614_v44, %v4200_v41  ;;  %7819 = vmatprep.subr.bf16.mxu0 %v7818_v18  ;;  %4215 = vxpose.xlu0.b32.cont [7/8] (short) (narrow) %v4089_v52, 16  ;;  %v3960_v44 = vmax.f32 %v3934_v35, 0.0  ;;  %v3961_v52 = vmax.f32 %v3939_v6, 0.0  ;;  %v7834_v50 = vpack.c.bf16 %v4677_v42, %v4676_v3 }
 0x980   : > { %v4341_v49 = vrot.slane %v4340_v10, 1  ;;  %7821 = vmatpush3.bf16.msra.mxu0 %v7818_v18 }
 0x981   : > { %v7822_v11 = vpack.c.bf16 %v4206_v61, %v4201_v16 }
 0x982   : > { %v4342_v19 = vadd.f32 %v4341_v49, %v4340_v10 }
 0x983   : > { %7823 = vmatprep.subr.bf16.mxu0 %v7822_v11  ;;  %4216 = vxpose.xlu0.b32.end [8/8] (short) (narrow) %v4090_v12, 16 }
 0x984   : > { %7825 = vmatpush3.bf16.msra.mxu0 %v7822_v11  ;;  %v4472_v63 = vmul.f32 %v4342_v19, %v3957_v33  ;;  %v4473_v13 = vmul.f32 %v4342_v19, %v3958_v15  ;;  %v4474_v36 = vmul.f32 %v4342_v19, %v3959_v54  ;;  %v4475_v12 = vmul.f32 %v4342_v19, %v3960_v44 }
 0x985   : > { %v4476_v4 = vmul.f32 %v4342_v19, %v3961_v52  ;;  %v4477_v32 = vmul.f32 %v4342_v19, %v3962_v46  ;;  %v4478_v22 = vmul.f32 %v4342_v19, %v3963_v60  ;;  %v4479_v1 = vmul.f32 %v4342_v19, %v3964_v38 }
 0x986   : > { %v4480_v14 = vsel %vm1374_vm4, %v4472_v63, 0.0  ;;  %v4483_v17 = vsel %vm1374_vm4, %v4473_v13, 0.0  ;;  %v4486_v20 = vsel %vm1374_vm4, %v4474_v36, 0.0  ;;  %v4489_v62 = vsel %vm1374_vm4, %v4475_v12, 0.0  ;;  %v4678_v63 = vld [vmem:[%s10791_s14 + $0x10] sm:$0xff] }
 0x987   : > { %4481 = vadd.xlane.f32.xlu1 %v4480_v14  ;;  %v4492_v45 = vsel %vm1374_vm4, %v4476_v4, 0.0  ;;  %v4495_v27 = vsel %vm1374_vm4, %v4477_v32, 0.0  ;;  %v4498_v9 = vsel %vm1374_vm4, %v4478_v22, 0.0  ;;  %v4501_v26 = vsel %vm1374_vm4, %v4479_v1, 0.0  ;;  %v4679_v14 = vld [vmem:[%s10791_s14 + $0x18] sm:$0xff] }
 0x98b   : > { %4484 = vadd.xlane.f32.xlu1 %v4483_v17 }
 0x98f   : > { %4487 = vadd.xlane.f32.xlu1 %v4486_v20 }
 0x993   : > { %4490 = vadd.xlane.f32.xlu1 %v4489_v62 }
 0x997   : > { %4493 = vadd.xlane.f32.xlu1 %v4492_v45 }
 0x99b   : > { %4496 = vadd.xlane.f32.xlu1 %v4495_v27 }
 0x99f   : > { %4499 = vadd.xlane.f32.xlu1 %v4498_v9 }
 0x9a3   : > { %4502 = vadd.xlane.f32.xlu1 %v4501_v26  ;;  %v6580_v26 = vld [vmem:[%s10790_s13] ss:$0 sm:$0xff] }
 0x9e7   : > { %v4225_v37 = vpop.trf.xlu0 }
 0x9e8   : > { %7422 = vmatprep.mubr.msk.f32.mxu0 %vm3406_vm6, %v4225_v37 }
 0x9eb   : > { %v4226_v8 = vpop.trf.xlu0 }
 0x9ec   : > { %7423 = vmatmul.mubr.msk.f32.vlgmr.msra.gmra.mrb[102].mxu0 %vm3406_vm6, %v4226_v8 }
 0x9ed   : > { %7429 = vmatprep.mubr.msk.f32.mxu0 %vm1374_vm4, %v3957_v33 }
 0xa14   : > { %v4482_v21 = vpop.xlane.xlu1 %4481 }
 0xa15   : > { %v4504_v10 = vadd.f32 1e-06, %v4482_v21 }
 0xa17   : > { %8117 = vrcp.f32 %v4504_v10 }
 0xa18   : > { %v4485_v31 = vpop.xlane.xlu1 %4484 }
 0xa19   : > { %v4505_v61 = vadd.f32 1e-06, %v4485_v31 }
 0xa1b   : > { %8119 = vrcp.f32 %v4505_v61 }
 0xa1c   : > { %v4488_v29 = vpop.xlane.xlu1 %4487 }
 0xa1d   : > { %v4506_v41 = vadd.f32 1e-06, %v4488_v29 }
 0xa1f   : > { %8121 = vrcp.f32 %v4506_v41 }
 0xa20   : > { %v4491_v18 = vpop.xlane.xlu1 %4490 }
 0xa21   : > { %v4507_v2 = vadd.f32 1e-06, %v4491_v18  ;;  %v8118_v13 = vpop.eup %8117 }
 0xa23   : > { %8123 = vrcp.f32 %v4507_v2 }
 0xa24   : > { %v4494_v58 = vpop.xlane.xlu1 %4493 }
 0xa25   : > { %v4508_v49 = vadd.f32 1e-06, %v4494_v58 }
 0xa27   : > { %8125 = vrcp.f32 %v4508_v49 }
 0xa28   : > { %v4497_v30 = vpop.xlane.xlu1 %4496 }
 0xa29   : > { %v4509_v11 = vadd.f32 1e-06, %v4497_v30 }
 0xa2b   : > { %8127 = vrcp.f32 %v4509_v11 }
 0xa2c   : > { %v4500_v16 = vpop.xlane.xlu1 %4499 }
 0xa2d   : > { %v4510_v19 = vadd.f32 1e-06, %v4500_v16 }
 0xa2f   : > { %8129 = vrcp.f32 %v4510_v19 }
 0xa30   : > { %v4503_v33 = vpop.xlane.xlu1 %4502 }
 0xabf   : > { %v7424_v0 = vpop.f32.mrb[102].mxu0 }
 0xac0   : > { %v4313_v48 = vpop.f32.mrb[103].mxu0 }
 0xac1   : > { %v7826_v56 = vpack.c.bf16 %v7424_v0, %v4313_v48 }
 0xac3   : > { %7827 = vmatprep.subr.bf16.mxu0 %v7826_v56 }
 0xac4   : > { %7829 = vmatpush3.bf16.msra.mxu0 %v7826_v56 }
 0xac5   : > { %7831 = vmatprep.subr.bf16.mxu0 %v7830_v43 }
 0xac7   : > { %7430 = vmatmul.mubr.msk.f32.vlgmr.msra.gmra.mrb[104].mxu0 %vm1374_vm4, %v3958_v15  ;;  %v4511_v15 = vadd.f32 1e-06, %v4503_v33 }
 0xac8   : > { %7432 = vmatprep.mubr.msk.f32.mxu0 %vm1374_vm4, %v3959_v54  ;;  %7833 = vmatpush3.bf16.msra.mxu0 %v7830_v43  ;;  %v8120_v54 = vpop.eup %8119 }
 0xac9   : > { %7835 = vmatprep.subr.bf16.mxu0 %v7834_v50  ;;  %8131 = vrcp.f32 %v4511_v15  ;;  %v8122_v20 = vpop.eup %8121 }
 0xaca   : > { %v8124_v23 = vpop.eup %8123 }
 0xacb   : > { %7433 = vmatmul.mubr.msk.f32.gmra.mrb[106].mxu0 %vm1374_vm4, %v3960_v44  ;;  %v7838_v44 = vpack.c.bf16 %v4679_v14, %v4678_v63  ;;  %v5888_v63 = vld [vmem:[%s10794_s17] sm:$0xff]  ;;  %v5889_v14 = vld [vmem:[%s10794_s17 + $0x8] sm:$0xff] }
 0xacc   : > { %7435 = vmatprep.mubr.msk.f32.mxu0 %vm1374_vm4, %v3961_v52 }
 0xacf   : > { %7436 = vmatmul.mubr.msk.f32.gmra.mrb[108].mxu0 %vm1374_vm4, %v3962_v46  ;;  %v8126_v46 = vpop.eup %8125 }
 0xad0   : > { %7438 = vmatprep.mubr.msk.f32.mxu0 %vm1374_vm4, %v3963_v60  ;;  %v8128_v45 = vpop.eup %8127 }
 0xad1   : > { %v8130_v27 = vpop.eup %8129 }
 0xad3   : > { %7439 = vmatmul.mubr.msk.f32.gmra.mrb[110].mxu0 %vm1374_vm4, %v3964_v38  ;;  %v8132_v38 = vpop.eup %8131 }
 0xb9a   : > { %v7431_v39 = vpop.f32.mrb[104].mxu0 }
 0xb9b   : > { %v4433_v35 = vpop.f32.mrb[105].mxu0  ;;  %v4521_v36 = vmul.f32 %v8120_v54, %v7431_v39  ;;  %v7858_v54 = vpack.c.bf16 %v5889_v14, %v5888_v63 }
 0xb9c   : > { %v4520_v17 = vmul.f32 %v8118_v13, %v4433_v35 }
 0xb9d   : > { %7859 = vmatprep.subr.bf16.mxu1 %v7858_v54 }
 0xb9e   : > { %v7434_v6 = vpop.f32.mrb[106].mxu0  ;;  %7445 = vmatprep.mubr.msk.f32.mxu0 %vm1374_vm4, %v4520_v17  ;;  %7861 = vmatpush3.bf16.msra.mxu1 %v7858_v54 }
 0xb9f   : > { %v4443_v12 = vpop.f32.mrb[107].mxu0  ;;  %7446 = vmatmul.mubr.msk.f32.vlgmr.msra.gmra.mrb[70].mxu0 %vm1374_vm4, %v4521_v36  ;;  %v4523_v62 = vmul.f32 %v8124_v23, %v7434_v6 }
 0xba0   : > { %v4522_v52 = vmul.f32 %v8122_v20, %v4443_v12  ;;  %7837 = vmatpush3.bf16.msra.mxu0 %v7834_v50 }
 0xba1   : > { %7839 = vmatprep.subr.bf16.mxu0 %v7838_v44 }
 0xba2   : > { %v7437_v4 = vpop.f32.mrb[108].mxu0  ;;  %7448 = vmatprep.mubr.msk.f32.mxu0 %vm1374_vm4, %v4522_v52 }
 0xba3   : > { %v4453_v28 = vpop.f32.mrb[109].mxu0  ;;  %7449 = vmatmul.mubr.msk.f32.gmra.mrb[72].mxu0 %vm1374_vm4, %v4523_v62  ;;  %v4525_v51 = vmul.f32 %v8128_v45, %v7437_v4 }
 0xba4   : > { %v4524_v32 = vmul.f32 %v8126_v46, %v4453_v28  ;;  %7841 = vmatpush3.bf16.msra.mxu0 %v7838_v44 }
 0xba6   : > { %v7440_v60 = vpop.f32.mrb[110].mxu0  ;;  %7451 = vmatprep.mubr.msk.f32.mxu0 %vm1374_vm4, %v4524_v32 }
 0xba7   : > { %v4463_v22 = vpop.f32.mrb[111].mxu0  ;;  %7452 = vmatmul.mubr.msk.f32.gmra.mrb[74].mxu0 %vm1374_vm4, %v4525_v51  ;;  %v4527_v1 = vmul.f32 %v8132_v38, %v7440_v60 }
 0xba8   : > { %v4526_v9 = vmul.f32 %v8130_v27, %v4463_v22 }
 0xbaa   : > { %7454 = vmatprep.mubr.msk.f32.mxu0 %vm1374_vm4, %v4526_v9 }
 0xbab   : > { %7455 = vmatmul.mubr.msk.f32.gmra.mrb[76].mxu0 %vm1374_vm4, %v4527_v1 }
 0xc72   : > { %v7447_v37 = vpop.f32.mrb[70].mxu0 }
 0xc73   : > { %v7898_v8 = vadd.f32 %v7447_v37, %v6580_v26  ;;  %v4621_v5 = vpop.f32.mrb[71].mxu0 }
 0xc74   : > { %v7899_v53 = vadd.f32 %v6580_v26, %v4621_v5 }
 0xc75   : > { %v10098_v56 = vadd.f32 %v7898_v8, %v9775_v57 }
 0xc76   : > { %v10095_v0 = vadd.f32 %v7899_v53, %v9773_v34  ;;  %v7450_v48 = vpop.f32.mrb[72].mxu0 }
 0xc77   : > { %v7900_v43 = vadd.f32 %v7450_v48, %v6580_v26  ;;  %v4631_v3 = vpop.f32.mrb[73].mxu0 }
 0xc78   : > { %v7901_v42 = vadd.f32 %v6580_v26, %v4631_v3  ;;  %7465 = vmatprep.mubr.msk.f32.mxu0 %vm2851_vm5, %v10095_v0 }
 0xc79   : > { %7466 = vmatmul.mubr.msk.f32.vlgmr.msra.gmra.mrb[112].mxu0 %vm2851_vm5, %v10098_v56  ;;  %v10108_v34 = vadd.f32 %v7900_v43, %v9789_v55 }
 0xc7a   : > { %v10105_v50 = vadd.f32 %v7901_v42, %v9787_v40  ;;  %v7453_v21 = vpop.f32.mrb[74].mxu0 }
 0xc7b   : > { %v7902_v31 = vadd.f32 %v7453_v21, %v6580_v26  ;;  %v4641_v29 = vpop.f32.mrb[75].mxu0 }
 0xc7c   : > { %v7903_v57 = vadd.f32 %v6580_v26, %v4641_v29  ;;  %7468 = vmatprep.mubr.msk.f32.mxu0 %vm2851_vm5, %v10105_v50 }
 0xc7d   : > { %7469 = vmatmul.mubr.msk.f32.gmra.mrb[114].mxu0 %vm2851_vm5, %v10108_v34  ;;  %v10118_v40 = vadd.f32 %v7902_v31, %v9797_v24  ;;  %v6643_v24 = vld [vmem:[%s10792_s15] ss:$0 sm:$0xff] }
 0xc7e   : > { %v10115_v18 = vadd.f32 %v7903_v57, %v9795_v59  ;;  %v7456_v58 = vpop.f32.mrb[76].mxu0  ;;  %v4888_v59 = vld [vmem:[%s10841_s8] sm:$0xff] }
 0xc7f   : > { %v7904_v30 = vadd.f32 %v7456_v58, %v6580_v26  ;;  %v4651_v10 = vpop.f32.mrb[77].mxu0 }
 0xc80   : > { %v7905_v55 = vadd.f32 %v6580_v26, %v4651_v10  ;;  %7471 = vmatprep.mubr.msk.f32.mxu0 %vm2851_vm5, %v10115_v18 }
 0xc81   : > { %7472 = vmatmul.mubr.msk.f32.gmra.mrb[116].mxu0 %vm2851_vm5, %v10118_v40  ;;  %v10128_v41 = vadd.f32 %v7904_v30, %v9805_v47 }
 0xc82   : > { %v10125_v61 = vadd.f32 %v7905_v55, %v9803_v25 }
 0xc84   : > { %7474 = vmatprep.mubr.msk.f32.mxu0 %vm2851_vm5, %v10125_v61 }
 0xc85   : > { %7475 = vmatmul.mubr.msk.f32.gmra.mrb[118].mxu0 %vm2851_vm5, %v10128_v41 }
 0xc86   : > { %7493 = vmatprep.mubr.msk.f32.mxu0 %vm3406_vm6, %v4888_v59 }
 0xd4c   : > { %v7467_v25 = vpop.f32.mrb[112].mxu0 }
 0xd4d   : > { %v10141_v16 = vadd.f32 %v7467_v25, %v6643_v24  ;;  %v4777_v47 = vpop.f32.mrb[113].mxu0 }
 0xd4e   : > { %v10143_v2 = vadd.f32 %v6643_v24, %v4777_v47 }
 0xd4f   : > { %v4817_v49 = vmul.f32 %v10141_v16, %v10141_v16 }
 0xd50   : > { %v4816_v11 = vmul.f32 %v10143_v2, %v10143_v2  ;;  %v7470_v33 = vpop.f32.mrb[114].mxu0 }
 0xd51   : > { %v4825_v19 = vmul.f32 %v4817_v49, %v10141_v16  ;;  %v10150_v15 = vadd.f32 %v7470_v33, %v6643_v24  ;;  %v4787_v39 = vpop.f32.mrb[115].mxu0 }
 0xd52   : > { %v4824_v13 = vmul.f32 %v4816_v11, %v10143_v2  ;;  %v10159_v35 = vadd.f32 %v6643_v24, %v4787_v39 }
 0xd53   : > { %v4833_v17 = vmul.f32 0.044715, %v4825_v19  ;;  %v4819_v36 = vmul.f32 %v10150_v15, %v10150_v15 }
 0xd54   : > { %v4832_v44 = vmul.f32 0.044715, %v4824_v13  ;;  %v4818_v6 = vmul.f32 %v10159_v35, %v10159_v35  ;;  %v7473_v20 = vpop.f32.mrb[116].mxu0 }
 0xd55   : > { %v4841_v12 = vadd.f32 %v4833_v17, %v10141_v16  ;;  %v4827_v23 = vmul.f32 %v4819_v36, %v10150_v15  ;;  %v10167_v52 = vadd.f32 %v7473_v20, %v6643_v24  ;;  %v4797_v62 = vpop.f32.mrb[117].mxu0 }
 0xd56   : > { %v4840_v4 = vadd.f32 %v4832_v44, %v10143_v2  ;;  %v4826_v46 = vmul.f32 %v4818_v6, %v10159_v35  ;;  %v10171_v28 = vadd.f32 %v6643_v24, %v4797_v62 }
 0xd57   : > { %v4849_v45 = vmul.f32 0.7978846, %v4841_v12  ;;  %v4835_v32 = vmul.f32 0.044715, %v4827_v23  ;;  %v4821_v51 = vmul.f32 %v10167_v52, %v10167_v52 }
 0xd58   : > { %v4848_v60 = vmul.f32 0.7978846, %v4840_v4  ;;  %v4834_v27 = vmul.f32 0.044715, %v4826_v46  ;;  %v4820_v22 = vmul.f32 %v10171_v28, %v10171_v28  ;;  %v7476_v38 = vpop.f32.mrb[118].mxu0 }
 0xd59   : > { %8133 = vtanh.f32 %v4849_v45  ;;  %v4843_v9 = vadd.f32 %v4835_v32, %v10150_v15  ;;  %v4829_v1 = vmul.f32 %v4821_v51, %v10167_v52  ;;  %v10179_v26 = vadd.f32 %v7476_v38, %v6643_v24  ;;  %v4807_v37 = vpop.f32.mrb[119].mxu0 }
 0xd5a   : > { %8135 = vtanh.f32 %v4848_v60  ;;  %v4842_v8 = vadd.f32 %v4834_v27, %v10159_v35  ;;  %v4828_v5 = vmul.f32 %v4820_v22, %v10171_v28  ;;  %v10183_v53 = vadd.f32 %v6643_v24, %v4807_v37 }
 0xd5b   : > { %v4851_v48 = vmul.f32 0.7978846, %v4843_v9  ;;  %v4837_v43 = vmul.f32 0.044715, %v4829_v1  ;;  %v4823_v3 = vmul.f32 %v10179_v26, %v10179_v26 }
 0xd5c   : > { %v4850_v42 = vmul.f32 0.7978846, %v4842_v8  ;;  %v4836_v21 = vmul.f32 0.044715, %v4828_v5  ;;  %v4822_v31 = vmul.f32 %v10183_v53, %v10183_v53 }
 0xd5d   : > { %8137 = vtanh.f32 %v4851_v48  ;;  %v4845_v29 = vadd.f32 %v4837_v43, %v10167_v52  ;;  %v4831_v57 = vmul.f32 %v4823_v3, %v10179_v26 }
 0xd5e   : > { %8139 = vtanh.f32 %v4850_v42  ;;  %v4844_v58 = vadd.f32 %v4836_v21, %v10171_v28  ;;  %v4830_v30 = vmul.f32 %v4822_v31, %v10183_v53  ;;  %v4893_v42 = vld [vmem:[%s10841_s8 + $0x28] sm:$0xff]  ;;  %v4894_v21 = vld [vmem:[%s10841_s8 + $0x30] sm:$0xff]  ;;  %v4895_v31 = vld [vmem:[%s10841_s8 + $0x38] sm:$0xff] }
 0xd5f   : > { %v4853_v10 = vmul.f32 0.7978846, %v4845_v29  ;;  %v4839_v55 = vmul.f32 0.044715, %v4831_v57  ;;  %v4896_v29 = vld [vmem:[%s10841_s8 + $0x40] sm:$0xff]  ;;  %v5890_v57 = vld [vmem:[%s10794_s17 + $0x10] sm:$0xff] }
 0xd60   : > { %v4852_v59 = vmul.f32 0.7978846, %v4844_v58  ;;  %v4838_v24 = vmul.f32 0.044715, %v4830_v30  ;;  %v5891_v58 = vld [vmem:[%s10794_s17 + $0x18] sm:$0xff]  ;;  %v4897_v30 = vld [vmem:[%s10841_s8 + $0x48] sm:$0xff] }
 0xd61   : > { %8141 = vtanh.f32 %v4853_v10  ;;  %v4847_v25 = vadd.f32 %v4839_v55, %v10179_v26  ;;  %v7862_v10 = vpack.c.bf16 %v5891_v58, %v5890_v57  ;;  %v4898_v55 = vld [vmem:[%s10841_s8 + $0x50] sm:$0xff]  ;;  %v4947_v58 = vld [vmem:[%s10841_s8 + $0x1d8] sm:$0xff] }
 0xd62   : > { %8143 = vtanh.f32 %v4852_v59  ;;  %v4846_v47 = vadd.f32 %v4838_v24, %v10183_v53  ;;  %v4899_v59 = vld [vmem:[%s10841_s8 + $0x58] sm:$0xff]  ;;  %v4900_v24 = vld [vmem:[%s10841_s8 + $0x60] sm:$0xff]  ;;  %v4946_v57 = vld [vmem:[%s10841_s8 + $0x1d0] sm:$0xff] }
 0xd63   : > { %v8134_v49 = vpop.eup %8133  ;;  %v4855_v11 = vmul.f32 0.7978846, %v4847_v25  ;;  %7863 = vmatprep.subr.bf16.mxu1 %v7862_v10  ;;  %v4901_v25 = vld [vmem:[%s10841_s8 + $0x68] sm:$0xff] }
 0xd64   : > { %v8136_v33 = vpop.eup %8135  ;;  %v4854_v19 = vmul.f32 0.7978846, %v4846_v47  ;;  %v4865_v39 = vadd.f32 1.0, %v8134_v49  ;;  %7865 = vmatpush3.bf16.msra.mxu1 %v7862_v10  ;;  %v4902_v47 = vld [vmem:[%s10841_s8 + $0x70] sm:$0xff]  ;;  %v4903_v49 = vld [vmem:[%s10841_s8 + $0x78] sm:$0xff]  ;;  %v4949_v10 = vld [vmem:[%s10841_s8 + $0x1e8] sm:$0xff] }
 0xd65   : > { %8145 = vtanh.f32 %v4855_v11  ;;  %v4864_v63 = vadd.f32 1.0, %v8136_v33  ;;  %v4904_v11 = vld [vmem:[%s10841_s8 + $0x80] sm:$0xff]  ;;  %v4905_v33 = vld [vmem:[%s10841_s8 + $0x88] sm:$0xff] }
 0xd66   : > { %8147 = vtanh.f32 %v4854_v19  ;;  %v4873_v14 = vmul.f32 0.5, %v4865_v39  ;;  %v4906_v19 = vld [vmem:[%s10841_s8 + $0x90] sm:$0xff]  ;;  %v4907_v39 = vld [vmem:[%s10841_s8 + $0x98] sm:$0xff] }
 0xd67   : > { %v8138_v13 = vpop.eup %8137  ;;  %v4872_v54 = vmul.f32 0.5, %v4864_v63  ;;  %v4908_v63 = vld [vmem:[%s10841_s8 + $0xa0] sm:$0xff] }
 0xd68   : > { %v8140_v17 = vpop.eup %8139  ;;  %v4881_v36 = vmul.f32 %v4873_v14, %v10141_v16  ;;  %v4867_v44 = vadd.f32 1.0, %v8138_v13  ;;  %v4909_v14 = vld [vmem:[%s10841_s8 + $0xa8] sm:$0xff]  ;;  %v4910_v13 = vld [vmem:[%s10841_s8 + $0xb0] sm:$0xff] }
 0xd69   : > { %v4880_v6 = vmul.f32 %v4872_v54, %v10143_v2  ;;  %v4866_v20 = vadd.f32 1.0, %v8140_v17  ;;  %v4911_v54 = vld [vmem:[%s10841_s8 + $0xb8] sm:$0xff]  ;;  %v4912_v17 = vld [vmem:[%s10841_s8 + $0xc0] sm:$0xff] }
 0xd6a   : > { %v4875_v12 = vmul.f32 0.5, %v4867_v44  ;;  %v4914_v44 = vld [vmem:[%s10841_s8 + $0xd0] sm:$0xff] }
 0xd6b   : > { %v8142_v23 = vpop.eup %8141  ;;  %v7842_v62 = vpack.c.bf16 %v4881_v36, %v4880_v6  ;;  %v4874_v4 = vmul.f32 0.5, %v4866_v20  ;;  %v4913_v36 = vld [vmem:[%s10841_s8 + $0xc8] sm:$0xff]  ;;  %v4915_v6 = vld [vmem:[%s10841_s8 + $0xd8] sm:$0xff]  ;;  %v4916_v20 = vld [vmem:[%s10841_s8 + $0xe0] sm:$0xff] }
 0xd6c   : > { %v8144_v46 = vpop.eup %8143  ;;  %v4883_v45 = vmul.f32 %v4875_v12, %v10150_v15  ;;  %v4869_v32 = vadd.f32 1.0, %v8142_v23  ;;  %v4917_v12 = vld [vmem:[%s10841_s8 + $0xe8] sm:$0xff]  ;;  %v4918_v23 = vld [vmem:[%s10841_s8 + $0xf0] sm:$0xff] }
 0xd6d   : > { %7843 = vmatprep.subr.bf16.mxu0 %v7842_v62  ;;  %v4882_v51 = vmul.f32 %v4874_v4, %v10159_v35  ;;  %v4868_v60 = vadd.f32 1.0, %v8144_v46  ;;  %v4920_v4 = vld [vmem:[%s10841_s8 + $0x100] sm:$0xff]  ;;  %v4921_v46 = vld [vmem:[%s10841_s8 + $0x108] sm:$0xff] }
 0xd6e   : > { %7845 = vmatpush3.bf16.msra.mxu0 %v7842_v62  ;;  %v4877_v27 = vmul.f32 0.5, %v4869_v32  ;;  %v4919_v62 = vld [vmem:[%s10841_s8 + $0xf8] sm:$0xff] }
 0xd6f   : > { %v8146_v22 = vpop.eup %8145  ;;  %v7846_v16 = vpack.c.bf16 %v4883_v45, %v4882_v51  ;;  %v4876_v38 = vmul.f32 0.5, %v4868_v60  ;;  %v4922_v45 = vld [vmem:[%s10841_s8 + $0x110] sm:$0xff]  ;;  %v4923_v32 = vld [vmem:[%s10841_s8 + $0x118] sm:$0xff]  ;;  %v4924_v51 = vld [vmem:[%s10841_s8 + $0x120] sm:$0xff] }
 0xd70   : > { %v8148_v9 = vpop.eup %8147  ;;  %v4885_v2 = vmul.f32 %v4877_v27, %v10167_v52  ;;  %v4871_v1 = vadd.f32 1.0, %v8146_v22  ;;  %v4889_v52 = vld [vmem:[%s10841_s8 + $0x8] sm:$0xff]  ;;  %v4926_v27 = vld [vmem:[%s10841_s8 + $0x130] sm:$0xff]  ;;  %v4927_v22 = vld [vmem:[%s10841_s8 + $0x138] sm:$0xff] }
 0xd71   : > { %7847 = vmatprep.subr.bf16.mxu0 %v7846_v16  ;;  %v4884_v37 = vmul.f32 %v4876_v38, %v10171_v28  ;;  %v4870_v8 = vadd.f32 1.0, %v8148_v9  ;;  %v4890_v28 = vld [vmem:[%s10841_s8 + $0x10] sm:$0xff]  ;;  %v4925_v60 = vld [vmem:[%s10841_s8 + $0x128] sm:$0xff] }
 0xd72   : > { %7849 = vmatpush3.bf16.msra.mxu0 %v7846_v16  ;;  %v4879_v15 = vmul.f32 0.5, %v4871_v1  ;;  %v4928_v16 = vld [vmem:[%s10841_s8 + $0x140] sm:$0xff]  ;;  %v4929_v38 = vld [vmem:[%s10841_s8 + $0x148] sm:$0xff]  ;;  %v4930_v9 = vld [vmem:[%s10841_s8 + $0x150] sm:$0xff] }
 0xd73   : > { %v7850_v5 = vpack.c.bf16 %v4885_v2, %v4884_v37  ;;  %v4878_v48 = vmul.f32 0.5, %v4870_v8  ;;  %v4931_v2 = vld [vmem:[%s10841_s8 + $0x158] sm:$0xff]  ;;  %v4932_v1 = vld [vmem:[%s10841_s8 + $0x160] sm:$0xff]  ;;  %v4933_v37 = vld [vmem:[%s10841_s8 + $0x168] sm:$0xff] }
 0xd74   : > { %v4887_v35 = vmul.f32 %v4879_v15, %v10179_v26  ;;  %v4891_v26 = vld [vmem:[%s10841_s8 + $0x18] sm:$0xff]  ;;  %v4934_v8 = vld [vmem:[%s10841_s8 + $0x170] sm:$0xff] }
 0xd75   : > { %7851 = vmatprep.subr.bf16.mxu0 %v7850_v5  ;;  %v4886_v43 = vmul.f32 %v4878_v48, %v10183_v53  ;;  %v4892_v53 = vld [vmem:[%s10841_s8 + $0x20] sm:$0xff]  ;;  %v4935_v15 = vld [vmem:[%s10841_s8 + $0x178] sm:$0xff]  ;;  %v4937_v48 = vld [vmem:[%s10841_s8 + $0x188] sm:$0xff] }
 0xd76   : > { %7853 = vmatpush3.bf16.msra.mxu0 %v7850_v5  ;;  %v4936_v5 = vld [vmem:[%s10841_s8 + $0x180] sm:$0xff] }
 0xd77   : > { %v7854_v3 = vpack.c.bf16 %v4887_v35, %v4886_v43  ;;  %v4938_v35 = vld [vmem:[%s10841_s8 + $0x190] sm:$0xff]  ;;  %v4939_v43 = vld [vmem:[%s10841_s8 + $0x198] sm:$0xff] }
 0xd79   : > { %7855 = vmatprep.subr.bf16.mxu0 %v7854_v3 }
 0xd7a   : > { %7857 = vmatpush3.bf16.msra.mxu0 %v7854_v3  ;;  %v4940_v3 = vld [vmem:[%s10841_s8 + $0x1a0] sm:$0xff] }
 0xd7d   : > { %7494 = vmatmul.mubr.msk.f32.vlgmr.msra.gmra.mrb[120].mxu0 %vm3406_vm6, %v4889_v52  ;;  %v4941_v52 = vld [vmem:[%s10841_s8 + $0x1a8] sm:$0xff] }
 0xd7e   : > { %7496 = vmatprep.mubr.msk.f32.mxu0 %vm3406_vm6, %v4890_v28  ;;  %v4942_v28 = vld [vmem:[%s10841_s8 + $0x1b0] sm:$0xff] }
 0xd81   : > { %7497 = vmatmul.mubr.msk.f32.gmra.mrb[122].mxu0 %vm3406_vm6, %v4891_v26  ;;  %v5892_v26 = vld [vmem:[%s10794_s17 + $0x20] sm:$0xff] }
 0xd82   : > { %7499 = vmatprep.mubr.msk.f32.mxu0 %vm3406_vm6, %v4892_v53  ;;  %v5893_v53 = vld [vmem:[%s10794_s17 + $0x28] sm:$0xff] }
 0xd85   : > { %7500 = vmatmul.mubr.msk.f32.gmra.mrb[124].mxu0 %vm3406_vm6, %v4893_v42  ;;  %v7866_v42 = vpack.c.bf16 %v5893_v53, %v5892_v26 }
 0xd86   : > { %7502 = vmatprep.mubr.msk.f32.mxu0 %vm3406_vm6, %v4894_v21  ;;  %v4943_v21 = vld [vmem:[%s10841_s8 + $0x1b8] sm:$0xff] }
 0xd87   : > { %7867 = vmatprep.subr.bf16.mxu1 %v7866_v42 }
 0xd88   : > { %7869 = vmatpush3.bf16.msra.mxu1 %v7866_v42 }
 0xd89   : > { %7503 = vmatmul.mubr.msk.f32.gmra.mrb[126].mxu0 %vm3406_vm6, %v4895_v31  ;;  %v4944_v31 = vld [vmem:[%s10841_s8 + $0x1c0] sm:$0xff] }
 0xd8a   : > { %7505 = vmatprep.mubr.msk.f32.mxu0 %vm3406_vm6, %v4896_v29  ;;  %v4945_v29 = vld [vmem:[%s10841_s8 + $0x1c8] sm:$0xff] }
 0xd8d   : > { %7506 = vmatmul.mubr.msk.f32.gmra.mrb[128].mxu0 %vm3406_vm6, %v4897_v30  ;;  %v4948_v30 = vld [vmem:[%s10841_s8 + $0x1e0] sm:$0xff] }
 0xd8e   : > { %7508 = vmatprep.mubr.msk.f32.mxu0 %vm3406_vm6, %v4898_v55  ;;  %v4950_v55 = vld [vmem:[%s10841_s8 + $0x1f0] sm:$0xff] }
 0xd91   : > { %7509 = vmatmul.mubr.msk.f32.gmra.mrb[130].mxu0 %vm3406_vm6, %v4899_v59  ;;  %v4951_v59 = vld [vmem:[%s10841_s8 + $0x1f8] sm:$0xff] }
 0xd92   : > { %7511 = vmatprep.mubr.msk.f32.mxu0 %vm3406_vm6, %v4900_v24  ;;  %v4952_v24 = vld [vmem:[%s10841_s8 + $0x200] sm:$0xff] }
 0xd95   : > { %7512 = vmatmul.mubr.msk.f32.gmra.mrb[132].mxu0 %vm3406_vm6, %v4901_v25  ;;  %v4953_v25 = vld [vmem:[%s10841_s8 + $0x208] sm:$0xff] }
 0xd96   : > { %7514 = vmatprep.mubr.msk.f32.mxu0 %vm3406_vm6, %v4902_v47  ;;  %v4954_v47 = vld [vmem:[%s10841_s8 + $0x210] sm:$0xff] }
 0xd99   : > { %7515 = vmatmul.mubr.msk.f32.gmra.mrb[134].mxu0 %vm3406_vm6, %v4903_v49  ;;  %v4955_v49 = vld [vmem:[%s10841_s8 + $0x218] sm:$0xff] }
 0xd9a   : > { %7517 = vmatprep.mubr.msk.f32.mxu0 %vm3406_vm6, %v4904_v11  ;;  %v4956_v11 = vld [vmem:[%s10841_s8 + $0x220] sm:$0xff] }
 0xd9d   : > { %7518 = vmatmul.mubr.msk.f32.gmra.mrb[136].mxu0 %vm3406_vm6, %v4905_v33  ;;  %v4957_v33 = vld [vmem:[%s10841_s8 + $0x228] sm:$0xff] }
 0xd9e   : > { %7520 = vmatprep.mubr.msk.f32.mxu0 %vm3406_vm6, %v4906_v19  ;;  %v4958_v19 = vld [vmem:[%s10841_s8 + $0x230] sm:$0xff] }
 0xda1   : > { %7521 = vmatmul.mubr.msk.f32.gmra.mrb[138].mxu0 %vm3406_vm6, %v4907_v39  ;;  %v4959_v39 = vld [vmem:[%s10841_s8 + $0x238] sm:$0xff]  ;;  %s8187_s8 = scalar_lea.vmem %s8186_s24, 32 }
 0xda2   : > { %7523 = vmatprep.mubr.msk.f32.mxu0 %vm3406_vm6, %v4908_v63  ;;  %v5894_v63 = vld [vmem:[%s10794_s17 + $0x30] sm:$0xff]  ;;  %p8189_p1 = scmp.lt.s32.totalorder %s8187_s8, %s8181_s6 }
 0xda4   : > { %p8190_p2 = por %p8189_p1, %p8188_p0 }
 0xda5   : > { %7524 = vmatmul.mubr.msk.f32.gmra.mrb[140].mxu0 %vm3406_vm6, %v4909_v14  ;;  %v5895_v14 = vld [vmem:[%s10794_s17 + $0x38] sm:$0xff] }
 0xda6   : > { %7526 = vmatprep.mubr.msk.f32.mxu0 %vm3406_vm6, %v4910_v13  ;;  %v7870_v13 = vpack.c.bf16 %v5895_v14, %v5894_v63  ;;  %p8191_p3 = pnand %p8190_p2, %p8184_p13 }
 0xda8   : > { %7871 = vmatprep.subr.bf16.mxu1 %v7870_v13 }
 0xda9   : > { %7527 = vmatmul.mubr.msk.f32.gmra.mrb[142].mxu0 %vm3406_vm6, %v4911_v54  ;;  %7873 = vmatpush3.bf16.msra.mxu1 %v7870_v13 }
 0xdaa   : > { %7529 = vmatprep.mubr.msk.f32.mxu0 %vm3406_vm6, %v4912_v17 }
 0xdad   : > { %7530 = vmatmul.mubr.msk.f32.gmra.mrb[144].mxu0 %vm3406_vm6, %v4913_v36 }
 0xdae   : > { %7532 = vmatprep.mubr.msk.f32.mxu0 %vm3406_vm6, %v4914_v44 }
 0xdb1   : > { %7533 = vmatmul.mubr.msk.f32.gmra.mrb[146].mxu0 %vm3406_vm6, %v4915_v6 }
 0xdb2   : > { %7535 = vmatprep.mubr.msk.f32.mxu0 %vm3406_vm6, %v4916_v20 }
 0xdb5   : > { %7536 = vmatmul.mubr.msk.f32.gmra.mrb[148].mxu0 %vm3406_vm6, %v4917_v12 }
 0xdb6   : > { %7538 = vmatprep.mubr.msk.f32.mxu0 %vm3406_vm6, %v4918_v23 }
 0xdb9   : > { %7539 = vmatmul.mubr.msk.f32.gmra.mrb[150].mxu0 %vm3406_vm6, %v4919_v62  ;;  %v6724_v62 = vld [vmem:[%s10793_s16] ss:$0 sm:$0xff] }
 0xdba   : > { %7541 = vmatprep.mubr.msk.f32.mxu0 %vm3406_vm6, %v4920_v4  ;;  %v6726_v4 = vld [vmem:[%s10793_s16 + $0x1] ss:$0 sm:$0xff] }
 0xdbd   : > { %7542 = vmatmul.mubr.msk.f32.gmra.mrb[152].mxu0 %vm3406_vm6, %v4921_v46 }
 0xdbe   : > { %7544 = vmatprep.mubr.msk.f32.mxu0 %vm3406_vm6, %v4922_v45 }
 0xdc1   : > { %7545 = vmatmul.mubr.msk.f32.gmra.mrb[154].mxu0 %vm3406_vm6, %v4923_v32 }
 0xdc2   : > { %7547 = vmatprep.mubr.msk.f32.mxu0 %vm3406_vm6, %v4924_v51 }
 0xdc5   : > { %7548 = vmatmul.mubr.msk.f32.gmra.mrb[156].mxu0 %vm3406_vm6, %v4925_v60 }
 0xdc6   : > { %7550 = vmatprep.mubr.msk.f32.mxu0 %vm3406_vm6, %v4926_v27 }
 0xdc9   : > { %7551 = vmatmul.mubr.msk.f32.gmra.mrb[158].mxu0 %vm3406_vm6, %v4927_v22 }
 0xdca   : > { %7553 = vmatprep.mubr.msk.f32.mxu0 %vm3406_vm6, %v4928_v16 }
 0xdcd   : > { %7554 = vmatmul.mubr.msk.f32.gmra.mrb[160].mxu0 %vm3406_vm6, %v4929_v38 }
 0xdce   : > { %7556 = vmatprep.mubr.msk.f32.mxu0 %vm3406_vm6, %v4930_v9 }
 0xdd1   : > { %7557 = vmatmul.mubr.msk.f32.gmra.mrb[162].mxu0 %vm3406_vm6, %v4931_v2 }
 0xdd2   : > { %7559 = vmatprep.mubr.msk.f32.mxu0 %vm3406_vm6, %v4932_v1 }
 0xdd5   : > { %7560 = vmatmul.mubr.msk.f32.gmra.mrb[164].mxu0 %vm3406_vm6, %v4933_v37 }
 0xdd6   : > { %7562 = vmatprep.mubr.msk.f32.mxu0 %vm3406_vm6, %v4934_v8 }
 0xdd9   : > { %7563 = vmatmul.mubr.msk.f32.gmra.mrb[166].mxu0 %vm3406_vm6, %v4935_v15 }
 0xdda   : > { %7565 = vmatprep.mubr.msk.f32.mxu0 %vm3406_vm6, %v4936_v5 }
 0xddd   : > { %7566 = vmatmul.mubr.msk.f32.gmra.mrb[168].mxu0 %vm3406_vm6, %v4937_v48 }
 0xdde   : > { %7568 = vmatprep.mubr.msk.f32.mxu0 %vm3406_vm6, %v4938_v35 }
 0xde1   : > { %7569 = vmatmul.mubr.msk.f32.gmra.mrb[170].mxu0 %vm3406_vm6, %v4939_v43 }
 0xde2   : > { %7571 = vmatprep.mubr.msk.f32.mxu0 %vm3406_vm6, %v4940_v3 }
 0xde5   : > { %7572 = vmatmul.mubr.msk.f32.gmra.mrb[172].mxu0 %vm3406_vm6, %v4941_v52 }
 0xde6   : > { %7574 = vmatprep.mubr.msk.f32.mxu0 %vm3406_vm6, %v4942_v28 }
 0xde9   : > { %7575 = vmatmul.mubr.msk.f32.gmra.mrb[174].mxu0 %vm3406_vm6, %v4943_v21 }
 0xdea   : > { %7577 = vmatprep.mubr.msk.f32.mxu0 %vm3406_vm6, %v4944_v31 }
 0xded   : > { %7578 = vmatmul.mubr.msk.f32.gmra.mrb[176].mxu0 %vm3406_vm6, %v4945_v29 }
 0xdee   : > { %7580 = vmatprep.mubr.msk.f32.mxu0 %vm3406_vm6, %v4946_v57 }
 0xdf1   : > { %7581 = vmatmul.mubr.msk.f32.gmra.mrb[178].mxu0 %vm3406_vm6, %v4947_v58 }
 0xdf2   : > { %7583 = vmatprep.mubr.msk.f32.mxu0 %vm3406_vm6, %v4948_v30  ;;  %v6728_v30 = vld [vmem:[%s10793_s16 + $0x2] ss:$0 sm:$0xff] }
 0xdf5   : > { %7584 = vmatmul.mubr.msk.f32.gmra.mrb[180].mxu0 %vm3406_vm6, %v4949_v10 }
 0xdf6   : > { %7586 = vmatprep.mubr.msk.f32.mxu0 %vm3406_vm6, %v4950_v55 }
 0xdf9   : > { %7587 = vmatmul.mubr.msk.f32.gmra.mrb[182].mxu0 %vm3406_vm6, %v4951_v59 }
 0xdfa   : > { %7589 = vmatprep.mubr.msk.f32.mxu0 %vm3406_vm6, %v4952_v24 }
 0xdfd   : > { %7590 = vmatmul.mubr.msk.f32.gmra.mrb[184].mxu0 %vm3406_vm6, %v4953_v25 }
 0xdfe   : > { %7592 = vmatprep.mubr.msk.f32.mxu0 %vm3406_vm6, %v4954_v47 }
 0xe01   : > { %7593 = vmatmul.mubr.msk.f32.gmra.mrb[186].mxu0 %vm3406_vm6, %v4955_v49 }
 0xe02   : > { %7595 = vmatprep.mubr.msk.f32.mxu0 %vm3406_vm6, %v4956_v11 }
 0xe05   : > { %7596 = vmatmul.mubr.msk.f32.gmra.mrb[188].mxu0 %vm3406_vm6, %v4957_v33 }
 0xe06   : > { %7598 = vmatprep.mubr.msk.f32.mxu0 %vm3406_vm6, %v4958_v19 }
 0xe09   : > { %7599 = vmatmul.mubr.msk.f32.gmra.mrb[190].mxu0 %vm3406_vm6, %v4959_v39 }
 0xe50   : > { %v7495_v54 = vpop.f32.mrb[120].mxu0 }
 0xe51   : > { %v5242_v17 = vpop.f32.mrb[121].mxu0  ;;  %v5609_v45 = vmul.f32 %v7495_v54, %v6724_v62 }
 0xe52   : > { %v5608_v60 = vmul.f32 %v6724_v62, %v5242_v17 }
 0xe54   : > { %v7498_v36 = vpop.f32.mrb[122].mxu0 }
 0xe55   : > { %v5252_v44 = vpop.f32.mrb[123].mxu0  ;;  %v5611_v9 = vmul.f32 %v7498_v36, %v6724_v62 }
 0xe56   : > { %v5610_v37 = vmul.f32 %v6724_v62, %v5252_v44 }
 0xe58   : > { %v7501_v6 = vpop.f32.mrb[124].mxu0 }
 0xe59   : > { %v5262_v20 = vpop.f32.mrb[125].mxu0  ;;  %v5613_v35 = vmul.f32 %v7501_v6, %v6724_v62 }
 0xe5a   : > { %v5612_v52 = vmul.f32 %v6724_v62, %v5262_v20 }
 0xe5c   : > { %v7504_v12 = vpop.f32.mrb[126].mxu0 }
 0xe5d   : > { %v5272_v23 = vpop.f32.mrb[127].mxu0  ;;  %v5615_v21 = vmul.f32 %v7504_v12, %v6724_v62 }
 0xe5e   : > { %v5614_v57 = vmul.f32 %v6724_v62, %v5272_v23 }
 0xe60   : > { %v7507_v46 = vpop.f32.mrb[128].mxu0 }
 0xe61   : > { %v5633_v32 = vmul.f32 %v7507_v46, %v6726_v4  ;;  %v5282_v51 = vpop.f32.mrb[129].mxu0  ;;  %v6730_v46 = vld [vmem:[%s10793_s16 + $0x3] ss:$0 sm:$0xff] }
 0xe62   : > { %v5632_v27 = vmul.f32 %v6726_v4, %v5282_v51 }
 0xe63   : > { %v5641_v22 = vadd.f32 %v5633_v32, %v5609_v45  ;;  %v6040_v45 = vld [vmem:[%s10796_s19] sm:$0xff]  ;;  %v6041_v32 = vld [vmem:[%s10796_s19 + $0x8] sm:$0xff] }
 0xe64   : > { %v5640_v16 = vadd.f32 %v5632_v27, %v5608_v60  ;;  %v7510_v38 = vpop.f32.mrb[130].mxu0  ;;  %v10523_v60 = vpack.c.bf16 %v6041_v32, %v6040_v45 }
 0xe65   : > { %v5635_v2 = vmul.f32 %v7510_v38, %v6726_v4  ;;  %v5292_v1 = vpop.f32.mrb[131].mxu0 }
 0xe66   : > { %v5634_v8 = vmul.f32 %v6726_v4, %v5292_v1  ;;  %7875 = vmatprep.subr.bf16.mxu1 %v10523_v60 }
 0xe67   : > { %v5643_v15 = vadd.f32 %v5635_v2, %v5611_v9 }
 0xe68   : > { %v5642_v5 = vadd.f32 %v5634_v8, %v5610_v37  ;;  %v7513_v48 = vpop.f32.mrb[132].mxu0 }
 0xe69   : > { %v5637_v43 = vmul.f32 %v7513_v48, %v6726_v4  ;;  %v5302_v3 = vpop.f32.mrb[133].mxu0 }
 0xe6a   : > { %v5636_v28 = vmul.f32 %v6726_v4, %v5302_v3 }
 0xe6b   : > { %v5645_v26 = vadd.f32 %v5637_v43, %v5613_v35 }
 0xe6c   : > { %v5644_v53 = vadd.f32 %v5636_v28, %v5612_v52  ;;  %v7516_v42 = vpop.f32.mrb[134].mxu0 }
 0xe6d   : > { %v5639_v31 = vmul.f32 %v7516_v42, %v6726_v4  ;;  %v5312_v29 = vpop.f32.mrb[135].mxu0 }
 0xe6e   : > { %v5638_v58 = vmul.f32 %v6726_v4, %v5312_v29 }
 0xe6f   : > { %v5647_v10 = vadd.f32 %v5639_v31, %v5615_v21 }
 0xe70   : > { %v5646_v55 = vadd.f32 %v5638_v58, %v5614_v57  ;;  %v7519_v59 = vpop.f32.mrb[136].mxu0  ;;  %v6732_v57 = vld [vmem:[%s10793_s16 + $0x4] ss:$0 sm:$0xff] }
 0xe71   : > { %v5657_v24 = vmul.f32 %v7519_v59, %v6728_v30  ;;  %v5322_v25 = vpop.f32.mrb[137].mxu0 }
 0xe72   : > { %v5656_v47 = vmul.f32 %v6728_v30, %v5322_v25 }
 0xe73   : > { %v5665_v49 = vadd.f32 %v5657_v24, %v5641_v22 }
 0xe74   : > { %v5664_v11 = vadd.f32 %v5656_v47, %v5640_v16  ;;  %v7522_v33 = vpop.f32.mrb[138].mxu0 }
 0xe75   : > { %v5659_v19 = vmul.f32 %v7522_v33, %v6728_v30  ;;  %v5332_v39 = vpop.f32.mrb[139].mxu0 }
 0xe76   : > { %v5658_v63 = vmul.f32 %v6728_v30, %v5332_v39 }
 0xe77   : > { %v5667_v14 = vadd.f32 %v5659_v19, %v5643_v15 }
 0xe78   : > { %v5666_v13 = vadd.f32 %v5658_v63, %v5642_v5  ;;  %v7525_v54 = vpop.f32.mrb[140].mxu0 }
 0xe79   : > { %v5661_v17 = vmul.f32 %v7525_v54, %v6728_v30  ;;  %v5342_v36 = vpop.f32.mrb[141].mxu0 }
 0xe7a   : > { %v5660_v44 = vmul.f32 %v6728_v30, %v5342_v36 }
 0xe7b   : > { %v5669_v6 = vadd.f32 %v5661_v17, %v5645_v26 }
 0xe7c   : > { %v5668_v20 = vadd.f32 %v5660_v44, %v5644_v53  ;;  %v7528_v12 = vpop.f32.mrb[142].mxu0 }
 0xe7d   : > { %v5663_v23 = vmul.f32 %v7528_v12, %v6728_v30  ;;  %v5352_v62 = vpop.f32.mrb[143].mxu0 }
 0xe7e   : > { %v5662_v4 = vmul.f32 %v6728_v30, %v5352_v62  ;;  %v6734_v62 = vld [vmem:[%s10793_s16 + $0x5] ss:$0 sm:$0xff] }
 0xe7f   : > { %v5671_v51 = vadd.f32 %v5663_v23, %v5647_v10 }
 0xe80   : > { %v5670_v27 = vadd.f32 %v5662_v4, %v5646_v55  ;;  %v7531_v22 = vpop.f32.mrb[144].mxu0 }
 0xe81   : > { %v5681_v16 = vmul.f32 %v7531_v22, %v6730_v46  ;;  %v5362_v38 = vpop.f32.mrb[145].mxu0 }
 0xe82   : > { %v5680_v9 = vmul.f32 %v6730_v46, %v5362_v38 }
 0xe83   : > { %v5689_v2 = vadd.f32 %v5681_v16, %v5665_v49 }
 0xe84   : > { %v5688_v1 = vadd.f32 %v5680_v9, %v5664_v11  ;;  %v7534_v37 = vpop.f32.mrb[146].mxu0 }
 0xe85   : > { %v5683_v8 = vmul.f32 %v7534_v37, %v6730_v46  ;;  %v5372_v15 = vpop.f32.mrb[147].mxu0 }
 0xe86   : > { %v5682_v5 = vmul.f32 %v6730_v46, %v5372_v15 }
 0xe87   : > { %v5691_v48 = vadd.f32 %v5683_v8, %v5667_v14 }
 0xe88   : > { %v5690_v35 = vadd.f32 %v5682_v5, %v5666_v13  ;;  %v7537_v43 = vpop.f32.mrb[148].mxu0 }
 0xe89   : > { %v5685_v3 = vmul.f32 %v7537_v43, %v6730_v46  ;;  %v5382_v52 = vpop.f32.mrb[149].mxu0 }
 0xe8a   : > { %v5684_v28 = vmul.f32 %v6730_v46, %v5382_v52 }
 0xe8b   : > { %v5693_v26 = vadd.f32 %v5685_v3, %v5669_v6 }
 0xe8c   : > { %v5692_v53 = vadd.f32 %v5684_v28, %v5668_v20  ;;  %v7540_v42 = vpop.f32.mrb[150].mxu0 }
 0xe8d   : > { %v5687_v21 = vmul.f32 %v7540_v42, %v6730_v46  ;;  %v5392_v31 = vpop.f32.mrb[151].mxu0  ;;  %v6736_v42 = vld [vmem:[%s10793_s16 + $0x6] ss:$0 sm:$0xff] }
 0xe8e   : > { %v5686_v29 = vmul.f32 %v6730_v46, %v5392_v31 }
 0xe8f   : > { %v5695_v58 = vadd.f32 %v5687_v21, %v5671_v51 }
 0xe90   : > { %v5694_v30 = vadd.f32 %v5686_v29, %v5670_v27  ;;  %v7543_v10 = vpop.f32.mrb[152].mxu0 }
 0xe91   : > { %v5705_v55 = vmul.f32 %v7543_v10, %v6732_v57  ;;  %v5402_v59 = vpop.f32.mrb[153].mxu0 }
 0xe92   : > { %v5704_v24 = vmul.f32 %v6732_v57, %v5402_v59 }
 0xe93   : > { %v5713_v25 = vadd.f32 %v5705_v55, %v5689_v2 }
 0xe94   : > { %v5712_v47 = vadd.f32 %v5704_v24, %v5688_v1  ;;  %v7546_v49 = vpop.f32.mrb[154].mxu0 }
 0xe95   : > { %v5707_v11 = vmul.f32 %v7546_v49, %v6732_v57  ;;  %v5412_v33 = vpop.f32.mrb[155].mxu0 }
 0xe96   : > { %v5706_v19 = vmul.f32 %v6732_v57, %v5412_v33 }
 0xe97   : > { %v5715_v39 = vadd.f32 %v5707_v11, %v5691_v48 }
 0xe98   : > { %v5714_v63 = vadd.f32 %v5706_v19, %v5690_v35  ;;  %v7549_v14 = vpop.f32.mrb[156].mxu0 }
 0xe99   : > { %v5709_v13 = vmul.f32 %v7549_v14, %v6732_v57  ;;  %v5422_v54 = vpop.f32.mrb[157].mxu0 }
 0xe9a   : > { %v5708_v17 = vmul.f32 %v6732_v57, %v5422_v54 }
 0xe9b   : > { %v5717_v36 = vadd.f32 %v5709_v13, %v5693_v26 }
 0xe9c   : > { %v5716_v44 = vadd.f32 %v5708_v17, %v5692_v53  ;;  %v7552_v6 = vpop.f32.mrb[158].mxu0 }
 0xe9d   : > { %v5711_v20 = vmul.f32 %v7552_v6, %v6732_v57  ;;  %v5432_v12 = vpop.f32.mrb[159].mxu0  ;;  %v6738_v6 = vld [vmem:[%s10793_s16 + $0x7] ss:$0 sm:$0xff] }
 0xe9e   : > { %v5710_v23 = vmul.f32 %v6732_v57, %v5432_v12 }
 0xe9f   : > { %v5719_v4 = vadd.f32 %v5711_v20, %v5695_v58 }
 0xea0   : > { %v5718_v46 = vadd.f32 %v5710_v23, %v5694_v30  ;;  %v7555_v45 = vpop.f32.mrb[160].mxu0 }
 0xea1   : > { %v5729_v32 = vmul.f32 %v7555_v45, %v6734_v62  ;;  %v5442_v51 = vpop.f32.mrb[161].mxu0 }
 0xea2   : > { %v5728_v27 = vmul.f32 %v6734_v62, %v5442_v51 }
 0xea3   : > { %v5737_v22 = vadd.f32 %v5729_v32, %v5713_v25 }
 0xea4   : > { %v5736_v16 = vadd.f32 %v5728_v27, %v5712_v47  ;;  %v7558_v38 = vpop.f32.mrb[162].mxu0 }
 0xea5   : > { %v5731_v9 = vmul.f32 %v7558_v38, %v6734_v62  ;;  %v5452_v2 = vpop.f32.mrb[163].mxu0 }
 0xea6   : > { %v5730_v1 = vmul.f32 %v6734_v62, %v5452_v2 }
 0xea7   : > { %v5739_v37 = vadd.f32 %v5731_v9, %v5715_v39 }
 0xea8   : > { %v5738_v8 = vadd.f32 %v5730_v1, %v5714_v63  ;;  %v7561_v15 = vpop.f32.mrb[164].mxu0 }
 0xea9   : > { %v5733_v5 = vmul.f32 %v7561_v15, %v6734_v62  ;;  %v5462_v48 = vpop.f32.mrb[165].mxu0 }
 0xeaa   : > { %v5732_v35 = vmul.f32 %v6734_v62, %v5462_v48 }
 0xeab   : > { %v5741_v43 = vadd.f32 %v5733_v5, %v5717_v36 }
 0xeac   : > { %v5740_v3 = vadd.f32 %v5732_v35, %v5716_v44  ;;  %v7564_v52 = vpop.f32.mrb[166].mxu0 }
 0xead   : > { %v5735_v28 = vmul.f32 %v7564_v52, %v6734_v62  ;;  %v5472_v26 = vpop.f32.mrb[167].mxu0  ;;  %v6740_v52 = vld [vmem:[%s10793_s16 + $0x8] ss:$0 sm:$0xff] }
 0xeae   : > { %v5734_v53 = vmul.f32 %v6734_v62, %v5472_v26 }
 0xeaf   : > { %v5743_v21 = vadd.f32 %v5735_v28, %v5719_v4 }
 0xeb0   : > { %v5742_v31 = vadd.f32 %v5734_v53, %v5718_v46  ;;  %v7567_v29 = vpop.f32.mrb[168].mxu0 }
 0xeb1   : > { %v5753_v57 = vmul.f32 %v7567_v29, %v6736_v42  ;;  %v5482_v58 = vpop.f32.mrb[169].mxu0 }
 0xeb2   : > { %v5752_v30 = vmul.f32 %v6736_v42, %v5482_v58 }
 0xeb3   : > { %v5761_v10 = vadd.f32 %v5753_v57, %v5737_v22 }
 0xeb4   : > { %v5760_v55 = vadd.f32 %v5752_v30, %v5736_v16  ;;  %v7570_v59 = vpop.f32.mrb[170].mxu0 }
 0xeb5   : > { %v5755_v24 = vmul.f32 %v7570_v59, %v6736_v42  ;;  %v5492_v25 = vpop.f32.mrb[171].mxu0 }
 0xeb6   : > { %v5754_v47 = vmul.f32 %v6736_v42, %v5492_v25 }
 0xeb7   : > { %v5763_v49 = vadd.f32 %v5755_v24, %v5739_v37 }
 0xeb8   : > { %v5762_v11 = vadd.f32 %v5754_v47, %v5738_v8  ;;  %v7573_v33 = vpop.f32.mrb[172].mxu0 }
 0xeb9   : > { %v5757_v19 = vmul.f32 %v7573_v33, %v6736_v42  ;;  %v5502_v39 = vpop.f32.mrb[173].mxu0 }
 0xeba   : > { %v5756_v63 = vmul.f32 %v6736_v42, %v5502_v39 }
 0xebb   : > { %v5765_v14 = vadd.f32 %v5757_v19, %v5741_v43 }
 0xebc   : > { %v5764_v13 = vadd.f32 %v5756_v63, %v5740_v3  ;;  %v7576_v54 = vpop.f32.mrb[174].mxu0 }
 0xebd   : > { %v5759_v17 = vmul.f32 %v7576_v54, %v6736_v42  ;;  %v5512_v36 = vpop.f32.mrb[175].mxu0 }
 0xebe   : > { %v5758_v44 = vmul.f32 %v6736_v42, %v5512_v36 }
 0xebf   : > { %v5767_v20 = vadd.f32 %v5759_v17, %v5743_v21 }
 0xec0   : > { %v5766_v12 = vadd.f32 %v5758_v44, %v5742_v31  ;;  %v7579_v23 = vpop.f32.mrb[176].mxu0 }
 0xec1   : > { %v5777_v62 = vmul.f32 %v7579_v23, %v6738_v6  ;;  %v5522_v4 = vpop.f32.mrb[177].mxu0 }
 0xec2   : > { %v5776_v46 = vmul.f32 %v6738_v6, %v5522_v4 }
 0xec3   : > { %v5785_v45 = vadd.f32 %v5777_v62, %v5761_v10 }
 0xec4   : > { %v5784_v32 = vadd.f32 %v5776_v46, %v5760_v55  ;;  %v7582_v51 = vpop.f32.mrb[178].mxu0 }
 0xec5   : > { %v5779_v27 = vmul.f32 %v7582_v51, %v6738_v6  ;;  %v5532_v22 = vpop.f32.mrb[179].mxu0 }
 0xec6   : > { %v5778_v16 = vmul.f32 %v6738_v6, %v5532_v22 }
 0xec7   : > { %v5787_v38 = vadd.f32 %v5779_v27, %v5763_v49 }
 0xec8   : > { %v5786_v9 = vadd.f32 %v5778_v16, %v5762_v11  ;;  %v7585_v2 = vpop.f32.mrb[180].mxu0 }
 0xec9   : > { %v5781_v1 = vmul.f32 %v7585_v2, %v6738_v6  ;;  %v5542_v37 = vpop.f32.mrb[181].mxu0 }
 0xeca   : > { %v5780_v8 = vmul.f32 %v6738_v6, %v5542_v37 }
 0xecb   : > { %v5789_v15 = vadd.f32 %v5781_v1, %v5765_v14 }
 0xecc   : > { %v5788_v5 = vadd.f32 %v5780_v8, %v5764_v13  ;;  %v7588_v48 = vpop.f32.mrb[182].mxu0 }
 0xecd   : > { %v5783_v35 = vmul.f32 %v7588_v48, %v6738_v6  ;;  %v5552_v43 = vpop.f32.mrb[183].mxu0 }
 0xece   : > { %v5782_v3 = vmul.f32 %v6738_v6, %v5552_v43 }
 0xecf   : > { %v5791_v28 = vadd.f32 %v5783_v35, %v5767_v20 }
 0xed0   : > { %v5790_v26 = vadd.f32 %v5782_v3, %v5766_v12  ;;  %v7591_v53 = vpop.f32.mrb[184].mxu0 }
 0xed1   : > { %v5801_v42 = vmul.f32 %v7591_v53, %v6740_v52  ;;  %v5562_v21 = vpop.f32.mrb[185].mxu0 }
 0xed2   : > { %v5800_v31 = vmul.f32 %v6740_v52, %v5562_v21 }
 0xed3   : > { %v10541_v29 = vadd.f32 %v5801_v42, %v5785_v45 }
 0xed4   : > { %v10543_v57 = vadd.f32 %v5800_v31, %v5784_v32  ;;  %v7594_v58 = vpop.f32.mrb[186].mxu0 }
 0xed5   : > { %v5817_v30 = vmul.f32 %v10541_v29, %v10541_v29  ;;  %v5803_v10 = vmul.f32 %v7594_v58, %v6740_v52  ;;  %v5572_v55 = vpop.f32.mrb[187].mxu0 }
 0xed6   : > { %v5816_v59 = vmul.f32 %v10543_v57, %v10543_v57  ;;  %v5802_v24 = vmul.f32 %v6740_v52, %v5572_v55 }
 0xed7   : > { %v5825_v25 = vmul.f32 %v5817_v30, %v10541_v29  ;;  %v10550_v47 = vadd.f32 %v5803_v10, %v5787_v38 }
 0xed8   : > { %v5824_v49 = vmul.f32 %v5816_v59, %v10543_v57  ;;  %v10553_v11 = vadd.f32 %v5802_v24, %v5786_v9  ;;  %v7597_v33 = vpop.f32.mrb[188].mxu0 }
 0xed9   : > { %v5833_v19 = vmul.f32 0.044715, %v5825_v25  ;;  %v5819_v39 = vmul.f32 %v10550_v47, %v10550_v47  ;;  %v5805_v63 = vmul.f32 %v7597_v33, %v6740_v52  ;;  %v5582_v14 = vpop.f32.mrb[189].mxu0 }
 0xeda   : > { %v5832_v13 = vmul.f32 0.044715, %v5824_v49  ;;  %v5818_v54 = vmul.f32 %v10553_v11, %v10553_v11  ;;  %v5804_v17 = vmul.f32 %v6740_v52, %v5582_v14 }
 0xedb   : > { %v5841_v36 = vadd.f32 %v5833_v19, %v10541_v29  ;;  %v5827_v44 = vmul.f32 %v5819_v39, %v10550_v47  ;;  %v10561_v6 = vadd.f32 %v5805_v63, %v5789_v15 }
 0xedc   : > { %v5840_v20 = vadd.f32 %v5832_v13, %v10543_v57  ;;  %v5826_v12 = vmul.f32 %v5818_v54, %v10553_v11  ;;  %v10565_v23 = vadd.f32 %v5804_v17, %v5788_v5  ;;  %v7600_v62 = vpop.f32.mrb[190].mxu0  ;;  %v6042_v13 = vld [vmem:[%s10796_s19 + $0x10] sm:$0xff]  ;;  %v6043_v54 = vld [vmem:[%s10796_s19 + $0x18] sm:$0xff] }
 0xedd   : > { %v5849_v4 = vmul.f32 0.7978846, %v5841_v36  ;;  %v5835_v46 = vmul.f32 0.044715, %v5827_v44  ;;  %v5821_v45 = vmul.f32 %v10561_v6, %v10561_v6  ;;  %v5807_v32 = vmul.f32 %v7600_v62, %v6740_v52  ;;  %v5592_v51 = vpop.f32.mrb[191].mxu0 }
 0xede   : > { %v5848_v27 = vmul.f32 0.7978846, %v5840_v20  ;;  %v5834_v22 = vmul.f32 0.044715, %v5826_v12  ;;  %v5820_v16 = vmul.f32 %v10565_v23, %v10565_v23  ;;  %v5806_v38 = vmul.f32 %v6740_v52, %v5592_v51 }
 0xedf   : > { %8149 = vtanh.f32 %v5849_v4  ;;  %v5843_v9 = vadd.f32 %v5835_v46, %v10550_v47  ;;  %v5829_v2 = vmul.f32 %v5821_v45, %v10561_v6  ;;  %v10573_v1 = vadd.f32 %v5807_v32, %v5791_v28 }
 0xee0   : > { %8151 = vtanh.f32 %v5848_v27  ;;  %v5842_v37 = vadd.f32 %v5834_v22, %v10553_v11  ;;  %v5828_v8 = vmul.f32 %v5820_v16, %v10565_v23  ;;  %v10577_v15 = vadd.f32 %v5806_v38, %v5790_v26 }
 0xee1   : > { %v5851_v5 = vmul.f32 0.7978846, %v5843_v9  ;;  %v5837_v48 = vmul.f32 0.044715, %v5829_v2  ;;  %v5823_v35 = vmul.f32 %v10573_v1, %v10573_v1  ;;  %v7878_v4 = vpack.c.bf16 %v6043_v54, %v6042_v13  ;;  %v6282_v13 = vld [vmem:[%s10798_s21 + $0x38] sm:$0xff] }
 0xee2   : > { %v5850_v43 = vmul.f32 0.7978846, %v5842_v37  ;;  %v5836_v3 = vmul.f32 0.044715, %v5828_v8  ;;  %v5822_v52 = vmul.f32 %v10577_v15, %v10577_v15 }
 0xee3   : > { %8153 = vtanh.f32 %v5851_v5  ;;  %v5845_v28 = vadd.f32 %v5837_v48, %v10561_v6  ;;  %v5831_v53 = vmul.f32 %v5823_v35, %v10573_v1 }
 0xee4   : > { %8155 = vtanh.f32 %v5850_v43  ;;  %v5844_v42 = vadd.f32 %v5836_v3, %v10565_v23  ;;  %v5830_v26 = vmul.f32 %v5822_v52, %v10577_v15 }
 0xee5   : > { %v5853_v21 = vmul.f32 0.7978846, %v5845_v28  ;;  %v5839_v31 = vmul.f32 0.044715, %v5831_v53 }
 0xee6   : > { %v5852_v58 = vmul.f32 0.7978846, %v5844_v42  ;;  %v5838_v30 = vmul.f32 0.044715, %v5830_v26 }
 0xee7   : > { %8157 = vtanh.f32 %v5853_v21  ;;  %v5847_v10 = vadd.f32 %v5839_v31, %v10573_v1 }
 0xee8   : > { %8159 = vtanh.f32 %v5852_v58  ;;  %v5846_v55 = vadd.f32 %v5838_v30, %v10577_v15 }
 0xee9   : > { %v8150_v59 = vpop.eup %8149  ;;  %v5855_v24 = vmul.f32 0.7978846, %v5847_v10 }
 0xeea   : > { %v8152_v25 = vpop.eup %8151  ;;  %v5865_v49 = vadd.f32 1.0, %v8150_v59  ;;  %v5854_v33 = vmul.f32 0.7978846, %v5846_v55 }
 0xeeb   : > { %8161 = vtanh.f32 %v5855_v24  ;;  %v5864_v19 = vadd.f32 1.0, %v8152_v25 }
 0xeec   : > { %v5873_v39 = vmul.f32 0.5, %v5865_v49  ;;  %8163 = vtanh.f32 %v5854_v33 }
 0xeed   : > { %v8154_v63 = vpop.eup %8153  ;;  %v5872_v14 = vmul.f32 0.5, %v5864_v19  ;;  %v6279_v19 = vld [vmem:[%s10798_s21 + $0x20] sm:$0xff] }
 0xeee   : > { %v8156_v17 = vpop.eup %8155  ;;  %v5867_v36 = vadd.f32 1.0, %v8154_v63  ;;  %v5881_v12 = vmul.f32 %v5873_v39, %v10541_v29  ;;  %v6280_v39 = vld [vmem:[%s10798_s21 + $0x28] sm:$0xff] }
 0xeef   : > { %v5880_v44 = vmul.f32 %v5872_v14, %v10543_v57  ;;  %v5866_v20 = vadd.f32 1.0, %v8156_v17  ;;  %v7889_v63 = vpack.c.bf16 %v6280_v39, %v6279_v19  ;;  %v6281_v14 = vld [vmem:[%s10798_s21 + $0x30] sm:$0xff]  ;;  %v8248_v17 = vmov 0.0  }
 0xef0   : > { %v5875_v62 = vmul.f32 0.5, %v5867_v36  ;;  %v7892_v54 = vpack.c.bf16 %v6282_v13, %v6281_v14  ;;  %v6750_v36 = vld [vmem:[%s10797_s20] ss:$0 sm:$0xff] }
 0xef1   : > { %v8158_v46 = vpop.eup %8157  ;;  %7617 = vmatprep.mubr.msk.f32.mxu1 %vm3406_vm6, %v5880_v44  ;;  %v5874_v45 = vmul.f32 0.5, %v5866_v20 }
 0xef2   : > { %v8160_v32 = vpop.eup %8159  ;;  %7618 = vmatmul.mubr.msk.f32.vlgmr.msra.gmra.mrb[180].mxu1 %vm3406_vm6, %v5881_v12  ;;  %v5869_v51 = vadd.f32 1.0, %v8158_v46  ;;  %v5883_v57 = vmul.f32 %v5875_v62, %v10550_v47 }
 0xef3   : > { %v5882_v27 = vmul.f32 %v5874_v45, %v10553_v11  ;;  %v5868_v22 = vadd.f32 1.0, %v8160_v32  ;;  %7877 = vmatpush3.bf16.msra.mxu1 %v10523_v60 }
 0xef4   : > { %v5877_v16 = vmul.f32 0.5, %v5869_v51  ;;  %7879 = vmatprep.subr.bf16.mxu1 %v7878_v4 }
 0xef5   : > { %v8162_v29 = vpop.eup %8161  ;;  %7620 = vmatprep.mubr.msk.f32.mxu1 %vm3406_vm6, %v5882_v27  ;;  %v5876_v38 = vmul.f32 0.5, %v5868_v22 }
 0xef6   : > { %v8164_v9 = vpop.eup %8163  ;;  %7621 = vmatmul.mubr.msk.f32.gmra.mrb[182].mxu1 %vm3406_vm6, %v5883_v57  ;;  %v5871_v2 = vadd.f32 1.0, %v8162_v29  ;;  %v5885_v11 = vmul.f32 %v5877_v16, %v10561_v6  ;;  %v6741_v6 = vld [vmem:[%s10795_s18] ss:$0 sm:$0xff] }
 0xef7   : > { %v5884_v37 = vmul.f32 %v5876_v38, %v10565_v23  ;;  %v5870_v8 = vadd.f32 1.0, %v8164_v9  ;;  %7881 = vmatpush3.bf16.msra.mxu1 %v7878_v4 }
 0xef8   : > { %v5879_v5 = vmul.f32 0.5, %v5871_v2  ;;  %7882 = vmatprep.subr.bf16.mxu1 %v8246_v7 }
 0xef9   : > { %7623 = vmatprep.mubr.msk.f32.mxu1 %vm3406_vm6, %v5884_v37  ;;  %v5878_v60 = vmul.f32 0.5, %v5870_v8 }
 0xefa   : > { %7624 = vmatmul.mubr.msk.f32.gmra.mrb[184].mxu1 %vm3406_vm6, %v5885_v11  ;;  %v5887_v48 = vmul.f32 %v5879_v5, %v10573_v1 }
 0xefb   : > { %v5886_v47 = vmul.f32 %v5878_v60, %v10577_v15 }
 0xefd   : > { %7626 = vmatprep.mubr.msk.f32.mxu1 %vm3406_vm6, %v5886_v47 }
 0xefe   : > { %7627 = vmatmul.mubr.msk.f32.gmra.mrb[186].mxu1 %vm3406_vm6, %v5887_v48 }
 0xfc5   : > { %v7619_v23 = vpop.f32.mrb[180].mxu1 }
 0xfc6   : > { %v5999_v35 = vadd.f32 %v7619_v23, %v6741_v6  ;;  %v5993_v43 = vpop.f32.mrb[181].mxu1 }
 0xfc7   : > { %v5994_v3 = vadd.f32 %v6741_v6, %v5993_v43 }
 0xfc8   : > { %v6033_v53 = vadd.f32 %v5999_v35, %v10098_v56 }
 0xfc9   : > { %v6032_v52 = vadd.f32 %v5994_v3, %v10095_v0  ;;  %v7622_v28 = vpop.f32.mrb[182].mxu1 }
 0xfca   : > { %v6009_v15 = vadd.f32 %v7622_v28, %v6741_v6  ;;  %v6003_v42 = vpop.f32.mrb[183].mxu1 }
 0xfcb   : > { %v6004_v1 = vadd.f32 %v6741_v6, %v6003_v42  ;;  %7637 = vmatprep.mubr.msk.f32.mxu1 %vm2851_vm5, %v6032_v52 }
 0xfcc   : > { %7638 = vmatmul.mubr.msk.f32.vlgmr.msra.gmra.mrb[188].mxu1 %vm2851_vm5, %v6033_v53  ;;  %v6035_v31 = vadd.f32 %v6009_v15, %v10108_v34 }
 0xfcd   : > { %v6034_v26 = vadd.f32 %v6004_v1, %v10105_v50  ;;  %v7625_v21 = vpop.f32.mrb[184].mxu1 }
 0xfce   : > { %v6019_v58 = vadd.f32 %v7625_v21, %v6741_v6  ;;  %v6013_v30 = vpop.f32.mrb[185].mxu1 }
 0xfcf   : > { %v6014_v10 = vadd.f32 %v6741_v6, %v6013_v30  ;;  %7640 = vmatprep.mubr.msk.f32.mxu1 %vm2851_vm5, %v6034_v26 }
 0xfd0   : > { %7641 = vmatmul.mubr.msk.f32.gmra.mrb[190].mxu1 %vm2851_vm5, %v6035_v31  ;;  %v6037_v55 = vadd.f32 %v6019_v58, %v10118_v40  ;;  %v6276_v40 = vld [vmem:[%s10798_s21 + $0x8] sm:$0xff] }
 0xfd1   : > { %v6036_v0 = vadd.f32 %v6014_v10, %v10115_v18  ;;  %v7628_v56 = vpop.f32.mrb[186].mxu1  ;;  %v6275_v18 = vld [vmem:[%s10798_s21] sm:$0xff] }
 0xfd2   : > { %v6029_v59 = vadd.f32 %v7628_v56, %v6741_v6  ;;  %v6023_v24 = vpop.f32.mrb[187].mxu1  ;;  %v7883_v49 = vpack.c.bf16 %v6276_v40, %v6275_v18 }
 0xfd3   : > { %v6024_v25 = vadd.f32 %v6741_v6, %v6023_v24  ;;  %7643 = vmatprep.mubr.msk.f32.mxu1 %vm2851_vm5, %v6036_v0 }
 0xfd4   : > { %7644 = vmatmul.mubr.msk.f32.gmra.mrb[192].mxu1 %vm2851_vm5, %v6037_v55  ;;  %v6039_v34 = vadd.f32 %v6029_v59, %v10128_v41  ;;  %v6278_v41 = vld [vmem:[%s10798_s21 + $0x18] sm:$0xff] }
 0xfd5   : > { %v6038_v50 = vadd.f32 %v6024_v25, %v10125_v61  ;;  %7884 = vmatpush3.bf16.msra.mxu1 %v7883_v49  ;;  %v6277_v61 = vld [vmem:[%s10798_s21 + $0x10] sm:$0xff] }
 0xfd6   : > { %7885 = vmatprep.subr.bf16.mxu1 %v8246_v7  ;;  %v7886_v33 = vpack.c.bf16 %v6278_v41, %v6277_v61 }
 0xfd7   : > { %7646 = vmatprep.mubr.msk.f32.mxu1 %vm2851_vm5, %v6038_v50 }
 0xfd8   : > { %7647 = vmatmul.mubr.msk.f32.gmra.mrb[194].mxu1 %vm2851_vm5, %v6039_v34 }
 0xfd9   : > { %7887 = vmatpush3.bf16.msra.mxu1 %v7886_v33  ;;  %7665 = vmatprep.mubr.msk.f32.mxu1 %vm8247_vm7, %v8248_v17 }
 0xfda   : > { %7888 = vmatprep.subr.bf16.mxu1 %v8246_v7 }
 0xfdd   : > { %7890 = vmatpush3.bf16.msra.mxu1 %v7889_v63 }
 0xfde   : > { %7891 = vmatprep.subr.bf16.mxu1 %v8246_v7 }
 0xfe1   : > { %7893 = vmatpush3.bf16.msra.mxu1 %v7892_v54 }
0x109f   : > { %v7639_v44 = vpop.f32.mrb[188].mxu1 }
0x10a0   : > { %v10662_v20 = vadd.f32 %v7639_v44, %v6750_v36  ;;  %v6141_v12 = vpop.f32.mrb[189].mxu1 }
0x10a1   : > { %v10664_v62 = vadd.f32 %v6750_v36, %v6141_v12 }
0x10a2   : > { %v6181_v4 = vmul.f32 %v10662_v20, %v10662_v20 }
0x10a3   : > { %v6180_v7 = vmul.f32 %v10664_v62, %v10664_v62  ;;  %v7642_v46 = vpop.f32.mrb[190].mxu1 }
0x10a4   : > { %v6189_v45 = vmul.f32 %v6181_v4, %v10662_v20  ;;  %v10671_v32 = vadd.f32 %v7642_v46, %v6750_v36  ;;  %v6151_v51 = vpop.f32.mrb[191].mxu1 }
0x10a5   : > { %v6188_v27 = vmul.f32 %v6180_v7, %v10664_v62  ;;  %v10674_v22 = vadd.f32 %v6750_v36, %v6151_v51 }
0x10a6   : > { %v6197_v57 = vmul.f32 0.044715, %v6189_v45  ;;  %v6183_v16 = vmul.f32 %v10671_v32, %v10671_v32 }
0x10a7   : > { %v6196_v29 = vmul.f32 0.044715, %v6188_v27  ;;  %v6182_v38 = vmul.f32 %v10674_v22, %v10674_v22  ;;  %v7645_v9 = vpop.f32.mrb[192].mxu1 }
0x10a8   : > { %v6205_v2 = vadd.f32 %v6197_v57, %v10662_v20  ;;  %v6191_v37 = vmul.f32 %v6183_v16, %v10671_v32  ;;  %v10682_v8 = vadd.f32 %v7645_v9, %v6750_v36  ;;  %v6161_v11 = vpop.f32.mrb[193].mxu1 }
0x10a9   : > { %v6204_v5 = vadd.f32 %v6196_v29, %v10664_v62  ;;  %v6190_v60 = vmul.f32 %v6182_v38, %v10674_v22  ;;  %v10686_v47 = vadd.f32 %v6750_v36, %v6161_v11 }
0x10aa   : > { %v6213_v48 = vmul.f32 0.7978846, %v6205_v2  ;;  %v6199_v6 = vmul.f32 0.044715, %v6191_v37  ;;  %v6185_v23 = vmul.f32 %v10682_v8, %v10682_v8 }
0x10ab   : > { %v6212_v35 = vmul.f32 0.7978846, %v6204_v5  ;;  %v6198_v43 = vmul.f32 0.044715, %v6190_v60  ;;  %v6184_v3 = vmul.f32 %v10686_v47, %v10686_v47  ;;  %v7648_v52 = vpop.f32.mrb[194].mxu1 }
0x10ac   : > { %8165 = vtanh.f32 %v6213_v48  ;;  %v6207_v28 = vadd.f32 %v6199_v6, %v10671_v32  ;;  %v6193_v53 = vmul.f32 %v6185_v23, %v10682_v8  ;;  %v10694_v15 = vadd.f32 %v7648_v52, %v6750_v36  ;;  %v6171_v42 = vpop.f32.mrb[195].mxu1 }
0x10ad   : > { %8167 = vtanh.f32 %v6212_v35  ;;  %v6206_v1 = vadd.f32 %v6198_v43, %v10674_v22  ;;  %v6192_v26 = vmul.f32 %v6184_v3, %v10686_v47  ;;  %v10698_v21 = vadd.f32 %v6750_v36, %v6171_v42 }
0x10ae   : > { %v6215_v31 = vmul.f32 0.7978846, %v6207_v28  ;;  %v6201_v58 = vmul.f32 0.044715, %v6193_v53  ;;  %v6187_v30 = vmul.f32 %v10694_v15, %v10694_v15 }
0x10af   : > { %v6214_v10 = vmul.f32 0.7978846, %v6206_v1  ;;  %v6200_v0 = vmul.f32 0.044715, %v6192_v26  ;;  %v6186_v56 = vmul.f32 %v10698_v21, %v10698_v21 }
0x10b0   : > { %8169 = vtanh.f32 %v6215_v31  ;;  %v6209_v55 = vadd.f32 %v6201_v58, %v10682_v8  ;;  %v6195_v59 = vmul.f32 %v6187_v30, %v10694_v15 }
0x10b1   : > { %8171 = vtanh.f32 %v6214_v10  ;;  %v6208_v24 = vadd.f32 %v6200_v0, %v10686_v47  ;;  %v6194_v25 = vmul.f32 %v6186_v56, %v10698_v21 }
0x10b2   : > { %v6217_v50 = vmul.f32 0.7978846, %v6209_v55  ;;  %v6203_v34 = vmul.f32 0.044715, %v6195_v59 }
0x10b3   : > { %v6216_v18 = vmul.f32 0.7978846, %v6208_v24  ;;  %v6202_v40 = vmul.f32 0.044715, %v6194_v25 }
0x10b4   : > { %8173 = vtanh.f32 %v6217_v50  ;;  %v6211_v49 = vadd.f32 %v6203_v34, %v10694_v15 }
0x10b5   : > { %8175 = vtanh.f32 %v6216_v18  ;;  %v6210_v61 = vadd.f32 %v6202_v40, %v10698_v21 }
0x10b6   : > { %v8166_v41 = vpop.eup %8165  ;;  %v6219_v33 = vmul.f32 0.7978846, %v6211_v49 }
0x10b7   : > { %v8168_v19 = vpop.eup %8167  ;;  %v6229_v39 = vadd.f32 1.0, %v8166_v41  ;;  %v6218_v63 = vmul.f32 0.7978846, %v6210_v61 }
0x10b8   : > { %v6228_v14 = vadd.f32 1.0, %v8168_v19  ;;  %8177 = vtanh.f32 %v6219_v33 }
0x10b9   : > { %v6237_v13 = vmul.f32 0.5, %v6229_v39  ;;  %8179 = vtanh.f32 %v6218_v63 }
0x10ba   : > { %v8170_v54 = vpop.eup %8169  ;;  %v6236_v17 = vmul.f32 0.5, %v6228_v14 }
0x10bb   : > { %v8172_v36 = vpop.eup %8171  ;;  %v6245_v44 = vmul.f32 %v6237_v13, %v10662_v20  ;;  %v6231_v12 = vadd.f32 1.0, %v8170_v54 }
0x10bc   : > { %v6244_v4 = vmul.f32 %v6236_v17, %v10664_v62  ;;  %v6230_v7 = vadd.f32 1.0, %v8172_v36 }
0x10bd   : > { %v6253_v46 = vsel %vm3406_vm6, %v6245_v44, 0.0  ;;  %v6239_v45 = vmul.f32 0.5, %v6231_v12 }
0x10be   : > { %v8174_v51 = vpop.eup %8173  ;;  %v6252_v27 = vsel %vm3406_vm6, %v6244_v4, 0.0  ;;  %v6238_v57 = vmul.f32 0.5, %v6230_v7 }
0x10bf   : > { %v8176_v16 = vpop.eup %8175  ;;  %v6254_v29 = vadd.f32 %v6253_v46, %v6252_v27  ;;  %v6233_v38 = vadd.f32 1.0, %v8174_v51  ;;  %v6247_v9 = vmul.f32 %v6239_v45, %v10671_v32 }
0x10c0   : > { %v6246_v2 = vmul.f32 %v6238_v57, %v10674_v22  ;;  %v6232_v37 = vadd.f32 1.0, %v8176_v16 }
0x10c1   : > { %v6241_v20 = vmul.f32 0.5, %v6233_v38  ;;  %v6257_v23 = vsel %vm3406_vm6, %v6247_v9, 0.0 }
0x10c2   : > { %v8178_v11 = vpop.eup %8177  ;;  %v6255_v62 = vsel %vm3406_vm6, %v6246_v2, 0.0  ;;  %v6240_v5 = vmul.f32 0.5, %v6232_v37 }
0x10c3   : > { %v8180_v60 = vpop.eup %8179  ;;  %v6256_v48 = vadd.f32 %v6255_v62, %v6254_v29  ;;  %v6235_v6 = vadd.f32 1.0, %v8178_v11  ;;  %v6249_v35 = vmul.f32 %v6241_v20, %v10682_v8 }
0x10c4   : > { %v6248_v43 = vmul.f32 %v6240_v5, %v10686_v47  ;;  %v6234_v3 = vadd.f32 1.0, %v8180_v60 }
0x10c5   : > { %v6258_v52 = vadd.f32 %v6257_v23, %v6256_v48  ;;  %v6243_v32 = vmul.f32 0.5, %v6235_v6  ;;  %v6261_v42 = vsel %vm3406_vm6, %v6249_v35, 0.0 }
0x10c6   : > { %v6259_v22 = vsel %vm3406_vm6, %v6248_v43, 0.0  ;;  %v6242_v28 = vmul.f32 0.5, %v6234_v3 }
0x10c7   : > { %v6260_v53 = vadd.f32 %v6259_v22, %v6258_v52  ;;  %v6251_v1 = vmul.f32 %v6243_v32, %v10694_v15  ;;  %v6283_v15 = vld [vmem:[%s10799_s22] sm:$0x1] }
0x10c8   : > { %v6250_v26 = vmul.f32 %v6242_v28, %v10698_v21 }
0x10c9   : > { %v6262_v31 = vadd.f32 %v6261_v42, %v6260_v53  ;;  %v6265_v47 = vsel %vm3406_vm6, %v6251_v1, 0.0 }
0x10ca   : > { %v6263_v8 = vsel %vm3406_vm6, %v6250_v26, 0.0 }
0x10cb   : > { %v6264_v58 = vadd.f32 %v6263_v8, %v6262_v31 }
0x10cd   : > { %v6266_v30 = vadd.f32 %v6265_v47, %v6264_v58 }
0x10cf   : > { %v6267_v10 = vrot.slane %v6266_v30, 4 }
0x10d1   : > { %v6268_v0 = vadd.f32 %v6267_v10, %v6266_v30 }
0x10d3   : > { %v6269_v56 = vrot.slane %v6268_v0, 2 }
0x10d5   : > { %v6270_v55 = vadd.f32 %v6269_v56, %v6268_v0 }
0x10d7   : > { %v6271_v59 = vrot.slane %v6270_v55, 1 }
0x10d9   : > { %v6272_v24 = vadd.f32 %v6271_v59, %v6270_v55 }
0x10db   : > { %v6274_v25 = vmul.f32 0.015625, %v6272_v24 }
0x10dd   : > { %7666 = vmatmul.mubr.msk.f32.vlgmr.msra.gmra.mrb[196].mxu1 %vm3406_vm6, %v6274_v25 }
0x11b0   : > { %v6353_v21 = vpop.f32.mrb[196].mxu1 }
0x11b1   : > { %v6354_v50 = vadd.f32 %v6353_v21, %v6283_v15  ;;  %v7667_v34 = vpop.f32.mrb[197].mxu1 }
0x11b3   : > { %6357 = vst [vmem:[%s702_s27] sm:$0x1] %v6354_v50 }
0x11b4   : > { %8194 = shalt.err (!%p8191_p3)
}
0x11b5   : > { %s8195_s0 = scalar_lea.hbm %s10735_s9, 16  ;;  %s8199_s4 = scalar_lea.hbm %s10800_s23, 32 }
0x11b6   : > { %p8196_p4 = scmp.ne.s32.totalorder %s10735_s9, %s8195_s0  ;;  %p8200_p9 = scmp.lt.u32.totalorder %s10735_s9, %s10800_s23 }
0x11b7   : > { %p8201_p10 = scmp.lt.u32.totalorder %s8199_s4, %s8195_s0  ;;  %p8203_p12 = scmp.lt.u32.totalorder %s8195_s0, %s10735_s9 }
0x11b8   : > { %p8197_p7 = pnand %p8196_p4, %p8408_p5 }
0x11b9   : > { %p8202_p11 = por %p8201_p10, %p8200_p9 }
0x11ba   : > { %p8198_p8 = pneg %p8197_p7 }
0x11bb   : > { %p8204_p13 = por %p8203_p12, %p8202_p11 }
0x11bd   : > { %p8205_p0 = pnand %p8204_p13, %p8198_p8 }
0x11bf   : > { %8208 = shalt.err (!%p8205_p0)
}
0x11c0   : > { %7914 = dma.vmem_to_hbm [thread:$0]  (%p8408_p5), %s10737_s1, 16, %s10735_s9, %s6359_s2  }
0x11c1 PF: > { %s10842_s8 = sld [smem:[#allocation5_spill]]  ;;  %p7920_p1 = scmp.ge.s32.totalorder %s8243_s25, 2 }
0x11c3   : > { %p7917_p2 = pnand %p7920_p1, %p8412_p6 }
0x11c7   : > { %s6383_s24 = sand.u32 1, %s10842_s8  }
0x11c8   : > { %s6384_s3 = scalar_lea.sflag [#allocation3], %s6383_s24 }
0x11c9   : > { %8226 = dma.done.wait (!%p7917_p2), %s6384_s3, 16  }
0x11ca   : > { %8228 = vsyncadd (!%p7917_p2), %s6384_s3, 4294967280  ;;  %s10844_s25 = sld [smem:[#allocation7_spill]]  ;;  %s10845_s0 = sld [smem:[#allocation6_spill]] }
0x11cb   : > { %s10846_s24 = sld [smem:[#allocation8_spill]]  ;;  %s10847_s4 = smov %s8235_s30 }
0x11d0   : > { %p33_p3 = scmp.ge.s32.totalorder %s10844_s25, 4   ;;  %s10848_s30 = smov %s10845_s0 }
0x11d2   :  { %35 = sbr.rel (!%p33_p3) target bundleno = 14 (0xe), region = 174 }
0x11d9   :  { %6388 = vsyncpa [#allocation3], 1 }
0x11da   :  { %6390 = vsyncpa [#allocation3 + $0x1], 1 }

</bundles_post_ra>
